<compile_context>
chip_gen: v7x
topology: tpu7x:2x2x1
jax: 0.10.0
libtpu: 0.0.40
codegen_flags: <defaults>
</compile_context>

<pallas_src>
import functools

import jax
import jax.numpy as jnp
from jax import lax
from jax.experimental import pallas as pl
from jax.experimental.pallas import tpu as pltpu

LRELU_SLOPE = 0.2
BN_EPS = 1e-5

_MIB = 1024 * 1024
_RESIDENT_W_BYTES = 4 * _MIB     # weights <= this stay fully VMEM-resident (tk = Kp)
_VMEM_BUDGET = 30 * _MIB         # per-call working-set target (v7x-safe)


def _round_up(x, m):
    return ((x + m - 1) // m) * m


def _vmem_estimate(tm, tk, Np, out_bytes):
    return (2 * tm * tk * 2             # A tile (bf16, double-buffered)
            + 2 * tk * Np * 2           # B tile (bf16, double-buffered)
            + tm * Np * 4               # f32 accumulator scratch (worst case)
            + 2 * tm * Np * out_bytes)  # output tile (double-buffered)


def _pick_tiles(M, Kp, Np, out_bytes):
    """Row tile tm, padded row count Mp, K tile tk."""
    # Single K block whenever the bf16 weight slab is small enough to keep fully
    # VMEM-resident (constant block index -> fetched once, no re-stream across row
    # tiles, no accumulator pass).  Otherwise stream K in 2048-wide tiles.
    if Kp * Np * 2 <= _RESIDENT_W_BYTES:
        tk = Kp
    else:
        tk = 2048
        while Kp % tk:
            tk -= 128
    # Big row tiles (all layers are HBM-bound), but keep >= 2 row tiles when M
    # allows (megacore / v7x's two TensorCores) and stay inside the VMEM budget.
    m8 = _round_up(M, 8)
    tm = min(1024, _round_up(max(m8 // 2, 8), 8))
    while tm > 8 and _vmem_estimate(tm, tk, Np, out_bytes) > _VMEM_BUDGET:
        tm = _round_up(max(tm // 2, 8), 8)
    Mp = _round_up(m8, tm)
    return tm, Mp, tk


# ---------------------------------------------------------------------------
# Fused kernel: [prev-layer BN affine + LeakyReLU prologue] -> conv matmul
#               (optionally K-tiled with an f32 accumulator) -> [epilogue]
#               + optional per-channel sum / sum-of-squares for the next BN.
# ---------------------------------------------------------------------------
def _fused_conv_kernel(*refs, apply_prologue, epilogue, compute_stats, n_k,
                       m_valid, tm):
    it = iter(refs)
    a_ref = next(it)
    b_ref = next(it)
    sc_ref = sh_ref = None
    if apply_prologue:
        sc_ref = next(it)
        sh_ref = next(it)
    o_ref = next(it)
    stats_ref = next(it) if compute_stats else None
    acc_ref = next(it) if n_k > 1 else None

    # program_id must be read at kernel top level (NOT inside pl.when bodies).
    i = pl.program_id(0)
    k = pl.program_id(1)
    row_base = i * tm

    if apply_prologue:
        # Previous layer's BatchNorm affine (per im2col column) + LeakyReLU fused
        # into this conv's operand load.  f32 on the VPU (safe on v5e too).
        a = a_ref[...].astype(jnp.float32)
        a = a * sc_ref[pl.ds(k, 1), :] + sh_ref[pl.ds(k, 1), :]
        a = jnp.where(a > 0, a, LRELU_SLOPE * a).astype(jnp.bfloat16)
    else:
        a = a_ref[...]          # already bf16 — no f32 round-trip

    part = jnp.dot(a, b_ref[...], preferred_element_type=jnp.float32)

    def finalize(y):
        if compute_stats:
            # Partial per-channel sum / sum-of-squares of the *raw* conv output for
            # the next BatchNorm, masked to valid rows.  (1, 2, OCp) per row tile.
            row = row_base + lax.broadcasted_iota(jnp.int32, y.shape, 0)
            ym = jnp.where(row < m_valid, y, 0.0)
            stats_ref[0, 0:1, :] = jnp.sum(ym, axis=0, keepdims=True)
            stats_ref[0, 1:2, :] = jnp.sum(ym * ym, axis=0, keepdims=True)
        if epilogue == "lrelu":
            y = jnp.where(y > 0, y, LRELU_SLOPE * y)
        elif epilogue == "sigmoid":
            # Numerically stable sigmoid.
            z = jnp.exp(-jnp.abs(y))
            y = jnp.where(y >= 0, 1.0 / (1.0 + z), z / (1.0 + z))
        o_ref[...] = y.astype(o_ref.dtype)

    if n_k == 1:
        # Weight fully resident, no K accumulation pass needed.
        finalize(part)
    else:
        @pl.when(k == 0)
        def _():
            acc_ref[...] = jnp.zeros_like(acc_ref)

        acc_ref[...] += part

        @pl.when(k == n_k - 1)
        def _():
            finalize(acc_ref[...])


# ---------------------------------------------------------------------------
# JAX glue: im2col patch extraction (bf16), one fused pallas_call per layer
# ---------------------------------------------------------------------------
def _im2col(x, kh, kw, stride, pad):
    # TODO(synk): move patch extraction into the kernel (strided DMA windows from a
    # pl.ANY-space input) to avoid materializing ~kh*kw/stride^2 x the activation.
    N, H, W, C = x.shape
    xp = jnp.pad(x, ((0, 0), (pad, pad), (pad, pad), (0, 0)))
    OH = (H + 2 * pad - kh) // stride + 1
    OW = (W + 2 * pad - kw) // stride + 1
    cols = []
    for i in range(kh):
        for j in range(kw):
            cols.append(xp[:, i:i + stride * OH:stride, j:j + stride * OW:stride, :])
    patches = jnp.stack(cols, axis=3).reshape(N, OH, OW, kh * kw * C)
    return patches.reshape(N * OH * OW, kh * kw * C), (N, OH, OW)


def _conv_block(x, w_hwio, stride, pad, *, prologue=None, epilogue=None,
                compute_stats=False, out_dtype=jnp.bfloat16):
    """x: raw NHWC activation (pre-BN if `prologue` is given).
    prologue = (scale_c, shift_c) of the previous BatchNorm (applied + LeakyReLU
    inside the kernel), or None.
    Returns (raw conv output NHWC, per-channel (2, oc) sum / sum-of-squares or None)."""
    kh, kw, ic, oc = w_hwio.shape
    patches, (N, OH, OW) = _im2col(x.astype(jnp.bfloat16), kh, kw, stride, pad)
    M, K = patches.shape
    Kp = _round_up(K, 128)
    Np = _round_up(oc, 128)                  # lane-dense output even when oc is tiny
    out_bytes = jnp.dtype(out_dtype).itemsize
    tm, Mp, tk = _pick_tiles(M, Kp, Np, out_bytes)
    n_k = Kp // tk
    n_rows = Mp // tm

    # Pad only when actually required (avoids re-materializing the largest tensor
    # in the pipeline just to round it up).
    a = patches if (Mp, Kp) == (M, K) else jnp.pad(patches, ((0, Mp - M), (0, Kp - K)))
    w2d = w_hwio.reshape(K, oc).astype(jnp.bfloat16)
    b = w2d if (Kp, Np) == (K, oc) else jnp.pad(w2d, ((0, Kp - K), (0, Np - oc)))

    inputs = [a, b]
    in_specs = [pl.BlockSpec((tm, tk), lambda i, k: (i, k)),
                pl.BlockSpec((tk, Np), lambda i, k: (k, 0))]
    if prologue is not None:
        scale_c, shift_c = prologue          # per input-channel -> per im2col column
        sc = jnp.zeros((Kp,), jnp.float32).at[:K].set(jnp.tile(scale_c, kh * kw))
        sh = jnp.zeros((Kp,), jnp.float32).at[:K].set(jnp.tile(shift_c, kh * kw))
        # Fully VMEM-resident (constant block index); the kernel picks row k.
        inputs += [sc.reshape(n_k, tk), sh.reshape(n_k, tk)]
        in_specs += [pl.BlockSpec((n_k, tk), lambda i, k: (0, 0)),
                     pl.BlockSpec((n_k, tk), lambda i, k: (0, 0))]

    out_shapes = [jax.ShapeDtypeStruct((Mp, Np), out_dtype)]
    out_specs = [pl.BlockSpec((tm, Np), lambda i, k: (i, 0))]
    if compute_stats:
        out_shapes.append(jax.ShapeDtypeStruct((n_rows, 2, Np), jnp.float32))
        out_specs.append(pl.BlockSpec((1, 2, Np), lambda i, k: (i, 0, 0)))

    scratch = [pltpu.VMEM((tm, Np), jnp.float32)] if n_k > 1 else []

    cost = pl.CostEstimate(
        flops=2 * Mp * Kp * Np, transcendentals=0,
        bytes_accessed=int((Mp * Kp + Kp * Np) * 2 + Mp * Np * out_bytes))
    vmem_limit = int(min(48 * _MIB,
                         max(16 * _MIB, 2 * _vmem_estimate(tm, tk, Np, out_bytes))))

    res = pl.pallas_call(
        functools.partial(_fused_conv_kernel,
                          apply_prologue=prologue is not None,
                          epilogue=epilogue, compute_stats=compute_stats,
                          n_k=n_k, m_valid=M, tm=tm),
        out_shape=tuple(out_shapes),
        grid_spec=pltpu.PrefetchScalarGridSpec(
            num_scalar_prefetch=0,
            grid=(n_rows, n_k),
            in_specs=in_specs,
            out_specs=tuple(out_specs),
            scratch_shapes=scratch),
        compiler_params=pltpu.CompilerParams(
            dimension_semantics=("parallel", "arbitrary"),
            vmem_limit_bytes=vmem_limit),
        cost_estimate=cost,
    )(*inputs)

    y = res[0][:M, :oc].reshape(N, OH, OW, oc)
    sums = jnp.sum(res[1], axis=0)[:, :oc] if compute_stats else None   # (2, oc)
    return y, sums


def _bn_scale_shift(sums, count, gamma, beta):
    """Fold train-mode BatchNorm into per-channel scale/shift for the next conv."""
    mean = sums[0] / count
    var = sums[1] / count - mean * mean          # biased variance (PyTorch train mode)
    rstd = lax.rsqrt(var + BN_EPS)
    scale = gamma * rstd
    shift = beta - mean * scale
    return scale, shift


def discriminator_forward(x_nchw, params):
    h = jnp.transpose(x_nchw, (0, 2, 3, 1)).astype(jnp.float32)   # NCHW -> NHWC

    # conv1 + LeakyReLU (no BN): activation fused as epilogue; stats not needed.
    h, _ = _conv_block(h, params["w1"], 2, 1, epilogue="lrelu")

    # conv2 raw + fused BN stats; BN2 + LReLU deferred into conv3's prologue.
    y2, s2 = _conv_block(h, params["w2"], 2, 1, compute_stats=True)
    bn2 = _bn_scale_shift(s2, y2.shape[0] * y2.shape[1] * y2.shape[2],
                          params["g2"], params["b2"])

    y3, s3 = _conv_block(y2, params["w3"], 2, 1, prologue=bn2, compute_stats=True)
    bn3 = _bn_scale_shift(s3, y3.shape[0] * y3.shape[1] * y3.shape[2],
                          params["g3"], params["b3"])

    y4, s4 = _conv_block(y3, params["w4"], 2, 1, prologue=bn3, compute_stats=True)
    bn4 = _bn_scale_shift(s4, y4.shape[0] * y4.shape[1] * y4.shape[2],
                          params["g4"], params["b4"])

    out, _ = _conv_block(y4, params["w5"], 1, 0, prologue=bn4,
                         epilogue="sigmoid", out_dtype=jnp.float32)
    return jnp.transpose(out, (0, 3, 1, 2))                        # (N, 1, 1, 1)


# ---------------------------------------------------------------------------
# Deterministic parameter init (same distributions as initialize_weights)
# ---------------------------------------------------------------------------
def init_params(key, nc=3, ndf=16):
    ks = jax.random.split(key, 8)

    def conv_w(k, ic, oc):
        return 0.02 * jax.random.normal(k, (4, 4, ic, oc), jnp.float32)  # HWIO

    return {
        "w1": conv_w(ks[0], nc, ndf),
        "w2": conv_w(ks[1], ndf, ndf * 2),
        "w3": conv_w(ks[2], ndf * 2, ndf * 4),
        "w4": conv_w(ks[3], ndf * 4, ndf * 8),
        "w5": conv_w(ks[4], ndf * 8, 1),
        "g2": 1.0 + 0.02 * jax.random.normal(ks[5], (ndf * 2,), jnp.float32),
        "g3": 1.0 + 0.02 * jax.random.normal(ks[6], (ndf * 4,), jnp.float32),
        "g4": 1.0 + 0.02 * jax.random.normal(ks[7], (ndf * 8,), jnp.float32),
        "b2": jnp.zeros((ndf * 2,), jnp.float32),
        "b3": jnp.zeros((ndf * 4,), jnp.float32),
        "b4": jnp.zeros((ndf * 8,), jnp.float32),
    }


# ---------------------------------------------------------------------------
# Pure-JAX reference (for correctness check)
# ---------------------------------------------------------------------------
def reference_forward(x_nchw, params):
    h = jnp.transpose(x_nchw, (0, 2, 3, 1)).astype(jnp.float32)

    def conv(h, w, s, p):
        return lax.conv_general_dilated(
            h, w, (s, s), [(p, p), (p, p)],
            dimension_numbers=("NHWC", "HWIO", "NHWC"),
            precision=lax.Precision.HIGHEST)

    def bn(h, g, b):
        mean = jnp.mean(h, axis=(0, 1, 2), keepdims=True)
        var = jnp.mean((h - mean) ** 2, axis=(0, 1, 2), keepdims=True)
        return (h - mean) / jnp.sqrt(var + BN_EPS) * g + b

    lrelu = lambda v: jnp.where(v > 0, v, LRELU_SLOPE * v)
    h = lrelu(conv(h, params["w1"], 2, 1))
    h = lrelu(bn(conv(h, params["w2"], 2, 1), params["g2"], params["b2"]))
    h = lrelu(bn(conv(h, params["w3"], 2, 1), params["g3"], params["b3"]))
    h = lrelu(bn(conv(h, params["w4"], 2, 1), params["g4"], params["b4"]))
    h = jax.nn.sigmoid(conv(h, params["w5"], 1, 0))
    return jnp.transpose(h, (0, 3, 1, 2))


if __name__ == "__main__":
    key = jax.random.PRNGKey(0)
    k_x, k_p = jax.random.split(key)

    # DCGAN discriminator requires 64x64 inputs (4 stride-2 convs + final 4x4 valid conv).
    N, NC, H, W = 2, 3, 64, 64
    NDF = 16  # scaled-down ndf for a small test (default in the module is 128)

    x = jax.random.normal(k_x, (N, NC, H, W), jnp.float32)
    params = init_params(k_p, nc=NC, ndf=NDF)

    out = jax.jit(discriminator_forward)(x, params)
    out = jax.block_until_ready(out)
    assert out.shape == (N, 1, 1, 1), out.shape

    ref = reference_forward(x, params)
    max_diff = float(jnp.max(jnp.abs(out - ref)))
    assert jnp.allclose(out, ref, atol=5e-2, rtol=0.0), f"max diff {max_diff}"

    print("KERNEL_OK")
</pallas_src>

<mosaic_0001>
module attributes {stable_mosaic.version = 11 : i64} {
  func.func @_fused_conv_kernel(%arg0: i32, %arg1: i32, %arg2: memref<1024x128xbf16, #tpu.memory_space<vmem>>, %arg3: memref<128x128xbf16, #tpu.memory_space<vmem>>, %arg4: memref<1024x128xbf16, #tpu.memory_space<vmem>>) attributes {dimension_semantics = [#tpu.dimension_semantics<parallel>, #tpu.dimension_semantics<arbitrary>], iteration_bounds = array<i64: 2, 1>, scalar_prefetch = 0 : i64, scratch_operands = 0 : i64, tpu.core_type = #tpu.core_type<tc>, window_params = [{transform_indices = @transform_0, window_bounds = array<i64: 1024, 128>}, {transform_indices = @transform_1, window_bounds = array<i64: 128, 128>}, {transform_indices = @transform_2, window_bounds = array<i64: 1024, 128>}]} {
    %c0 = arith.constant 0 : index
    %c0_0 = arith.constant 0 : index
    %0 = vector.load %arg2[%c0, %c0_0] : memref<1024x128xbf16, #tpu.memory_space<vmem>>, vector<1024x128xbf16>
    %c0_1 = arith.constant 0 : index
    %c0_2 = arith.constant 0 : index
    %1 = vector.load %arg3[%c0_1, %c0_2] : memref<128x128xbf16, #tpu.memory_space<vmem>>, vector<128x128xbf16>
    %cst = arith.constant dense<0.000000e+00> : vector<1024x128xf32>
    %2 = tpu.matmul %0, %1, %cst {dimension_numbers = #tpu.dot_dimension_numbers<[1], [0], [0], [1], [0, 0, 1, 1], [], []>} : vector<1024x128xbf16>, vector<128x128xbf16>, vector<1024x128xf32> -> vector<1024x128xf32>
    %cst_3 = arith.constant 0.000000e+00 : f32
    %3 = vector.broadcast %cst_3 : f32 to vector<1024x128xf32>
    %4 = arith.cmpf ogt, %2, %3 : vector<1024x128xf32>
    %cst_4 = arith.constant 2.000000e-01 : f32
    %5 = vector.broadcast %cst_4 : f32 to vector<1024x128xf32>
    %6 = arith.mulf %5, %2 : vector<1024x128xf32>
    %7 = arith.select %4, %2, %6 : vector<1024x128xi1>, vector<1024x128xf32>
    %8 = arith.truncf %7 : vector<1024x128xf32> to vector<1024x128xbf16>
    %c0_5 = arith.constant 0 : index
    %c0_6 = arith.constant 0 : index
    %9 = vector.load %arg4[%c0_5, %c0_6] : memref<1024x128xbf16, #tpu.memory_space<vmem>>, vector<1024x128xbf16>
    tpu.vector_store %arg4[%c0_5, %c0_6], %8 {strides = array<i32>} : memref<1024x128xbf16, #tpu.memory_space<vmem>>, vector<1024x128xbf16>,
    return
  }
  func.func @transform_0(%arg0: i32, %arg1: i32) -> (i32, i32) {
    %c0_i32 = arith.constant 0 : i32
    return %arg0, %arg1 : i32, i32
  }
  func.func @transform_1(%arg0: i32, %arg1: i32) -> (i32, i32) {
    %c0_i32 = arith.constant 0 : i32
    %c0_i32_0 = arith.constant 0 : i32
    return %arg1, %c0_i32 : i32, i32
  }
  func.func @transform_2(%arg0: i32, %arg1: i32) -> (i32, i32) {
    %c0_i32 = arith.constant 0 : i32
    %c0_i32_0 = arith.constant 0 : i32
    return %arg0, %c0_i32 : i32, i32
  }
}

module attributes {stable_mosaic.version = 11 : i64} {
  func.func @_fused_conv_kernel(%arg0: i32, %arg1: i32, %arg2: memref<256x256xbf16, #tpu.memory_space<vmem>>, %arg3: memref<256x128xbf16, #tpu.memory_space<vmem>>, %arg4: memref<256x128xbf16, #tpu.memory_space<vmem>>, %arg5: memref<1x2x128xf32, #tpu.memory_space<vmem>>) attributes {dimension_semantics = [#tpu.dimension_semantics<parallel>, #tpu.dimension_semantics<arbitrary>], iteration_bounds = array<i64: 2, 1>, scalar_prefetch = 0 : i64, scratch_operands = 0 : i64, tpu.core_type = #tpu.core_type<tc>, window_params = [{transform_indices = @transform_0, window_bounds = array<i64: 256, 256>}, {transform_indices = @transform_1, window_bounds = array<i64: 256, 128>}, {transform_indices = @transform_2, window_bounds = array<i64: 256, 128>}, {transform_indices = @transform_3, window_bounds = array<i64: 1, 2, 128>}]} {
    %c256_i32 = arith.constant 256 : i32
    %0 = arith.muli %arg0, %c256_i32 : i32
    %c0 = arith.constant 0 : index
    %c0_0 = arith.constant 0 : index
    %1 = vector.load %arg2[%c0, %c0_0] : memref<256x256xbf16, #tpu.memory_space<vmem>>, vector<256x256xbf16>
    %c0_1 = arith.constant 0 : index
    %c0_2 = arith.constant 0 : index
    %2 = vector.load %arg3[%c0_1, %c0_2] : memref<256x128xbf16, #tpu.memory_space<vmem>>, vector<256x128xbf16>
    %cst = arith.constant dense<0.000000e+00> : vector<256x128xf32>
    %3 = tpu.matmul %1, %2, %cst {dimension_numbers = #tpu.dot_dimension_numbers<[1], [0], [0], [1], [0, 0, 1, 1], [], []>} : vector<256x256xbf16>, vector<256x128xbf16>, vector<256x128xf32> -> vector<256x128xf32>
    %4 = tpu.iota {dimensions = array<i32: 0>} : vector<256x128xi32>
    %5 = vector.broadcast %0 : i32 to vector<256x128xi32>
    %6 = arith.addi %5, %4 : vector<256x128xi32>
    %c512_i32 = arith.constant 512 : i32
    %7 = vector.broadcast %c512_i32 : i32 to vector<256x128xi32>
    %8 = arith.cmpi slt, %6, %7 : vector<256x128xi32>
    %cst_3 = arith.constant 0.000000e+00 : f32
    %9 = vector.broadcast %cst_3 : f32 to vector<256x128xf32>
    %10 = arith.select %8, %3, %9 : vector<256x128xi1>, vector<256x128xf32>
    %cst_4 = arith.constant dense<0.000000e+00> : vector<128xf32>
    %11 = vector.multi_reduction <add>, %10, %cst_4 [0] : vector<256x128xf32> to vector<128xf32>
    %12 = vector.shape_cast %11 : vector<128xf32> to vector<1x128xf32>
    %c0_5 = arith.constant 0 : index
    %c0_6 = arith.constant 0 : index
    %c0_7 = arith.constant 0 : index
    %13 = vector.load %arg5[%c0_5, %c0_6, %c0_7] : memref<1x2x128xf32, #tpu.memory_space<vmem>>, vector<1x1x128xf32>
    %14 = vector.shape_cast %13 : vector<1x1x128xf32> to vector<1x128xf32>
    %15 = vector.shape_cast %12 : vector<1x128xf32> to vector<1x1x128xf32>
    tpu.vector_store %arg5[%c0_5, %c0_6, %c0_7], %15 {strides = array<i32>} : memref<1x2x128xf32, #tpu.memory_space<vmem>>, vector<1x1x128xf32>,
    %16 = arith.mulf %10, %10 : vector<256x128xf32>
    %cst_8 = arith.constant dense<0.000000e+00> : vector<128xf32>
    %17 = vector.multi_reduction <add>, %16, %cst_8 [0] : vector<256x128xf32> to vector<128xf32>
    %18 = vector.shape_cast %17 : vector<128xf32> to vector<1x128xf32>
    %c0_9 = arith.constant 0 : index
    %c1 = arith.constant 1 : index
    %c0_10 = arith.constant 0 : index
    %19 = vector.load %arg5[%c0_9, %c1, %c0_10] : memref<1x2x128xf32, #tpu.memory_space<vmem>>, vector<1x1x128xf32>
    %20 = vector.shape_cast %19 : vector<1x1x128xf32> to vector<1x128xf32>
    %21 = vector.shape_cast %18 : vector<1x128xf32> to vector<1x1x128xf32>
    tpu.vector_store %arg5[%c0_9, %c1, %c0_10], %21 {strides = array<i32>} : memref<1x2x128xf32, #tpu.memory_space<vmem>>, vector<1x1x128xf32>,
    %22 = arith.truncf %3 : vector<256x128xf32> to vector<256x128xbf16>
    %c0_11 = arith.constant 0 : index
    %c0_12 = arith.constant 0 : index
    %23 = vector.load %arg4[%c0_11, %c0_12] : memref<256x128xbf16, #tpu.memory_space<vmem>>, vector<256x128xbf16>
    tpu.vector_store %arg4[%c0_11, %c0_12], %22 {strides = array<i32>} : memref<256x128xbf16, #tpu.memory_space<vmem>>, vector<256x128xbf16>,
    return
  }
  func.func @transform_0(%arg0: i32, %arg1: i32) -> (i32, i32) {
    %c0_i32 = arith.constant 0 : i32
    return %arg0, %arg1 : i32, i32
  }
  func.func @transform_1(%arg0: i32, %arg1: i32) -> (i32, i32) {
    %c0_i32 = arith.constant 0 : i32
    %c0_i32_0 = arith.constant 0 : i32
    return %arg1, %c0_i32 : i32, i32
  }
  func.func @transform_2(%arg0: i32, %arg1: i32) -> (i32, i32) {
    %c0_i32 = arith.constant 0 : i32
    %c0_i32_0 = arith.constant 0 : i32
    return %arg0, %c0_i32 : i32, i32
  }
  func.func @transform_3(%arg0: i32, %arg1: i32) -> (i32, i32, i32) {
    %c0_i32 = arith.constant 0 : i32
    %c0_i32_0 = arith.constant 0 : i32
    %c0_i32_1 = arith.constant 0 : i32
    return %arg0, %c0_i32, %c0_i32_0 : i32, i32, i32
  }
}

module attributes {stable_mosaic.version = 11 : i64} {
  func.func @_fused_conv_kernel(%arg0: i32, %arg1: i32, %arg2: memref<64x512xbf16, #tpu.memory_space<vmem>>, %arg3: memref<512x128xbf16, #tpu.memory_space<vmem>>, %arg4: memref<1x512xf32, #tpu.memory_space<vmem>>, %arg5: memref<1x512xf32, #tpu.memory_space<vmem>>, %arg6: memref<64x128xbf16, #tpu.memory_space<vmem>>, %arg7: memref<1x2x128xf32, #tpu.memory_space<vmem>>) attributes {dimension_semantics = [#tpu.dimension_semantics<parallel>, #tpu.dimension_semantics<arbitrary>], iteration_bounds = array<i64: 2, 1>, scalar_prefetch = 0 : i64, scratch_operands = 0 : i64, tpu.core_type = #tpu.core_type<tc>, window_params = [{transform_indices = @transform_0, window_bounds = array<i64: 64, 512>}, {transform_indices = @transform_1, window_bounds = array<i64: 512, 128>}, {pipeline_mode = #tpu.pipeline_mode<synchronous>, transform_indices = @transform_2, window_bounds = array<i64: 1, 512>}, {pipeline_mode = #tpu.pipeline_mode<synchronous>, transform_indices = @transform_3, window_bounds = array<i64: 1, 512>}, {transform_indices = @transform_4, window_bounds = array<i64: 64, 128>}, {transform_indices = @transform_5, window_bounds = array<i64: 1, 2, 128>}]} {
    %c64_i32 = arith.constant 64 : i32
    %0 = arith.muli %arg0, %c64_i32 : i32
    %c0 = arith.constant 0 : index
    %c0_0 = arith.constant 0 : index
    %1 = vector.load %arg2[%c0, %c0_0] : memref<64x512xbf16, #tpu.memory_space<vmem>>, vector<64x512xbf16>
    %2 = arith.extf %1 : vector<64x512xbf16> to vector<64x512xf32>
    %3 = arith.index_cast %arg1 : i32 to index
    %c0_1 = arith.constant 0 : index
    %4 = vector.load %arg4[%3, %c0_1] : memref<1x512xf32, #tpu.memory_space<vmem>>, vector<1x512xf32>
    %5 = vector.broadcast %4 : vector<1x512xf32> to vector<64x512xf32>
    %6 = arith.mulf %2, %5 : vector<64x512xf32>
    %7 = arith.index_cast %arg1 : i32 to index
    %c0_2 = arith.constant 0 : index
    %8 = vector.load %arg5[%7, %c0_2] : memref<1x512xf32, #tpu.memory_space<vmem>>, vector<1x512xf32>
    %9 = vector.broadcast %8 : vector<1x512xf32> to vector<64x512xf32>
    %10 = arith.addf %6, %9 : vector<64x512xf32>
    %cst = arith.constant 0.000000e+00 : f32
    %11 = vector.broadcast %cst : f32 to vector<64x512xf32>
    %12 = arith.cmpf ogt, %10, %11 : vector<64x512xf32>
    %cst_3 = arith.constant 2.000000e-01 : f32
    %13 = vector.broadcast %cst_3 : f32 to vector<64x512xf32>
    %14 = arith.mulf %13, %10 : vector<64x512xf32>
    %15 = arith.select %12, %10, %14 : vector<64x512xi1>, vector<64x512xf32>
    %16 = arith.truncf %15 : vector<64x512xf32> to vector<64x512xbf16>
    %c0_4 = arith.constant 0 : index
    %c0_5 = arith.constant 0 : index
    %17 = vector.load %arg3[%c0_4, %c0_5] : memref<512x128xbf16, #tpu.memory_space<vmem>>, vector<512x128xbf16>
    %cst_6 = arith.constant dense<0.000000e+00> : vector<64x128xf32>
    %18 = tpu.matmul %16, %17, %cst_6 {dimension_numbers = #tpu.dot_dimension_numbers<[1], [0], [0], [1], [0, 0, 1, 1], [], []>} : vector<64x512xbf16>, vector<512x128xbf16>, vector<64x128xf32> -> vector<64x128xf32>
    %19 = tpu.iota {dimensions = array<i32: 0>} : vector<64x128xi32>
    %20 = vector.broadcast %0 : i32 to vector<64x128xi32>
    %21 = arith.addi %20, %19 : vector<64x128xi32>
    %c128_i32 = arith.constant 128 : i32
    %22 = vector.broadcast %c128_i32 : i32 to vector<64x128xi32>
    %23 = arith.cmpi slt, %21, %22 : vector<64x128xi32>
    %cst_7 = arith.constant 0.000000e+00 : f32
    %24 = vector.broadcast %cst_7 : f32 to vector<64x128xf32>
    %25 = arith.select %23, %18, %24 : vector<64x128xi1>, vector<64x128xf32>
    %cst_8 = arith.constant dense<0.000000e+00> : vector<128xf32>
    %26 = vector.multi_reduction <add>, %25, %cst_8 [0] : vector<64x128xf32> to vector<128xf32>
    %27 = vector.shape_cast %26 : vector<128xf32> to vector<1x128xf32>
    %c0_9 = arith.constant 0 : index
    %c0_10 = arith.constant 0 : index
    %c0_11 = arith.constant 0 : index
    %28 = vector.load %arg7[%c0_9, %c0_10, %c0_11] : memref<1x2x128xf32, #tpu.memory_space<vmem>>, vector<1x1x128xf32>
    %29 = vector.shape_cast %28 : vector<1x1x128xf32> to vector<1x128xf32>
    %30 = vector.shape_cast %27 : vector<1x128xf32> to vector<1x1x128xf32>
    tpu.vector_store %arg7[%c0_9, %c0_10, %c0_11], %30 {strides = array<i32>} : memref<1x2x128xf32, #tpu.memory_space<vmem>>, vector<1x1x128xf32>,
    %31 = arith.mulf %25, %25 : vector<64x128xf32>
    %cst_12 = arith.constant dense<0.000000e+00> : vector<128xf32>
    %32 = vector.multi_reduction <add>, %31, %cst_12 [0] : vector<64x128xf32> to vector<128xf32>
    %33 = vector.shape_cast %32 : vector<128xf32> to vector<1x128xf32>
    %c0_13 = arith.constant 0 : index
    %c1 = arith.constant 1 : index
    %c0_14 = arith.constant 0 : index
    %34 = vector.load %arg7[%c0_13, %c1, %c0_14] : memref<1x2x128xf32, #tpu.memory_space<vmem>>, vector<1x1x128xf32>
    %35 = vector.shape_cast %34 : vector<1x1x128xf32> to vector<1x128xf32>
    %36 = vector.shape_cast %33 : vector<1x128xf32> to vector<1x1x128xf32>
    tpu.vector_store %arg7[%c0_13, %c1, %c0_14], %36 {strides = array<i32>} : memref<1x2x128xf32, #tpu.memory_space<vmem>>, vector<1x1x128xf32>,
    %37 = arith.truncf %18 : vector<64x128xf32> to vector<64x128xbf16>
    %c0_15 = arith.constant 0 : index
    %c0_16 = arith.constant 0 : index
    %38 = vector.load %arg6[%c0_15, %c0_16] : memref<64x128xbf16, #tpu.memory_space<vmem>>, vector<64x128xbf16>
    tpu.vector_store %arg6[%c0_15, %c0_16], %37 {strides = array<i32>} : memref<64x128xbf16, #tpu.memory_space<vmem>>, vector<64x128xbf16>,
    return
  }
  func.func @transform_0(%arg0: i32, %arg1: i32) -> (i32, i32) {
    %c0_i32 = arith.constant 0 : i32
    return %arg0, %arg1 : i32, i32
  }
  func.func @transform_1(%arg0: i32, %arg1: i32) -> (i32, i32) {
    %c0_i32 = arith.constant 0 : i32
    %c0_i32_0 = arith.constant 0 : i32
    return %arg1, %c0_i32 : i32, i32
  }
  func.func @transform_2(%arg0: i32, %arg1: i32) -> (i32, i32) {
    %c0_i32 = arith.constant 0 : i32
    %c0_i32_0 = arith.constant 0 : i32
    %c0_i32_1 = arith.constant 0 : i32
    return %c0_i32, %c0_i32_0 : i32, i32
  }
  func.func @transform_3(%arg0: i32, %arg1: i32) -> (i32, i32) {
    %c0_i32 = arith.constant 0 : i32
    %c0_i32_0 = arith.constant 0 : i32
    %c0_i32_1 = arith.constant 0 : i32
    return %c0_i32, %c0_i32_0 : i32, i32
  }
  func.func @transform_4(%arg0: i32, %arg1: i32) -> (i32, i32) {
    %c0_i32 = arith.constant 0 : i32
    %c0_i32_0 = arith.constant 0 : i32
    return %arg0, %c0_i32 : i32, i32
  }
  func.func @transform_5(%arg0: i32, %arg1: i32) -> (i32, i32, i32) {
    %c0_i32 = arith.constant 0 : i32
    %c0_i32_0 = arith.constant 0 : i32
    %c0_i32_1 = arith.constant 0 : i32
    return %arg0, %c0_i32, %c0_i32_0 : i32, i32, i32
  }
}

module attributes {stable_mosaic.version = 11 : i64} {
  func.func @_fused_conv_kernel(%arg0: i32, %arg1: i32, %arg2: memref<16x1024xbf16, #tpu.memory_space<vmem>>, %arg3: memref<1024x128xbf16, #tpu.memory_space<vmem>>, %arg4: memref<1x1024xf32, #tpu.memory_space<vmem>>, %arg5: memref<1x1024xf32, #tpu.memory_space<vmem>>, %arg6: memref<16x128xbf16, #tpu.memory_space<vmem>>, %arg7: memref<1x2x128xf32, #tpu.memory_space<vmem>>) attributes {dimension_semantics = [#tpu.dimension_semantics<parallel>, #tpu.dimension_semantics<arbitrary>], iteration_bounds = array<i64: 2, 1>, scalar_prefetch = 0 : i64, scratch_operands = 0 : i64, tpu.core_type = #tpu.core_type<tc>, window_params = [{transform_indices = @transform_0, window_bounds = array<i64: 16, 1024>}, {transform_indices = @transform_1, window_bounds = array<i64: 1024, 128>}, {pipeline_mode = #tpu.pipeline_mode<synchronous>, transform_indices = @transform_2, window_bounds = array<i64: 1, 1024>}, {pipeline_mode = #tpu.pipeline_mode<synchronous>, transform_indices = @transform_3, window_bounds = array<i64: 1, 1024>}, {transform_indices = @transform_4, window_bounds = array<i64: 16, 128>}, {transform_indices = @transform_5, window_bounds = array<i64: 1, 2, 128>}]} {
    %c16_i32 = arith.constant 16 : i32
    %0 = arith.muli %arg0, %c16_i32 : i32
    %c0 = arith.constant 0 : index
    %c0_0 = arith.constant 0 : index
    %1 = vector.load %arg2[%c0, %c0_0] : memref<16x1024xbf16, #tpu.memory_space<vmem>>, vector<16x1024xbf16>
    %2 = arith.extf %1 : vector<16x1024xbf16> to vector<16x1024xf32>
    %3 = arith.index_cast %arg1 : i32 to index
    %c0_1 = arith.constant 0 : index
    %4 = vector.load %arg4[%3, %c0_1] : memref<1x1024xf32, #tpu.memory_space<vmem>>, vector<1x1024xf32>
    %5 = vector.broadcast %4 : vector<1x1024xf32> to vector<16x1024xf32>
    %6 = arith.mulf %2, %5 : vector<16x1024xf32>
    %7 = arith.index_cast %arg1 : i32 to index
    %c0_2 = arith.constant 0 : index
    %8 = vector.load %arg5[%7, %c0_2] : memref<1x1024xf32, #tpu.memory_space<vmem>>, vector<1x1024xf32>
    %9 = vector.broadcast %8 : vector<1x1024xf32> to vector<16x1024xf32>
    %10 = arith.addf %6, %9 : vector<16x1024xf32>
    %cst = arith.constant 0.000000e+00 : f32
    %11 = vector.broadcast %cst : f32 to vector<16x1024xf32>
    %12 = arith.cmpf ogt, %10, %11 : vector<16x1024xf32>
    %cst_3 = arith.constant 2.000000e-01 : f32
    %13 = vector.broadcast %cst_3 : f32 to vector<16x1024xf32>
    %14 = arith.mulf %13, %10 : vector<16x1024xf32>
    %15 = arith.select %12, %10, %14 : vector<16x1024xi1>, vector<16x1024xf32>
    %16 = arith.truncf %15 : vector<16x1024xf32> to vector<16x1024xbf16>
    %c0_4 = arith.constant 0 : index
    %c0_5 = arith.constant 0 : index
    %17 = vector.load %arg3[%c0_4, %c0_5] : memref<1024x128xbf16, #tpu.memory_space<vmem>>, vector<1024x128xbf16>
    %cst_6 = arith.constant dense<0.000000e+00> : vector<16x128xf32>
    %18 = tpu.matmul %16, %17, %cst_6 {dimension_numbers = #tpu.dot_dimension_numbers<[1], [0], [0], [1], [0, 0, 1, 1], [], []>} : vector<16x1024xbf16>, vector<1024x128xbf16>, vector<16x128xf32> -> vector<16x128xf32>
    %19 = tpu.iota {dimensions = array<i32: 0>} : vector<16x128xi32>
    %20 = vector.broadcast %0 : i32 to vector<16x128xi32>
    %21 = arith.addi %20, %19 : vector<16x128xi32>
    %c32_i32 = arith.constant 32 : i32
    %22 = vector.broadcast %c32_i32 : i32 to vector<16x128xi32>
    %23 = arith.cmpi slt, %21, %22 : vector<16x128xi32>
    %cst_7 = arith.constant 0.000000e+00 : f32
    %24 = vector.broadcast %cst_7 : f32 to vector<16x128xf32>
    %25 = arith.select %23, %18, %24 : vector<16x128xi1>, vector<16x128xf32>
    %cst_8 = arith.constant dense<0.000000e+00> : vector<128xf32>
    %26 = vector.multi_reduction <add>, %25, %cst_8 [0] : vector<16x128xf32> to vector<128xf32>
    %27 = vector.shape_cast %26 : vector<128xf32> to vector<1x128xf32>
    %c0_9 = arith.constant 0 : index
    %c0_10 = arith.constant 0 : index
    %c0_11 = arith.constant 0 : index
    %28 = vector.load %arg7[%c0_9, %c0_10, %c0_11] : memref<1x2x128xf32, #tpu.memory_space<vmem>>, vector<1x1x128xf32>
    %29 = vector.shape_cast %28 : vector<1x1x128xf32> to vector<1x128xf32>
    %30 = vector.shape_cast %27 : vector<1x128xf32> to vector<1x1x128xf32>
    tpu.vector_store %arg7[%c0_9, %c0_10, %c0_11], %30 {strides = array<i32>} : memref<1x2x128xf32, #tpu.memory_space<vmem>>, vector<1x1x128xf32>,
    %31 = arith.mulf %25, %25 : vector<16x128xf32>
    %cst_12 = arith.constant dense<0.000000e+00> : vector<128xf32>
    %32 = vector.multi_reduction <add>, %31, %cst_12 [0] : vector<16x128xf32> to vector<128xf32>
    %33 = vector.shape_cast %32 : vector<128xf32> to vector<1x128xf32>
    %c0_13 = arith.constant 0 : index
    %c1 = arith.constant 1 : index
    %c0_14 = arith.constant 0 : index
    %34 = vector.load %arg7[%c0_13, %c1, %c0_14] : memref<1x2x128xf32, #tpu.memory_space<vmem>>, vector<1x1x128xf32>
    %35 = vector.shape_cast %34 : vector<1x1x128xf32> to vector<1x128xf32>
    %36 = vector.shape_cast %33 : vector<1x128xf32> to vector<1x1x128xf32>
    tpu.vector_store %arg7[%c0_13, %c1, %c0_14], %36 {strides = array<i32>} : memref<1x2x128xf32, #tpu.memory_space<vmem>>, vector<1x1x128xf32>,
    %37 = arith.truncf %18 : vector<16x128xf32> to vector<16x128xbf16>
    %c0_15 = arith.constant 0 : index
    %c0_16 = arith.constant 0 : index
    %38 = vector.load %arg6[%c0_15, %c0_16] : memref<16x128xbf16, #tpu.memory_space<vmem>>, vector<16x128xbf16>
    tpu.vector_store %arg6[%c0_15, %c0_16], %37 {strides = array<i32>} : memref<16x128xbf16, #tpu.memory_space<vmem>>, vector<16x128xbf16>,
    return
  }
  func.func @transform_0(%arg0: i32, %arg1: i32) -> (i32, i32) {
    %c0_i32 = arith.constant 0 : i32
    return %arg0, %arg1 : i32, i32
  }
  func.func @transform_1(%arg0: i32, %arg1: i32) -> (i32, i32) {
    %c0_i32 = arith.constant 0 : i32
    %c0_i32_0 = arith.constant 0 : i32
    return %arg1, %c0_i32 : i32, i32
  }
  func.func @transform_2(%arg0: i32, %arg1: i32) -> (i32, i32) {
    %c0_i32 = arith.constant 0 : i32
    %c0_i32_0 = arith.constant 0 : i32
    %c0_i32_1 = arith.constant 0 : i32
    return %c0_i32, %c0_i32_0 : i32, i32
  }
  func.func @transform_3(%arg0: i32, %arg1: i32) -> (i32, i32) {
    %c0_i32 = arith.constant 0 : i32
    %c0_i32_0 = arith.constant 0 : i32
    %c0_i32_1 = arith.constant 0 : i32
    return %c0_i32, %c0_i32_0 : i32, i32
  }
  func.func @transform_4(%arg0: i32, %arg1: i32) -> (i32, i32) {
    %c0_i32 = arith.constant 0 : i32
    %c0_i32_0 = arith.constant 0 : i32
    return %arg0, %c0_i32 : i32, i32
  }
  func.func @transform_5(%arg0: i32, %arg1: i32) -> (i32, i32, i32) {
    %c0_i32 = arith.constant 0 : i32
    %c0_i32_0 = arith.constant 0 : i32
    %c0_i32_1 = arith.constant 0 : i32
    return %arg0, %c0_i32, %c0_i32_0 : i32, i32, i32
  }
}

module attributes {stable_mosaic.version = 11 : i64} {
  func.func @_fused_conv_kernel(%arg0: i32, %arg1: i32, %arg2: memref<8x2048xbf16, #tpu.memory_space<vmem>>, %arg3: memref<2048x128xbf16, #tpu.memory_space<vmem>>, %arg4: memref<1x2048xf32, #tpu.memory_space<vmem>>, %arg5: memref<1x2048xf32, #tpu.memory_space<vmem>>, %arg6: memref<8x128xf32, #tpu.memory_space<vmem>>) attributes {dimension_semantics = [#tpu.dimension_semantics<parallel>, #tpu.dimension_semantics<arbitrary>], iteration_bounds = array<i64: 1, 1>, scalar_prefetch = 0 : i64, scratch_operands = 0 : i64, tpu.core_type = #tpu.core_type<tc>, window_params = [{transform_indices = @transform_0, window_bounds = array<i64: 8, 2048>}, {transform_indices = @transform_1, window_bounds = array<i64: 2048, 128>}, {pipeline_mode = #tpu.pipeline_mode<synchronous>, transform_indices = @transform_2, window_bounds = array<i64: 1, 2048>}, {pipeline_mode = #tpu.pipeline_mode<synchronous>, transform_indices = @transform_3, window_bounds = array<i64: 1, 2048>}, {transform_indices = @transform_4, window_bounds = array<i64: 8, 128>}]} {
    %c0 = arith.constant 0 : index
    %c0_0 = arith.constant 0 : index
    %0 = vector.load %arg2[%c0, %c0_0] : memref<8x2048xbf16, #tpu.memory_space<vmem>>, vector<8x2048xbf16>
    %1 = arith.extf %0 : vector<8x2048xbf16> to vector<8x2048xf32>
    %2 = arith.index_cast %arg1 : i32 to index
    %c0_1 = arith.constant 0 : index
    %3 = vector.load %arg4[%2, %c0_1] : memref<1x2048xf32, #tpu.memory_space<vmem>>, vector<1x2048xf32>
    %4 = vector.broadcast %3 : vector<1x2048xf32> to vector<8x2048xf32>
    %5 = arith.mulf %1, %4 : vector<8x2048xf32>
    %6 = arith.index_cast %arg1 : i32 to index
    %c0_2 = arith.constant 0 : index
    %7 = vector.load %arg5[%6, %c0_2] : memref<1x2048xf32, #tpu.memory_space<vmem>>, vector<1x2048xf32>
    %8 = vector.broadcast %7 : vector<1x2048xf32> to vector<8x2048xf32>
    %9 = arith.addf %5, %8 : vector<8x2048xf32>
    %cst = arith.constant 0.000000e+00 : f32
    %10 = vector.broadcast %cst : f32 to vector<8x2048xf32>
    %11 = arith.cmpf ogt, %9, %10 : vector<8x2048xf32>
    %cst_3 = arith.constant 2.000000e-01 : f32
    %12 = vector.broadcast %cst_3 : f32 to vector<8x2048xf32>
    %13 = arith.mulf %12, %9 : vector<8x2048xf32>
    %14 = arith.select %11, %9, %13 : vector<8x2048xi1>, vector<8x2048xf32>
    %15 = arith.truncf %14 : vector<8x2048xf32> to vector<8x2048xbf16>
    %c0_4 = arith.constant 0 : index
    %c0_5 = arith.constant 0 : index
    %16 = vector.load %arg3[%c0_4, %c0_5] : memref<2048x128xbf16, #tpu.memory_space<vmem>>, vector<2048x128xbf16>
    %cst_6 = arith.constant dense<0.000000e+00> : vector<8x128xf32>
    %17 = tpu.matmul %15, %16, %cst_6 {dimension_numbers = #tpu.dot_dimension_numbers<[1], [0], [0], [1], [0, 0, 1, 1], [], []>} : vector<8x2048xbf16>, vector<2048x128xbf16>, vector<8x128xf32> -> vector<8x128xf32>
    %18 = math.absf %17 : vector<8x128xf32>
    %cst_7 = arith.constant 0.000000e+00 : f32
    %19 = vector.broadcast %cst_7 : f32 to vector<8x128xf32>
    %20 = arith.subf %19, %18 : vector<8x128xf32>
    %21 = math.exp %20 : vector<8x128xf32>
    %cst_8 = arith.constant 0.000000e+00 : f32
    %22 = vector.broadcast %cst_8 : f32 to vector<8x128xf32>
    %23 = arith.cmpf oge, %17, %22 : vector<8x128xf32>
    %cst_9 = arith.constant 1.000000e+00 : f32
    %24 = vector.broadcast %cst_9 : f32 to vector<8x128xf32>
    %25 = arith.addf %24, %21 : vector<8x128xf32>
    %cst_10 = arith.constant 1.000000e+00 : f32
    %26 = vector.broadcast %cst_10 : f32 to vector<8x128xf32>
    %27 = arith.divf %26, %25 : vector<8x128xf32>
    %cst_11 = arith.constant 1.000000e+00 : f32
    %28 = vector.broadcast %cst_11 : f32 to vector<8x128xf32>
    %29 = arith.addf %28, %21 : vector<8x128xf32>
    %30 = arith.divf %21, %29 : vector<8x128xf32>
    %31 = arith.select %23, %27, %30 : vector<8x128xi1>, vector<8x128xf32>
    %c0_12 = arith.constant 0 : index
    %c0_13 = arith.constant 0 : index
    %32 = vector.load %arg6[%c0_12, %c0_13] : memref<8x128xf32, #tpu.memory_space<vmem>>, vector<8x128xf32>
    tpu.vector_store %arg6[%c0_12, %c0_13], %31 {strides = array<i32>} : memref<8x128xf32, #tpu.memory_space<vmem>>, vector<8x128xf32>,
    return
  }
  func.func @transform_0(%arg0: i32, %arg1: i32) -> (i32, i32) {
    %c0_i32 = arith.constant 0 : i32
    return %arg0, %arg1 : i32, i32
  }
  func.func @transform_1(%arg0: i32, %arg1: i32) -> (i32, i32) {
    %c0_i32 = arith.constant 0 : i32
    %c0_i32_0 = arith.constant 0 : i32
    return %arg1, %c0_i32 : i32, i32
  }
  func.func @transform_2(%arg0: i32, %arg1: i32) -> (i32, i32) {
    %c0_i32 = arith.constant 0 : i32
    %c0_i32_0 = arith.constant 0 : i32
    %c0_i32_1 = arith.constant 0 : i32
    return %c0_i32, %c0_i32_0 : i32, i32
  }
  func.func @transform_3(%arg0: i32, %arg1: i32) -> (i32, i32) {
    %c0_i32 = arith.constant 0 : i32
    %c0_i32_0 = arith.constant 0 : i32
    %c0_i32_1 = arith.constant 0 : i32
    return %c0_i32, %c0_i32_0 : i32, i32
  }
  func.func @transform_4(%arg0: i32, %arg1: i32) -> (i32, i32) {
    %c0_i32 = arith.constant 0 : i32
    %c0_i32_0 = arith.constant 0 : i32
    return %arg0, %c0_i32 : i32, i32
  }
}

</mosaic_0001>

<bundles_post_ra>
// kernel: discriminator_forward.5
= control target key start
LH: loop header
LB: loop body
LE: loop exit
PB: predicated region body
PF: predicated region fallthrough
CT: control target
= control target key end

     0   :  { %s3511_s9 = smov 0   ;;  %s3513_s10 = smov 0   ;;  %s3722_s0 = inlined_call_operand.vmem [shape: bf16[2048,128], index: 0, kind: input, shape index: {}]   ;;  %s3723_s1 = inlined_call_operand.vmem [shape: bf16[128,128], index: 1, kind: input, shape index: {}]   ;;  %s3724_s2 = inlined_call_operand.vmem [shape: bf16[2048,128], index: 2, kind: output, shape index: {}]  }
   0x1   :  { %s3515_s11 = smov 0  }
   0x2 LB: > { %s24_s12 = sadd.s32 1, %s3490_s10  ;;  %p2426_p0 = scmp.ge.s32.totalorder %s3494_s11, 1  ;;  %s3494_s11 = sphi %s3515_s11, %s12_s11   ;;  %s3490_s10 = sphi %s3513_s10, %s3726_s10   ;;  %s3486_s9 = sphi %s3511_s9, %s3725_s9  }
   0x3   : > { %p26_p1 = scmp.ge.s32.totalorder %s24_s12, 2  ;;  %p141_p2 = scmp.lt.s32.totalorder %s3494_s11, 3 }
   0x5   : > { %s3728_s12 = smov (%p26_p1, %s24_s12), 0  ;;  %p142_p3 = pnand %p2426_p0, %p141_p2 }
   0x6   : > { %v3400_v0 = vld [vmem:[%s3723_s1] sm:$0xff] (!%p142_p3)   ;;  %s2427_s15 = sshll.u32 (!%p142_p3), %s3486_s9, 7  ;;  %v3401_v1 = vld [vmem:[%s3723_s1 + $0x8] sm:$0xff] (!%p142_p3)   ;;  %v3402_v2 = vld [vmem:[%s3723_s1 + $0x10] sm:$0xff] (!%p142_p3)  }
   0x7   : > { %145 = sbr.rel (%p142_p3) target bundleno = 382 (0x17e), region = 28  ;;  %p172_p4 = scmp.lt.s32.totalorder (!%p142_p3), %s2427_s15, 255  ;;  %3216 = vmatprep.subr.bf16.mxu0 (!%p142_p3), %v3400_v0  ;;  %3360 = vmatprep.subr.bf16.mxu1 (!%p142_p3), %v3400_v0  ;;  %v3403_v3 = vld [vmem:[%s3723_s1 + $0x18] sm:$0xff] (!%p142_p3)   ;;  %v3404_v6 = vld [vmem:[%s3723_s1 + $0x20] sm:$0xff] (!%p142_p3)   ;;  %v3405_v7 = vld [vmem:[%s3723_s1 + $0x28] sm:$0xff] (!%p142_p3)  }
   0x8   : > { %3217 = vmatpush3.bf16.msra.mxu0 (!%p142_p3), %v3400_v0  ;;  %3368 = vmatpush3.bf16.msra.mxu1 (!%p142_p3), %v3400_v0  ;;  %v3406_v8 = vld [vmem:[%s3723_s1 + $0x30] sm:$0xff] (!%p142_p3)   ;;  %v3407_v9 = vld [vmem:[%s3723_s1 + $0x38] sm:$0xff] (!%p142_p3)  }
   0x9   : > { %3218 = vmatprep.subr.bf16.mxu0 (!%p142_p3), %v3401_v1  ;;  %3361 = vmatprep.subr.bf16.mxu1 (!%p142_p3), %v3401_v1 }
   0xc   : > { %3219 = vmatpush3.bf16.msra.mxu0 (!%p142_p3), %v3401_v1  ;;  %3369 = vmatpush3.bf16.msra.mxu1 (!%p142_p3), %v3401_v1 }
   0xd   : > { %3220 = vmatprep.subr.bf16.mxu0 (!%p142_p3), %v3402_v2  ;;  %3362 = vmatprep.subr.bf16.mxu1 (!%p142_p3), %v3402_v2 }
   0xe   : > { %s3730_s15 = smov (!%p172_p4, %s2427_s15), 255 }
   0xf   : > { %s2428_s20 = sshll.u32 %s3730_s15, 2 }
  0x10   : > { %s3546_s23 = scalar_lea.vmem %s3722_s0, %s2428_s20  ;;  %3221 = vmatpush3.bf16.msra.mxu0 %v3402_v2  ;;  %3370 = vmatpush3.bf16.msra.mxu1 %v3402_v2  ;;  %s3632_s8 = scalar_lea.vmem %s3724_s2, %s2428_s20 }
  0x11   : > { %v3408_v4 = vld [vmem:[%s3546_s23] sm:$0xff]   ;;  %3222 = vmatprep.subr.bf16.mxu0 %v3403_v3  ;;  %3363 = vmatprep.subr.bf16.mxu1 %v3403_v3  ;;  %v3410_v10 = vld [vmem:[%s3546_s23 + $0x8] sm:$0xff]   ;;  %v3412_v12 = vld [vmem:[%s3546_s23 + $0x10] sm:$0xff]  }
  0x12   : > { %v3409_v5 = vld [vmem:[%s3546_s23 + $0x100] sm:$0xff]   ;;  %3232 = vmatprep.mubr.bf16.mxu0 %v3408_v4  ;;  %v3411_v11 = vld [vmem:[%s3546_s23 + $0x108] sm:$0xff]   ;;  %v3413_v13 = vld [vmem:[%s3546_s23 + $0x110] sm:$0xff]  }
  0x13   : > { %3296 = vmatprep.mubr.bf16.mxu1 %v3409_v5  ;;  %v3414_v14 = vld [vmem:[%s3546_s23 + $0x18] sm:$0xff]   ;;  %v3416_v16 = vld [vmem:[%s3546_s23 + $0x20] sm:$0xff]   ;;  %v3418_v18 = vld [vmem:[%s3546_s23 + $0x28] sm:$0xff]  }
  0x14   : > { %3223 = vmatpush3.bf16.msra.mxu0 %v3403_v3  ;;  %3371 = vmatpush3.bf16.msra.mxu1 %v3403_v3  ;;  %v3415_v15 = vld [vmem:[%s3546_s23 + $0x118] sm:$0xff]   ;;  %v3417_v17 = vld [vmem:[%s3546_s23 + $0x120] sm:$0xff]   ;;  %v3419_v19 = vld [vmem:[%s3546_s23 + $0x128] sm:$0xff]  }
  0x15   : > { %3224 = vmatprep.subr.bf16.mxu0 %v3404_v6  ;;  %3364 = vmatprep.subr.bf16.mxu1 %v3404_v6  ;;  %v3420_v20 = vld [vmem:[%s3546_s23 + $0x30] sm:$0xff]   ;;  %v3422_v22 = vld [vmem:[%s3546_s23 + $0x38] sm:$0xff]   ;;  %v3424_v24 = vld [vmem:[%s3546_s23 + $0x40] sm:$0xff]  }
  0x16   : > { %v3421_v21 = vld [vmem:[%s3546_s23 + $0x130] sm:$0xff]   ;;  %v3423_v23 = vld [vmem:[%s3546_s23 + $0x138] sm:$0xff]   ;;  %v3425_v25 = vld [vmem:[%s3546_s23 + $0x140] sm:$0xff]  }
  0x17   : > { %v3426_v26 = vld [vmem:[%s3546_s23 + $0x48] sm:$0xff]   ;;  %v3428_v28 = vld [vmem:[%s3546_s23 + $0x50] sm:$0xff]   ;;  %v3430_v30 = vld [vmem:[%s3546_s23 + $0x58] sm:$0xff]  }
  0x18   : > { %3225 = vmatpush3.bf16.msra.mxu0 %v3404_v6  ;;  %3372 = vmatpush3.bf16.msra.mxu1 %v3404_v6  ;;  %v3427_v27 = vld [vmem:[%s3546_s23 + $0x148] sm:$0xff]   ;;  %v3429_v29 = vld [vmem:[%s3546_s23 + $0x150] sm:$0xff]   ;;  %v3431_v31 = vld [vmem:[%s3546_s23 + $0x158] sm:$0xff]  }
  0x19   : > { %3226 = vmatprep.subr.bf16.mxu0 %v3405_v7  ;;  %3365 = vmatprep.subr.bf16.mxu1 %v3405_v7  ;;  %v3432_v32 = vld [vmem:[%s3546_s23 + $0x60] sm:$0xff]   ;;  %v3434_v34 = vld [vmem:[%s3546_s23 + $0x68] sm:$0xff]   ;;  %v3436_v36 = vld [vmem:[%s3546_s23 + $0x70] sm:$0xff]  }
  0x1a   : > { %v3433_v33 = vld [vmem:[%s3546_s23 + $0x160] sm:$0xff]   ;;  %v3435_v35 = vld [vmem:[%s3546_s23 + $0x168] sm:$0xff]   ;;  %v3437_v37 = vld [vmem:[%s3546_s23 + $0x170] sm:$0xff]  }
  0x1b   : > { %v3438_v38 = vld [vmem:[%s3546_s23 + $0x78] sm:$0xff]   ;;  %v3440_v40 = vld [vmem:[%s3546_s23 + $0x80] sm:$0xff]   ;;  %v3442_v42 = vld [vmem:[%s3546_s23 + $0x88] sm:$0xff]  }
  0x1c   : > { %3227 = vmatpush3.bf16.msra.mxu0 %v3405_v7  ;;  %3373 = vmatpush3.bf16.msra.mxu1 %v3405_v7  ;;  %v3439_v39 = vld [vmem:[%s3546_s23 + $0x178] sm:$0xff]   ;;  %v3441_v41 = vld [vmem:[%s3546_s23 + $0x180] sm:$0xff]   ;;  %v3443_v43 = vld [vmem:[%s3546_s23 + $0x188] sm:$0xff]  }
  0x1d   : > { %3228 = vmatprep.subr.bf16.mxu0 %v3406_v8  ;;  %3366 = vmatprep.subr.bf16.mxu1 %v3406_v8  ;;  %v3444_v44 = vld [vmem:[%s3546_s23 + $0x90] sm:$0xff]   ;;  %v3446_v46 = vld [vmem:[%s3546_s23 + $0x98] sm:$0xff]   ;;  %v3448_v48 = vld [vmem:[%s3546_s23 + $0xa0] sm:$0xff]  }
  0x1e   : > { %v3445_v45 = vld [vmem:[%s3546_s23 + $0x190] sm:$0xff]   ;;  %v3447_v47 = vld [vmem:[%s3546_s23 + $0x198] sm:$0xff]   ;;  %v3449_v49 = vld [vmem:[%s3546_s23 + $0x1a0] sm:$0xff]  }
  0x1f   : > { %v3450_v50 = vld [vmem:[%s3546_s23 + $0xa8] sm:$0xff]   ;;  %v3452_v52 = vld [vmem:[%s3546_s23 + $0xb0] sm:$0xff]   ;;  %v3454_v54 = vld [vmem:[%s3546_s23 + $0xb8] sm:$0xff]  }
  0x20   : > { %3229 = vmatpush3.bf16.msra.mxu0 %v3406_v8  ;;  %3374 = vmatpush3.bf16.msra.mxu1 %v3406_v8  ;;  %v3451_v51 = vld [vmem:[%s3546_s23 + $0x1a8] sm:$0xff]   ;;  %v3453_v53 = vld [vmem:[%s3546_s23 + $0x1b0] sm:$0xff]   ;;  %v3455_v55 = vld [vmem:[%s3546_s23 + $0x1b8] sm:$0xff]  }
  0x21   : > { %3230 = vmatprep.subr.bf16.mxu0 %v3407_v9  ;;  %3367 = vmatprep.subr.bf16.mxu1 %v3407_v9  ;;  %v3456_v56 = vld [vmem:[%s3546_s23 + $0xc0] sm:$0xff]   ;;  %v3458_v58 = vld [vmem:[%s3546_s23 + $0xc8] sm:$0xff]   ;;  %v3460_v60 = vld [vmem:[%s3546_s23 + $0xd0] sm:$0xff]  }
  0x22   : > { %v3457_v57 = vld [vmem:[%s3546_s23 + $0x1c0] sm:$0xff]   ;;  %v3459_v59 = vld [vmem:[%s3546_s23 + $0x1c8] sm:$0xff]   ;;  %v3461_v61 = vld [vmem:[%s3546_s23 + $0x1d0] sm:$0xff]  }
  0x23   : > { %v3462_v62 = vld [vmem:[%s3546_s23 + $0xd8] sm:$0xff]   ;;  %v3464_v0 = vld [vmem:[%s3546_s23 + $0xe0] sm:$0xff]   ;;  %v3466_v2 = vld [vmem:[%s3546_s23 + $0xe8] sm:$0xff]  }
  0x24   : > { %3231 = vmatpush3.bf16.msra.mxu0 %v3407_v9  ;;  %3375 = vmatpush3.bf16.msra.mxu1 %v3407_v9  ;;  %v3463_v63 = vld [vmem:[%s3546_s23 + $0x1d8] sm:$0xff]   ;;  %v3465_v1 = vld [vmem:[%s3546_s23 + $0x1e0] sm:$0xff]   ;;  %v3467_v3 = vld [vmem:[%s3546_s23 + $0x1e8] sm:$0xff]  }
  0x25   : > { %v3468_v4 = vld [vmem:[%s3546_s23 + $0xf0] sm:$0xff]   ;;  %v3470_v6 = vld [vmem:[%s3546_s23 + $0xf8] sm:$0xff]  }
  0x26   : > { %v3469_v5 = vld [vmem:[%s3546_s23 + $0x1f0] sm:$0xff]   ;;  %v3471_v7 = vld [vmem:[%s3546_s23 + $0x1f8] sm:$0xff]  }
  0x27   : > { %3233 = vmatmul.mubr.bf16.vlgmr.msra.gmra.mrb[0].mxu0 %v3410_v10  ;;  %3297 = vmatmul.mubr.bf16.vlgmr.msra.gmra.mrb[0].mxu1 %v3411_v11 }
  0x28   : > { %3236 = vmatprep.mubr.bf16.mxu0 %v3412_v12  ;;  %3300 = vmatprep.mubr.bf16.mxu1 %v3413_v13 }
  0x2f   : > { %3237 = vmatmul.mubr.bf16.gmra.mrb[4].mxu0 %v3414_v14  ;;  %3301 = vmatmul.mubr.bf16.gmra.mrb[4].mxu1 %v3415_v15 }
  0x30   : > { %3240 = vmatprep.mubr.bf16.mxu0 %v3416_v16  ;;  %3304 = vmatprep.mubr.bf16.mxu1 %v3417_v17 }
  0x37   : > { %3241 = vmatmul.mubr.bf16.gmra.mrb[8].mxu0 %v3418_v18  ;;  %3305 = vmatmul.mubr.bf16.gmra.mrb[8].mxu1 %v3419_v19 }
  0x38   : > { %3244 = vmatprep.mubr.bf16.mxu0 %v3420_v20  ;;  %3308 = vmatprep.mubr.bf16.mxu1 %v3421_v21 }
  0x3f   : > { %3245 = vmatmul.mubr.bf16.gmra.mrb[12].mxu0 %v3422_v22  ;;  %3309 = vmatmul.mubr.bf16.gmra.mrb[12].mxu1 %v3423_v23 }
  0x40   : > { %3248 = vmatprep.mubr.bf16.mxu0 %v3424_v24  ;;  %3312 = vmatprep.mubr.bf16.mxu1 %v3425_v25 }
  0x47   : > { %3249 = vmatmul.mubr.bf16.gmra.mrb[16].mxu0 %v3426_v26  ;;  %3313 = vmatmul.mubr.bf16.gmra.mrb[16].mxu1 %v3427_v27 }
  0x48   : > { %3252 = vmatprep.mubr.bf16.mxu0 %v3428_v28  ;;  %3316 = vmatprep.mubr.bf16.mxu1 %v3429_v29 }
  0x4f   : > { %3253 = vmatmul.mubr.bf16.gmra.mrb[20].mxu0 %v3430_v30  ;;  %3317 = vmatmul.mubr.bf16.gmra.mrb[20].mxu1 %v3431_v31 }
  0x50   : > { %3256 = vmatprep.mubr.bf16.mxu0 %v3432_v32  ;;  %3320 = vmatprep.mubr.bf16.mxu1 %v3433_v33 }
  0x57   : > { %3257 = vmatmul.mubr.bf16.gmra.mrb[24].mxu0 %v3434_v34  ;;  %3321 = vmatmul.mubr.bf16.gmra.mrb[24].mxu1 %v3435_v35 }
  0x58   : > { %3260 = vmatprep.mubr.bf16.mxu0 %v3436_v36  ;;  %3324 = vmatprep.mubr.bf16.mxu1 %v3437_v37 }
  0x5f   : > { %3261 = vmatmul.mubr.bf16.gmra.mrb[28].mxu0 %v3438_v38  ;;  %3325 = vmatmul.mubr.bf16.gmra.mrb[28].mxu1 %v3439_v39 }
  0x60   : > { %3264 = vmatprep.mubr.bf16.mxu0 %v3440_v40  ;;  %3328 = vmatprep.mubr.bf16.mxu1 %v3441_v41 }
  0x67   : > { %3265 = vmatmul.mubr.bf16.gmra.mrb[32].mxu0 %v3442_v42  ;;  %3329 = vmatmul.mubr.bf16.gmra.mrb[32].mxu1 %v3443_v43 }
  0x68   : > { %3268 = vmatprep.mubr.bf16.mxu0 %v3444_v44  ;;  %3332 = vmatprep.mubr.bf16.mxu1 %v3445_v45 }
  0x6f   : > { %3269 = vmatmul.mubr.bf16.gmra.mrb[36].mxu0 %v3446_v46  ;;  %3333 = vmatmul.mubr.bf16.gmra.mrb[36].mxu1 %v3447_v47 }
  0x70   : > { %3272 = vmatprep.mubr.bf16.mxu0 %v3448_v48  ;;  %3336 = vmatprep.mubr.bf16.mxu1 %v3449_v49 }
  0x77   : > { %3273 = vmatmul.mubr.bf16.gmra.mrb[40].mxu0 %v3450_v50  ;;  %3337 = vmatmul.mubr.bf16.gmra.mrb[40].mxu1 %v3451_v51 }
  0x78   : > { %3276 = vmatprep.mubr.bf16.mxu0 %v3452_v52  ;;  %3340 = vmatprep.mubr.bf16.mxu1 %v3453_v53 }
  0x7f   : > { %3277 = vmatmul.mubr.bf16.gmra.mrb[44].mxu0 %v3454_v54  ;;  %3341 = vmatmul.mubr.bf16.gmra.mrb[44].mxu1 %v3455_v55 }
  0x80   : > { %3280 = vmatprep.mubr.bf16.mxu0 %v3456_v56  ;;  %3344 = vmatprep.mubr.bf16.mxu1 %v3457_v57 }
  0x87   : > { %3281 = vmatmul.mubr.bf16.gmra.mrb[48].mxu0 %v3458_v58  ;;  %3345 = vmatmul.mubr.bf16.gmra.mrb[48].mxu1 %v3459_v59 }
  0x88   : > { %3284 = vmatprep.mubr.bf16.mxu0 %v3460_v60  ;;  %3348 = vmatprep.mubr.bf16.mxu1 %v3461_v61 }
  0x8f   : > { %3285 = vmatmul.mubr.bf16.gmra.mrb[52].mxu0 %v3462_v62  ;;  %3349 = vmatmul.mubr.bf16.gmra.mrb[52].mxu1 %v3463_v63 }
  0x90   : > { %3288 = vmatprep.mubr.bf16.mxu0 %v3464_v0  ;;  %3352 = vmatprep.mubr.bf16.mxu1 %v3465_v1 }
  0x97   : > { %3289 = vmatmul.mubr.bf16.gmra.mrb[56].mxu0 %v3466_v2  ;;  %3353 = vmatmul.mubr.bf16.gmra.mrb[56].mxu1 %v3467_v3 }
  0x98   : > { %3292 = vmatprep.mubr.bf16.mxu0 %v3468_v4  ;;  %3356 = vmatprep.mubr.bf16.mxu1 %v3469_v5 }
  0x9f   : > { %3293 = vmatmul.mubr.bf16.gmra.mrb[60].mxu0 %v3470_v6  ;;  %3357 = vmatmul.mubr.bf16.gmra.mrb[60].mxu1 %v3471_v7 }
  0xfa   : > { %v3234_v8 = vpop.f32.mrb[0].mxu0  ;;  %v3298_v9 = vpop.f32.mrb[0].mxu1 }
  0xfb   : > { %vm1316_vm0 = vcmp.gt.f32.partialorder %v3234_v8, 0.0  ;;  %v1444_v10 = vmul.f32 0.2, %v3234_v8  ;;  %v1508_v11 = vmul.f32 0.2, %v3298_v9  ;;  %vm1380_vm1 = vcmp.gt.f32.partialorder %v3298_v9, 0.0 }
  0xfc   : > { %v803_v12 = vpop.f32.mrb[1].mxu0  ;;  %v1059_v13 = vpop.f32.mrb[1].mxu1 }
  0xfd   : > { %v1442_v14 = vmul.f32 0.2, %v803_v12  ;;  %v3235_v15 = vpop.f32.mrb[2].mxu0  ;;  %v3299_v16 = vpop.f32.mrb[2].mxu1  ;;  %v1572_v17 = vsel %vm1316_vm0, %v3234_v8, %v1444_v10  ;;  %v1506_v18 = vmul.f32 0.2, %v1059_v13  ;;  %v1636_v20 = vsel %vm1380_vm1, %v3298_v9, %v1508_v11 }
  0xfe   : > { %vm1317_vm2 = vcmp.gt.f32.partialorder %v3235_v15, 0.0  ;;  %v1445_v19 = vmul.f32 0.2, %v3235_v15  ;;  %vm1314_vm3 = vcmp.gt.f32.partialorder %v803_v12, 0.0  ;;  %vm1381_vm4 = vcmp.gt.f32.partialorder %v3299_v16, 0.0  ;;  %v806_v22 = vpop.f32.mrb[3].mxu0 }
  0xff   : > { %v1509_v21 = vmul.f32 0.2, %v3299_v16  ;;  %v1062_v23 = vpop.f32.mrb[3].mxu1  ;;  %vm1378_vm5 = vcmp.gt.f32.partialorder %v1059_v13, 0.0  ;;  %vm1315_vm6 = vcmp.gt.f32.partialorder %v806_v22, 0.0  ;;  %v1570_v29 = vsel %vm1314_vm3, %v803_v12, %v1442_v14 }
 0x100   : > { %v1573_v24 = vsel %vm1317_vm2, %v3235_v15, %v1445_v19  ;;  %v1443_v25 = vmul.f32 0.2, %v806_v22  ;;  %vm1379_vm7 = vcmp.gt.f32.partialorder %v1062_v23, 0.0  ;;  %v1507_v28 = vmul.f32 0.2, %v1062_v23 }
 0x101   : > { %v2769_v26 = vpack.c.bf16 %v1573_v24, %v1572_v17  ;;  %v1637_v27 = vsel %vm1381_vm4, %v3299_v16, %v1509_v21  ;;  %v1634_v34 = vsel %vm1378_vm5, %v1059_v13, %v1506_v18 }
 0x102   : > { %v2929_v30 = vpack.c.bf16 %v1637_v27, %v1636_v20  ;;  %v1571_v31 = vsel %vm1315_vm6, %v806_v22, %v1443_v25  ;;  %v3238_v32 = vpop.f32.mrb[4].mxu0  ;;  %v3302_v33 = vpop.f32.mrb[4].mxu1  ;;  %v1635_v36 = vsel %vm1379_vm7, %v1062_v23, %v1507_v28 }
 0x103   : > { %3081 = vst [vmem:[%s3632_s8 + $0x8] sm:$0xff] %v2769_v26   ;;  %v2764_v35 = vpack.c.bf16 %v1571_v31, %v1570_v29  ;;  %v1448_v37 = vmul.f32 0.2, %v3238_v32  ;;  %v819_v38 = vpop.f32.mrb[5].mxu0  ;;  %v1075_v39 = vpop.f32.mrb[5].mxu1  ;;  %v2924_v40 = vpack.c.bf16 %v1635_v36, %v1634_v34  ;;  %vm1320_vm8 = vcmp.gt.f32.partialorder %v3238_v32, 0.0 }
 0x104   : > { %3113 = vst [vmem:[%s3632_s8 + $0x108] sm:$0xff] %v2929_v30   ;;  %v1512_v41 = vmul.f32 0.2, %v3302_v33  ;;  %v3239_v42 = vpop.f32.mrb[6].mxu0  ;;  %v3303_v43 = vpop.f32.mrb[6].mxu1  ;;  %vm1384_vm9 = vcmp.gt.f32.partialorder %v3302_v33, 0.0 }
 0x105   : > { %2765 = vst [vmem:[%s3632_s8] sm:$0xff] %v2764_v35   ;;  %v1446_v44 = vmul.f32 0.2, %v819_v38  ;;  %v1510_v45 = vmul.f32 0.2, %v1075_v39  ;;  %v822_v46 = vpop.f32.mrb[7].mxu0  ;;  %3112 = vst [vmem:[%s3632_s8 + $0x100] sm:$0xff] %v2924_v40   ;;  %v1576_v49 = vsel %vm1320_vm8, %v3238_v32, %v1448_v37 }
 0x106   : > { %vm1318_vm10 = vcmp.gt.f32.partialorder %v819_v38, 0.0  ;;  %vm1321_vm11 = vcmp.gt.f32.partialorder %v3239_v42, 0.0  ;;  %v1449_v47 = vmul.f32 0.2, %v3239_v42  ;;  %vm1385_vm12 = vcmp.gt.f32.partialorder %v3303_v43, 0.0  ;;  %v1078_v48 = vpop.f32.mrb[7].mxu1 }
 0x107   : > { %vm1382_vm13 = vcmp.gt.f32.partialorder %v1075_v39, 0.0  ;;  %v1513_v50 = vmul.f32 0.2, %v3303_v43  ;;  %vm1319_vm14 = vcmp.gt.f32.partialorder %v822_v46, 0.0  ;;  %v1447_v52 = vmul.f32 0.2, %v822_v46 }
 0x108   : > { %v1577_v51 = vsel %vm1321_vm11, %v3239_v42, %v1449_v47  ;;  %vm1383_vm15 = vcmp.gt.f32.partialorder %v1078_v48, 0.0  ;;  %v1511_v53 = vmul.f32 0.2, %v1078_v48  ;;  %v1640_v54 = vsel %vm1384_vm9, %v3302_v33, %v1512_v41 }
 0x109   : > { %v1574_v55 = vsel %vm1318_vm10, %v819_v38, %v1446_v44  ;;  %v2779_v56 = vpack.c.bf16 %v1577_v51, %v1576_v49  ;;  %v1641_v57 = vsel %vm1385_vm12, %v3303_v43, %v1513_v50  ;;  %v1638_v58 = vsel %vm1382_vm13, %v1075_v39, %v1510_v45 }
 0x10a   : > { %v2939_v59 = vpack.c.bf16 %v1641_v57, %v1640_v54  ;;  %v1575_v60 = vsel %vm1319_vm14, %v822_v46, %v1447_v52  ;;  %v1639_v61 = vsel %vm1383_vm15, %v1078_v48, %v1511_v53  ;;  %v3242_v62 = vpop.f32.mrb[8].mxu0  ;;  %v3306_v63 = vpop.f32.mrb[8].mxu1 }
 0x10b   : > { %3083 = vst [vmem:[%s3632_s8 + $0x18] sm:$0xff] %v2779_v56   ;;  %v2774_v0 = vpack.c.bf16 %v1575_v60, %v1574_v55  ;;  %v2934_v1 = vpack.c.bf16 %v1639_v61, %v1638_v58  ;;  %vm1324_vm0 = vcmp.gt.f32.partialorder %v3242_v62, 0.0  ;;  %v1452_v2 = vmul.f32 0.2, %v3242_v62  ;;  %v835_v3 = vpop.f32.mrb[9].mxu0  ;;  %v1091_v4 = vpop.f32.mrb[9].mxu1 }
 0x10c   : > { %3115 = vst [vmem:[%s3632_s8 + $0x118] sm:$0xff] %v2939_v59   ;;  %vm1388_vm1 = vcmp.gt.f32.partialorder %v3306_v63, 0.0  ;;  %v1516_v5 = vmul.f32 0.2, %v3306_v63  ;;  %v1450_v6 = vmul.f32 0.2, %v835_v3 }
 0x10d   : > { %3082 = vst [vmem:[%s3632_s8 + $0x10] sm:$0xff] %v2774_v0   ;;  %3114 = vst [vmem:[%s3632_s8 + $0x110] sm:$0xff] %v2934_v1   ;;  %v1514_v7 = vmul.f32 0.2, %v1091_v4  ;;  %v3243_v8 = vpop.f32.mrb[10].mxu0  ;;  %v3307_v9 = vpop.f32.mrb[10].mxu1  ;;  %v1580_v10 = vsel %vm1324_vm0, %v3242_v62, %v1452_v2 }
 0x10e   : > { %vm1322_vm2 = vcmp.gt.f32.partialorder %v835_v3, 0.0  ;;  %vm1325_vm3 = vcmp.gt.f32.partialorder %v3243_v8, 0.0  ;;  %v1453_v11 = vmul.f32 0.2, %v3243_v8  ;;  %v838_v12 = vpop.f32.mrb[11].mxu0  ;;  %v1094_v13 = vpop.f32.mrb[11].mxu1  ;;  %v1644_v18 = vsel %vm1388_vm1, %v3306_v63, %v1516_v5 }
 0x10f   : > { %vm1386_vm4 = vcmp.gt.f32.partialorder %v1091_v4, 0.0  ;;  %vm1389_vm5 = vcmp.gt.f32.partialorder %v3307_v9, 0.0  ;;  %v1517_v14 = vmul.f32 0.2, %v3307_v9  ;;  %vm1323_vm6 = vcmp.gt.f32.partialorder %v838_v12, 0.0 }
 0x110   : > { %v1581_v15 = vsel %vm1325_vm3, %v3243_v8, %v1453_v11  ;;  %v1451_v16 = vmul.f32 0.2, %v838_v12  ;;  %vm1387_vm7 = vcmp.gt.f32.partialorder %v1094_v13, 0.0  ;;  %v1515_v17 = vmul.f32 0.2, %v1094_v13 }
 0x111   : > { %v1578_v19 = vsel %vm1322_vm2, %v835_v3, %v1450_v6  ;;  %v2789_v20 = vpack.c.bf16 %v1581_v15, %v1580_v10  ;;  %v1645_v21 = vsel %vm1389_vm5, %v3307_v9, %v1517_v14  ;;  %v1642_v22 = vsel %vm1386_vm4, %v1091_v4, %v1514_v7 }
 0x112   : > { %v2949_v23 = vpack.c.bf16 %v1645_v21, %v1644_v18  ;;  %v1579_v24 = vsel %vm1323_vm6, %v838_v12, %v1451_v16  ;;  %v1643_v25 = vsel %vm1387_vm7, %v1094_v13, %v1515_v17  ;;  %v3246_v26 = vpop.f32.mrb[12].mxu0  ;;  %v3310_v27 = vpop.f32.mrb[12].mxu1 }
 0x113   : > { %3085 = vst [vmem:[%s3632_s8 + $0x28] sm:$0xff] %v2789_v20   ;;  %v2784_v28 = vpack.c.bf16 %v1579_v24, %v1578_v19  ;;  %v2944_v29 = vpack.c.bf16 %v1643_v25, %v1642_v22  ;;  %vm1328_vm8 = vcmp.gt.f32.partialorder %v3246_v26, 0.0  ;;  %v1456_v30 = vmul.f32 0.2, %v3246_v26  ;;  %v851_v31 = vpop.f32.mrb[13].mxu0  ;;  %v1107_v32 = vpop.f32.mrb[13].mxu1 }
 0x114   : > { %3117 = vst [vmem:[%s3632_s8 + $0x128] sm:$0xff] %v2949_v23   ;;  %vm1392_vm9 = vcmp.gt.f32.partialorder %v3310_v27, 0.0  ;;  %v1520_v33 = vmul.f32 0.2, %v3310_v27  ;;  %v1454_v34 = vmul.f32 0.2, %v851_v31 }
 0x115   : > { %3084 = vst [vmem:[%s3632_s8 + $0x20] sm:$0xff] %v2784_v28   ;;  %3116 = vst [vmem:[%s3632_s8 + $0x120] sm:$0xff] %v2944_v29   ;;  %v1518_v35 = vmul.f32 0.2, %v1107_v32  ;;  %v3247_v36 = vpop.f32.mrb[14].mxu0  ;;  %v3311_v37 = vpop.f32.mrb[14].mxu1  ;;  %v1584_v38 = vsel %vm1328_vm8, %v3246_v26, %v1456_v30 }
 0x116   : > { %vm1326_vm10 = vcmp.gt.f32.partialorder %v851_v31, 0.0  ;;  %vm1329_vm11 = vcmp.gt.f32.partialorder %v3247_v36, 0.0  ;;  %v1457_v39 = vmul.f32 0.2, %v3247_v36  ;;  %v854_v40 = vpop.f32.mrb[15].mxu0  ;;  %v1110_v41 = vpop.f32.mrb[15].mxu1  ;;  %v1648_v46 = vsel %vm1392_vm9, %v3310_v27, %v1520_v33 }
 0x117   : > { %vm1390_vm12 = vcmp.gt.f32.partialorder %v1107_v32, 0.0  ;;  %vm1393_vm13 = vcmp.gt.f32.partialorder %v3311_v37, 0.0  ;;  %v1521_v42 = vmul.f32 0.2, %v3311_v37  ;;  %vm1327_vm14 = vcmp.gt.f32.partialorder %v854_v40, 0.0 }
 0x118   : > { %v1585_v43 = vsel %vm1329_vm11, %v3247_v36, %v1457_v39  ;;  %v1455_v44 = vmul.f32 0.2, %v854_v40  ;;  %vm1391_vm15 = vcmp.gt.f32.partialorder %v1110_v41, 0.0  ;;  %v1519_v45 = vmul.f32 0.2, %v1110_v41 }
 0x119   : > { %v1582_v47 = vsel %vm1326_vm10, %v851_v31, %v1454_v34  ;;  %v2799_v48 = vpack.c.bf16 %v1585_v43, %v1584_v38  ;;  %v1649_v49 = vsel %vm1393_vm13, %v3311_v37, %v1521_v42  ;;  %v1646_v50 = vsel %vm1390_vm12, %v1107_v32, %v1518_v35 }
 0x11a   : > { %v2959_v51 = vpack.c.bf16 %v1649_v49, %v1648_v46  ;;  %v1583_v52 = vsel %vm1327_vm14, %v854_v40, %v1455_v44  ;;  %v1647_v53 = vsel %vm1391_vm15, %v1110_v41, %v1519_v45  ;;  %v3250_v54 = vpop.f32.mrb[16].mxu0  ;;  %v3314_v55 = vpop.f32.mrb[16].mxu1 }
 0x11b   : > { %3087 = vst [vmem:[%s3632_s8 + $0x38] sm:$0xff] %v2799_v48   ;;  %v2794_v56 = vpack.c.bf16 %v1583_v52, %v1582_v47  ;;  %v2954_v57 = vpack.c.bf16 %v1647_v53, %v1646_v50  ;;  %vm1332_vm0 = vcmp.gt.f32.partialorder %v3250_v54, 0.0  ;;  %v1460_v58 = vmul.f32 0.2, %v3250_v54  ;;  %v867_v59 = vpop.f32.mrb[17].mxu0  ;;  %v1123_v60 = vpop.f32.mrb[17].mxu1 }
 0x11c   : > { %3119 = vst [vmem:[%s3632_s8 + $0x138] sm:$0xff] %v2959_v51   ;;  %vm1396_vm1 = vcmp.gt.f32.partialorder %v3314_v55, 0.0  ;;  %v1524_v61 = vmul.f32 0.2, %v3314_v55  ;;  %v1458_v62 = vmul.f32 0.2, %v867_v59 }
 0x11d   : > { %3086 = vst [vmem:[%s3632_s8 + $0x30] sm:$0xff] %v2794_v56   ;;  %3118 = vst [vmem:[%s3632_s8 + $0x130] sm:$0xff] %v2954_v57   ;;  %v1522_v63 = vmul.f32 0.2, %v1123_v60  ;;  %v3251_v0 = vpop.f32.mrb[18].mxu0  ;;  %v3315_v1 = vpop.f32.mrb[18].mxu1  ;;  %v1588_v2 = vsel %vm1332_vm0, %v3250_v54, %v1460_v58 }
 0x11e   : > { %vm1330_vm2 = vcmp.gt.f32.partialorder %v867_v59, 0.0  ;;  %vm1333_vm3 = vcmp.gt.f32.partialorder %v3251_v0, 0.0  ;;  %v1461_v3 = vmul.f32 0.2, %v3251_v0  ;;  %v870_v4 = vpop.f32.mrb[19].mxu0  ;;  %v1126_v5 = vpop.f32.mrb[19].mxu1  ;;  %v1652_v10 = vsel %vm1396_vm1, %v3314_v55, %v1524_v61 }
 0x11f   : > { %vm1394_vm4 = vcmp.gt.f32.partialorder %v1123_v60, 0.0  ;;  %vm1397_vm5 = vcmp.gt.f32.partialorder %v3315_v1, 0.0  ;;  %v1525_v6 = vmul.f32 0.2, %v3315_v1  ;;  %vm1331_vm6 = vcmp.gt.f32.partialorder %v870_v4, 0.0 }
 0x120   : > { %v1589_v7 = vsel %vm1333_vm3, %v3251_v0, %v1461_v3  ;;  %v1459_v8 = vmul.f32 0.2, %v870_v4  ;;  %vm1395_vm7 = vcmp.gt.f32.partialorder %v1126_v5, 0.0  ;;  %v1523_v9 = vmul.f32 0.2, %v1126_v5 }
 0x121   : > { %v1586_v11 = vsel %vm1330_vm2, %v867_v59, %v1458_v62  ;;  %v2809_v12 = vpack.c.bf16 %v1589_v7, %v1588_v2  ;;  %v1653_v13 = vsel %vm1397_vm5, %v3315_v1, %v1525_v6  ;;  %v1650_v14 = vsel %vm1394_vm4, %v1123_v60, %v1522_v63 }
 0x122   : > { %v2969_v15 = vpack.c.bf16 %v1653_v13, %v1652_v10  ;;  %v1587_v16 = vsel %vm1331_vm6, %v870_v4, %v1459_v8  ;;  %v1651_v17 = vsel %vm1395_vm7, %v1126_v5, %v1523_v9  ;;  %v3254_v18 = vpop.f32.mrb[20].mxu0  ;;  %v3318_v19 = vpop.f32.mrb[20].mxu1 }
 0x123   : > { %3089 = vst [vmem:[%s3632_s8 + $0x48] sm:$0xff] %v2809_v12   ;;  %v2804_v20 = vpack.c.bf16 %v1587_v16, %v1586_v11  ;;  %v2964_v21 = vpack.c.bf16 %v1651_v17, %v1650_v14  ;;  %vm1336_vm8 = vcmp.gt.f32.partialorder %v3254_v18, 0.0  ;;  %v1464_v22 = vmul.f32 0.2, %v3254_v18  ;;  %v883_v23 = vpop.f32.mrb[21].mxu0  ;;  %v1139_v24 = vpop.f32.mrb[21].mxu1 }
 0x124   : > { %3121 = vst [vmem:[%s3632_s8 + $0x148] sm:$0xff] %v2969_v15   ;;  %vm1400_vm9 = vcmp.gt.f32.partialorder %v3318_v19, 0.0  ;;  %v1528_v25 = vmul.f32 0.2, %v3318_v19  ;;  %v1462_v26 = vmul.f32 0.2, %v883_v23 }
 0x125   : > { %3088 = vst [vmem:[%s3632_s8 + $0x40] sm:$0xff] %v2804_v20   ;;  %3120 = vst [vmem:[%s3632_s8 + $0x140] sm:$0xff] %v2964_v21   ;;  %v1526_v27 = vmul.f32 0.2, %v1139_v24  ;;  %v3255_v28 = vpop.f32.mrb[22].mxu0  ;;  %v3319_v29 = vpop.f32.mrb[22].mxu1  ;;  %v1592_v30 = vsel %vm1336_vm8, %v3254_v18, %v1464_v22 }
 0x126   : > { %vm1334_vm10 = vcmp.gt.f32.partialorder %v883_v23, 0.0  ;;  %vm1337_vm11 = vcmp.gt.f32.partialorder %v3255_v28, 0.0  ;;  %v1465_v31 = vmul.f32 0.2, %v3255_v28  ;;  %v886_v32 = vpop.f32.mrb[23].mxu0  ;;  %v1142_v33 = vpop.f32.mrb[23].mxu1  ;;  %v1656_v38 = vsel %vm1400_vm9, %v3318_v19, %v1528_v25 }
 0x127   : > { %vm1398_vm12 = vcmp.gt.f32.partialorder %v1139_v24, 0.0  ;;  %vm1401_vm13 = vcmp.gt.f32.partialorder %v3319_v29, 0.0  ;;  %v1529_v34 = vmul.f32 0.2, %v3319_v29  ;;  %vm1335_vm14 = vcmp.gt.f32.partialorder %v886_v32, 0.0 }
 0x128   : > { %v1593_v35 = vsel %vm1337_vm11, %v3255_v28, %v1465_v31  ;;  %v1463_v36 = vmul.f32 0.2, %v886_v32  ;;  %vm1399_vm15 = vcmp.gt.f32.partialorder %v1142_v33, 0.0  ;;  %v1527_v37 = vmul.f32 0.2, %v1142_v33 }
 0x129   : > { %v1590_v39 = vsel %vm1334_vm10, %v883_v23, %v1462_v26  ;;  %v2819_v40 = vpack.c.bf16 %v1593_v35, %v1592_v30  ;;  %v1657_v41 = vsel %vm1401_vm13, %v3319_v29, %v1529_v34  ;;  %v1654_v42 = vsel %vm1398_vm12, %v1139_v24, %v1526_v27 }
 0x12a   : > { %v2979_v43 = vpack.c.bf16 %v1657_v41, %v1656_v38  ;;  %v1591_v44 = vsel %vm1335_vm14, %v886_v32, %v1463_v36  ;;  %v1655_v45 = vsel %vm1399_vm15, %v1142_v33, %v1527_v37  ;;  %v3258_v46 = vpop.f32.mrb[24].mxu0  ;;  %v3322_v47 = vpop.f32.mrb[24].mxu1 }
 0x12b   : > { %3091 = vst [vmem:[%s3632_s8 + $0x58] sm:$0xff] %v2819_v40   ;;  %v2814_v48 = vpack.c.bf16 %v1591_v44, %v1590_v39  ;;  %v2974_v49 = vpack.c.bf16 %v1655_v45, %v1654_v42  ;;  %vm1340_vm0 = vcmp.gt.f32.partialorder %v3258_v46, 0.0  ;;  %v1468_v50 = vmul.f32 0.2, %v3258_v46  ;;  %v899_v51 = vpop.f32.mrb[25].mxu0  ;;  %v1155_v52 = vpop.f32.mrb[25].mxu1 }
 0x12c   : > { %3123 = vst [vmem:[%s3632_s8 + $0x158] sm:$0xff] %v2979_v43   ;;  %vm1404_vm1 = vcmp.gt.f32.partialorder %v3322_v47, 0.0  ;;  %v1532_v53 = vmul.f32 0.2, %v3322_v47  ;;  %v1466_v54 = vmul.f32 0.2, %v899_v51 }
 0x12d   : > { %3090 = vst [vmem:[%s3632_s8 + $0x50] sm:$0xff] %v2814_v48   ;;  %3122 = vst [vmem:[%s3632_s8 + $0x150] sm:$0xff] %v2974_v49   ;;  %v1530_v55 = vmul.f32 0.2, %v1155_v52  ;;  %v3259_v56 = vpop.f32.mrb[26].mxu0  ;;  %v3323_v57 = vpop.f32.mrb[26].mxu1  ;;  %v1596_v58 = vsel %vm1340_vm0, %v3258_v46, %v1468_v50 }
 0x12e   : > { %vm1338_vm2 = vcmp.gt.f32.partialorder %v899_v51, 0.0  ;;  %vm1341_vm3 = vcmp.gt.f32.partialorder %v3259_v56, 0.0  ;;  %v1469_v59 = vmul.f32 0.2, %v3259_v56  ;;  %v902_v60 = vpop.f32.mrb[27].mxu0  ;;  %v1158_v61 = vpop.f32.mrb[27].mxu1  ;;  %v1660_v2 = vsel %vm1404_vm1, %v3322_v47, %v1532_v53 }
 0x12f   : > { %vm1402_vm4 = vcmp.gt.f32.partialorder %v1155_v52, 0.0  ;;  %vm1405_vm5 = vcmp.gt.f32.partialorder %v3323_v57, 0.0  ;;  %v1533_v62 = vmul.f32 0.2, %v3323_v57  ;;  %vm1339_vm6 = vcmp.gt.f32.partialorder %v902_v60, 0.0 }
 0x130   : > { %v1597_v63 = vsel %vm1341_vm3, %v3259_v56, %v1469_v59  ;;  %v1467_v0 = vmul.f32 0.2, %v902_v60  ;;  %vm1403_vm7 = vcmp.gt.f32.partialorder %v1158_v61, 0.0  ;;  %v1531_v1 = vmul.f32 0.2, %v1158_v61 }
 0x131   : > { %v1594_v3 = vsel %vm1338_vm2, %v899_v51, %v1466_v54  ;;  %v2829_v4 = vpack.c.bf16 %v1597_v63, %v1596_v58  ;;  %v1661_v5 = vsel %vm1405_vm5, %v3323_v57, %v1533_v62  ;;  %v1658_v6 = vsel %vm1402_vm4, %v1155_v52, %v1530_v55 }
 0x132   : > { %v2989_v7 = vpack.c.bf16 %v1661_v5, %v1660_v2  ;;  %v1595_v8 = vsel %vm1339_vm6, %v902_v60, %v1467_v0  ;;  %v1659_v9 = vsel %vm1403_vm7, %v1158_v61, %v1531_v1  ;;  %v3262_v10 = vpop.f32.mrb[28].mxu0  ;;  %v3326_v11 = vpop.f32.mrb[28].mxu1 }
 0x133   : > { %3093 = vst [vmem:[%s3632_s8 + $0x68] sm:$0xff] %v2829_v4   ;;  %v2824_v12 = vpack.c.bf16 %v1595_v8, %v1594_v3  ;;  %v2984_v13 = vpack.c.bf16 %v1659_v9, %v1658_v6  ;;  %vm1344_vm8 = vcmp.gt.f32.partialorder %v3262_v10, 0.0  ;;  %v1472_v14 = vmul.f32 0.2, %v3262_v10  ;;  %v915_v15 = vpop.f32.mrb[29].mxu0  ;;  %v1171_v16 = vpop.f32.mrb[29].mxu1 }
 0x134   : > { %3125 = vst [vmem:[%s3632_s8 + $0x168] sm:$0xff] %v2989_v7   ;;  %vm1408_vm9 = vcmp.gt.f32.partialorder %v3326_v11, 0.0  ;;  %v1536_v17 = vmul.f32 0.2, %v3326_v11  ;;  %v1470_v18 = vmul.f32 0.2, %v915_v15 }
 0x135   : > { %3092 = vst [vmem:[%s3632_s8 + $0x60] sm:$0xff] %v2824_v12   ;;  %3124 = vst [vmem:[%s3632_s8 + $0x160] sm:$0xff] %v2984_v13   ;;  %v1534_v19 = vmul.f32 0.2, %v1171_v16  ;;  %v3263_v20 = vpop.f32.mrb[30].mxu0  ;;  %v3327_v21 = vpop.f32.mrb[30].mxu1  ;;  %v1600_v22 = vsel %vm1344_vm8, %v3262_v10, %v1472_v14 }
 0x136   : > { %vm1342_vm10 = vcmp.gt.f32.partialorder %v915_v15, 0.0  ;;  %vm1345_vm11 = vcmp.gt.f32.partialorder %v3263_v20, 0.0  ;;  %v1473_v23 = vmul.f32 0.2, %v3263_v20  ;;  %v918_v24 = vpop.f32.mrb[31].mxu0  ;;  %v1174_v25 = vpop.f32.mrb[31].mxu1  ;;  %v1664_v30 = vsel %vm1408_vm9, %v3326_v11, %v1536_v17 }
 0x137   : > { %vm1406_vm12 = vcmp.gt.f32.partialorder %v1171_v16, 0.0  ;;  %vm1409_vm13 = vcmp.gt.f32.partialorder %v3327_v21, 0.0  ;;  %v1537_v26 = vmul.f32 0.2, %v3327_v21  ;;  %vm1343_vm14 = vcmp.gt.f32.partialorder %v918_v24, 0.0 }
 0x138   : > { %v1601_v27 = vsel %vm1345_vm11, %v3263_v20, %v1473_v23  ;;  %v1471_v28 = vmul.f32 0.2, %v918_v24  ;;  %vm1407_vm15 = vcmp.gt.f32.partialorder %v1174_v25, 0.0  ;;  %v1535_v29 = vmul.f32 0.2, %v1174_v25 }
 0x139   : > { %v1598_v31 = vsel %vm1342_vm10, %v915_v15, %v1470_v18  ;;  %v2839_v32 = vpack.c.bf16 %v1601_v27, %v1600_v22  ;;  %v1665_v33 = vsel %vm1409_vm13, %v3327_v21, %v1537_v26  ;;  %v1662_v34 = vsel %vm1406_vm12, %v1171_v16, %v1534_v19 }
 0x13a   : > { %v2999_v35 = vpack.c.bf16 %v1665_v33, %v1664_v30  ;;  %v1599_v36 = vsel %vm1343_vm14, %v918_v24, %v1471_v28  ;;  %v1663_v37 = vsel %vm1407_vm15, %v1174_v25, %v1535_v29  ;;  %v3266_v38 = vpop.f32.mrb[32].mxu0  ;;  %v3330_v39 = vpop.f32.mrb[32].mxu1 }
 0x13b   : > { %3095 = vst [vmem:[%s3632_s8 + $0x78] sm:$0xff] %v2839_v32   ;;  %v2834_v40 = vpack.c.bf16 %v1599_v36, %v1598_v31  ;;  %v2994_v41 = vpack.c.bf16 %v1663_v37, %v1662_v34  ;;  %vm1348_vm0 = vcmp.gt.f32.partialorder %v3266_v38, 0.0  ;;  %v1476_v42 = vmul.f32 0.2, %v3266_v38  ;;  %v931_v43 = vpop.f32.mrb[33].mxu0  ;;  %v1187_v44 = vpop.f32.mrb[33].mxu1 }
 0x13c   : > { %3127 = vst [vmem:[%s3632_s8 + $0x178] sm:$0xff] %v2999_v35   ;;  %vm1412_vm1 = vcmp.gt.f32.partialorder %v3330_v39, 0.0  ;;  %v1540_v45 = vmul.f32 0.2, %v3330_v39  ;;  %v1474_v46 = vmul.f32 0.2, %v931_v43 }
 0x13d   : > { %3094 = vst [vmem:[%s3632_s8 + $0x70] sm:$0xff] %v2834_v40   ;;  %3126 = vst [vmem:[%s3632_s8 + $0x170] sm:$0xff] %v2994_v41   ;;  %v1538_v47 = vmul.f32 0.2, %v1187_v44  ;;  %v3267_v48 = vpop.f32.mrb[34].mxu0  ;;  %v3331_v49 = vpop.f32.mrb[34].mxu1  ;;  %v1604_v50 = vsel %vm1348_vm0, %v3266_v38, %v1476_v42 }
 0x13e   : > { %vm1346_vm2 = vcmp.gt.f32.partialorder %v931_v43, 0.0  ;;  %vm1349_vm3 = vcmp.gt.f32.partialorder %v3267_v48, 0.0  ;;  %v1477_v51 = vmul.f32 0.2, %v3267_v48  ;;  %v934_v52 = vpop.f32.mrb[35].mxu0  ;;  %v1190_v53 = vpop.f32.mrb[35].mxu1  ;;  %v1668_v58 = vsel %vm1412_vm1, %v3330_v39, %v1540_v45 }
 0x13f   : > { %vm1410_vm4 = vcmp.gt.f32.partialorder %v1187_v44, 0.0  ;;  %vm1413_vm5 = vcmp.gt.f32.partialorder %v3331_v49, 0.0  ;;  %v1541_v54 = vmul.f32 0.2, %v3331_v49  ;;  %vm1347_vm6 = vcmp.gt.f32.partialorder %v934_v52, 0.0 }
 0x140   : > { %v1605_v55 = vsel %vm1349_vm3, %v3267_v48, %v1477_v51  ;;  %v1475_v56 = vmul.f32 0.2, %v934_v52  ;;  %vm1411_vm7 = vcmp.gt.f32.partialorder %v1190_v53, 0.0  ;;  %v1539_v57 = vmul.f32 0.2, %v1190_v53 }
 0x141   : > { %v1602_v59 = vsel %vm1346_vm2, %v931_v43, %v1474_v46  ;;  %v2849_v60 = vpack.c.bf16 %v1605_v55, %v1604_v50  ;;  %v1669_v61 = vsel %vm1413_vm5, %v3331_v49, %v1541_v54  ;;  %v1666_v62 = vsel %vm1410_vm4, %v1187_v44, %v1538_v47 }
 0x142   : > { %v3009_v63 = vpack.c.bf16 %v1669_v61, %v1668_v58  ;;  %v1603_v0 = vsel %vm1347_vm6, %v934_v52, %v1475_v56  ;;  %v1667_v1 = vsel %vm1411_vm7, %v1190_v53, %v1539_v57  ;;  %v3270_v2 = vpop.f32.mrb[36].mxu0  ;;  %v3334_v3 = vpop.f32.mrb[36].mxu1 }
 0x143   : > { %3097 = vst [vmem:[%s3632_s8 + $0x88] sm:$0xff] %v2849_v60   ;;  %v2844_v4 = vpack.c.bf16 %v1603_v0, %v1602_v59  ;;  %v3004_v5 = vpack.c.bf16 %v1667_v1, %v1666_v62  ;;  %vm1352_vm8 = vcmp.gt.f32.partialorder %v3270_v2, 0.0  ;;  %v1480_v6 = vmul.f32 0.2, %v3270_v2  ;;  %v947_v7 = vpop.f32.mrb[37].mxu0  ;;  %v1203_v8 = vpop.f32.mrb[37].mxu1 }
 0x144   : > { %3129 = vst [vmem:[%s3632_s8 + $0x188] sm:$0xff] %v3009_v63   ;;  %vm1416_vm9 = vcmp.gt.f32.partialorder %v3334_v3, 0.0  ;;  %v1544_v9 = vmul.f32 0.2, %v3334_v3  ;;  %v1478_v10 = vmul.f32 0.2, %v947_v7 }
 0x145   : > { %3096 = vst [vmem:[%s3632_s8 + $0x80] sm:$0xff] %v2844_v4   ;;  %3128 = vst [vmem:[%s3632_s8 + $0x180] sm:$0xff] %v3004_v5   ;;  %v1542_v11 = vmul.f32 0.2, %v1203_v8  ;;  %v3271_v12 = vpop.f32.mrb[38].mxu0  ;;  %v3335_v13 = vpop.f32.mrb[38].mxu1  ;;  %v1608_v14 = vsel %vm1352_vm8, %v3270_v2, %v1480_v6 }
 0x146   : > { %vm1350_vm10 = vcmp.gt.f32.partialorder %v947_v7, 0.0  ;;  %vm1353_vm11 = vcmp.gt.f32.partialorder %v3271_v12, 0.0  ;;  %v1481_v15 = vmul.f32 0.2, %v3271_v12  ;;  %v950_v16 = vpop.f32.mrb[39].mxu0  ;;  %v1206_v17 = vpop.f32.mrb[39].mxu1  ;;  %v1672_v22 = vsel %vm1416_vm9, %v3334_v3, %v1544_v9 }
 0x147   : > { %vm1414_vm12 = vcmp.gt.f32.partialorder %v1203_v8, 0.0  ;;  %vm1417_vm13 = vcmp.gt.f32.partialorder %v3335_v13, 0.0  ;;  %v1545_v18 = vmul.f32 0.2, %v3335_v13  ;;  %vm1351_vm14 = vcmp.gt.f32.partialorder %v950_v16, 0.0 }
 0x148   : > { %v1609_v19 = vsel %vm1353_vm11, %v3271_v12, %v1481_v15  ;;  %v1479_v20 = vmul.f32 0.2, %v950_v16  ;;  %vm1415_vm15 = vcmp.gt.f32.partialorder %v1206_v17, 0.0  ;;  %v1543_v21 = vmul.f32 0.2, %v1206_v17 }
 0x149   : > { %v1606_v23 = vsel %vm1350_vm10, %v947_v7, %v1478_v10  ;;  %v2859_v24 = vpack.c.bf16 %v1609_v19, %v1608_v14  ;;  %v1673_v25 = vsel %vm1417_vm13, %v3335_v13, %v1545_v18  ;;  %v1670_v26 = vsel %vm1414_vm12, %v1203_v8, %v1542_v11 }
 0x14a   : > { %v3019_v27 = vpack.c.bf16 %v1673_v25, %v1672_v22  ;;  %v1607_v28 = vsel %vm1351_vm14, %v950_v16, %v1479_v20  ;;  %v1671_v29 = vsel %vm1415_vm15, %v1206_v17, %v1543_v21  ;;  %v3274_v30 = vpop.f32.mrb[40].mxu0  ;;  %v3338_v31 = vpop.f32.mrb[40].mxu1 }
 0x14b   : > { %3099 = vst [vmem:[%s3632_s8 + $0x98] sm:$0xff] %v2859_v24   ;;  %v2854_v32 = vpack.c.bf16 %v1607_v28, %v1606_v23  ;;  %v3014_v33 = vpack.c.bf16 %v1671_v29, %v1670_v26  ;;  %vm1356_vm0 = vcmp.gt.f32.partialorder %v3274_v30, 0.0  ;;  %v1484_v34 = vmul.f32 0.2, %v3274_v30  ;;  %v963_v35 = vpop.f32.mrb[41].mxu0  ;;  %v1219_v36 = vpop.f32.mrb[41].mxu1 }
 0x14c   : > { %3131 = vst [vmem:[%s3632_s8 + $0x198] sm:$0xff] %v3019_v27   ;;  %vm1420_vm1 = vcmp.gt.f32.partialorder %v3338_v31, 0.0  ;;  %v1548_v37 = vmul.f32 0.2, %v3338_v31  ;;  %v1482_v38 = vmul.f32 0.2, %v963_v35 }
 0x14d   : > { %3098 = vst [vmem:[%s3632_s8 + $0x90] sm:$0xff] %v2854_v32   ;;  %3130 = vst [vmem:[%s3632_s8 + $0x190] sm:$0xff] %v3014_v33   ;;  %v1546_v39 = vmul.f32 0.2, %v1219_v36  ;;  %v3275_v40 = vpop.f32.mrb[42].mxu0  ;;  %v3339_v41 = vpop.f32.mrb[42].mxu1  ;;  %v1612_v42 = vsel %vm1356_vm0, %v3274_v30, %v1484_v34 }
 0x14e   : > { %vm1354_vm2 = vcmp.gt.f32.partialorder %v963_v35, 0.0  ;;  %vm1357_vm3 = vcmp.gt.f32.partialorder %v3275_v40, 0.0  ;;  %v1485_v43 = vmul.f32 0.2, %v3275_v40  ;;  %v966_v44 = vpop.f32.mrb[43].mxu0  ;;  %v1222_v45 = vpop.f32.mrb[43].mxu1  ;;  %v1676_v50 = vsel %vm1420_vm1, %v3338_v31, %v1548_v37 }
 0x14f   : > { %vm1418_vm4 = vcmp.gt.f32.partialorder %v1219_v36, 0.0  ;;  %vm1421_vm5 = vcmp.gt.f32.partialorder %v3339_v41, 0.0  ;;  %v1549_v46 = vmul.f32 0.2, %v3339_v41  ;;  %vm1355_vm6 = vcmp.gt.f32.partialorder %v966_v44, 0.0 }
 0x150   : > { %v1613_v47 = vsel %vm1357_vm3, %v3275_v40, %v1485_v43  ;;  %v1483_v48 = vmul.f32 0.2, %v966_v44  ;;  %vm1419_vm7 = vcmp.gt.f32.partialorder %v1222_v45, 0.0  ;;  %v1547_v49 = vmul.f32 0.2, %v1222_v45 }
 0x151   : > { %v1610_v51 = vsel %vm1354_vm2, %v963_v35, %v1482_v38  ;;  %v2869_v52 = vpack.c.bf16 %v1613_v47, %v1612_v42  ;;  %v1677_v53 = vsel %vm1421_vm5, %v3339_v41, %v1549_v46  ;;  %v1674_v54 = vsel %vm1418_vm4, %v1219_v36, %v1546_v39 }
 0x152   : > { %v3029_v55 = vpack.c.bf16 %v1677_v53, %v1676_v50  ;;  %v1611_v56 = vsel %vm1355_vm6, %v966_v44, %v1483_v48  ;;  %v1675_v57 = vsel %vm1419_vm7, %v1222_v45, %v1547_v49  ;;  %v3278_v58 = vpop.f32.mrb[44].mxu0  ;;  %v3342_v59 = vpop.f32.mrb[44].mxu1 }
 0x153   : > { %3101 = vst [vmem:[%s3632_s8 + $0xa8] sm:$0xff] %v2869_v52   ;;  %v2864_v60 = vpack.c.bf16 %v1611_v56, %v1610_v51  ;;  %v3024_v61 = vpack.c.bf16 %v1675_v57, %v1674_v54  ;;  %vm1360_vm8 = vcmp.gt.f32.partialorder %v3278_v58, 0.0  ;;  %v1488_v62 = vmul.f32 0.2, %v3278_v58  ;;  %v979_v63 = vpop.f32.mrb[45].mxu0  ;;  %v1235_v0 = vpop.f32.mrb[45].mxu1 }
 0x154   : > { %3133 = vst [vmem:[%s3632_s8 + $0x1a8] sm:$0xff] %v3029_v55   ;;  %vm1424_vm9 = vcmp.gt.f32.partialorder %v3342_v59, 0.0  ;;  %v1552_v1 = vmul.f32 0.2, %v3342_v59  ;;  %v1486_v2 = vmul.f32 0.2, %v979_v63 }
 0x155   : > { %3100 = vst [vmem:[%s3632_s8 + $0xa0] sm:$0xff] %v2864_v60   ;;  %3132 = vst [vmem:[%s3632_s8 + $0x1a0] sm:$0xff] %v3024_v61   ;;  %v1550_v3 = vmul.f32 0.2, %v1235_v0  ;;  %v3279_v4 = vpop.f32.mrb[46].mxu0  ;;  %v3343_v5 = vpop.f32.mrb[46].mxu1  ;;  %v1616_v6 = vsel %vm1360_vm8, %v3278_v58, %v1488_v62 }
 0x156   : > { %vm1358_vm10 = vcmp.gt.f32.partialorder %v979_v63, 0.0  ;;  %vm1361_vm11 = vcmp.gt.f32.partialorder %v3279_v4, 0.0  ;;  %v1489_v7 = vmul.f32 0.2, %v3279_v4  ;;  %v982_v8 = vpop.f32.mrb[47].mxu0  ;;  %v1238_v9 = vpop.f32.mrb[47].mxu1  ;;  %v1680_v14 = vsel %vm1424_vm9, %v3342_v59, %v1552_v1 }
 0x157   : > { %vm1422_vm12 = vcmp.gt.f32.partialorder %v1235_v0, 0.0  ;;  %vm1425_vm13 = vcmp.gt.f32.partialorder %v3343_v5, 0.0  ;;  %v1553_v10 = vmul.f32 0.2, %v3343_v5  ;;  %vm1359_vm14 = vcmp.gt.f32.partialorder %v982_v8, 0.0 }
 0x158   : > { %v1617_v11 = vsel %vm1361_vm11, %v3279_v4, %v1489_v7  ;;  %v1487_v12 = vmul.f32 0.2, %v982_v8  ;;  %vm1423_vm15 = vcmp.gt.f32.partialorder %v1238_v9, 0.0  ;;  %v1551_v13 = vmul.f32 0.2, %v1238_v9 }
 0x159   : > { %v1614_v15 = vsel %vm1358_vm10, %v979_v63, %v1486_v2  ;;  %v2879_v16 = vpack.c.bf16 %v1617_v11, %v1616_v6  ;;  %v1681_v17 = vsel %vm1425_vm13, %v3343_v5, %v1553_v10  ;;  %v1678_v18 = vsel %vm1422_vm12, %v1235_v0, %v1550_v3 }
 0x15a   : > { %v3039_v19 = vpack.c.bf16 %v1681_v17, %v1680_v14  ;;  %v1615_v20 = vsel %vm1359_vm14, %v982_v8, %v1487_v12  ;;  %v1679_v21 = vsel %vm1423_vm15, %v1238_v9, %v1551_v13  ;;  %v3282_v22 = vpop.f32.mrb[48].mxu0  ;;  %v3346_v23 = vpop.f32.mrb[48].mxu1 }
 0x15b   : > { %3103 = vst [vmem:[%s3632_s8 + $0xb8] sm:$0xff] %v2879_v16   ;;  %v2874_v24 = vpack.c.bf16 %v1615_v20, %v1614_v15  ;;  %v3034_v25 = vpack.c.bf16 %v1679_v21, %v1678_v18  ;;  %vm1364_vm0 = vcmp.gt.f32.partialorder %v3282_v22, 0.0  ;;  %v1492_v26 = vmul.f32 0.2, %v3282_v22  ;;  %v995_v27 = vpop.f32.mrb[49].mxu0  ;;  %v1251_v28 = vpop.f32.mrb[49].mxu1 }
 0x15c   : > { %3135 = vst [vmem:[%s3632_s8 + $0x1b8] sm:$0xff] %v3039_v19   ;;  %vm1428_vm1 = vcmp.gt.f32.partialorder %v3346_v23, 0.0  ;;  %v1556_v29 = vmul.f32 0.2, %v3346_v23  ;;  %v1490_v30 = vmul.f32 0.2, %v995_v27 }
 0x15d   : > { %3102 = vst [vmem:[%s3632_s8 + $0xb0] sm:$0xff] %v2874_v24   ;;  %3134 = vst [vmem:[%s3632_s8 + $0x1b0] sm:$0xff] %v3034_v25   ;;  %v1554_v31 = vmul.f32 0.2, %v1251_v28  ;;  %v3283_v32 = vpop.f32.mrb[50].mxu0  ;;  %v3347_v33 = vpop.f32.mrb[50].mxu1  ;;  %v1620_v34 = vsel %vm1364_vm0, %v3282_v22, %v1492_v26 }
 0x15e   : > { %vm1362_vm2 = vcmp.gt.f32.partialorder %v995_v27, 0.0  ;;  %vm1365_vm3 = vcmp.gt.f32.partialorder %v3283_v32, 0.0  ;;  %v1493_v35 = vmul.f32 0.2, %v3283_v32  ;;  %v998_v36 = vpop.f32.mrb[51].mxu0  ;;  %v1254_v37 = vpop.f32.mrb[51].mxu1  ;;  %v1684_v42 = vsel %vm1428_vm1, %v3346_v23, %v1556_v29 }
 0x15f   : > { %vm1426_vm4 = vcmp.gt.f32.partialorder %v1251_v28, 0.0  ;;  %vm1429_vm5 = vcmp.gt.f32.partialorder %v3347_v33, 0.0  ;;  %v1557_v38 = vmul.f32 0.2, %v3347_v33  ;;  %vm1363_vm6 = vcmp.gt.f32.partialorder %v998_v36, 0.0 }
 0x160   : > { %v1621_v39 = vsel %vm1365_vm3, %v3283_v32, %v1493_v35  ;;  %v1491_v40 = vmul.f32 0.2, %v998_v36  ;;  %vm1427_vm7 = vcmp.gt.f32.partialorder %v1254_v37, 0.0  ;;  %v1555_v41 = vmul.f32 0.2, %v1254_v37 }
 0x161   : > { %v1618_v43 = vsel %vm1362_vm2, %v995_v27, %v1490_v30  ;;  %v2889_v44 = vpack.c.bf16 %v1621_v39, %v1620_v34  ;;  %v1685_v45 = vsel %vm1429_vm5, %v3347_v33, %v1557_v38  ;;  %v1682_v46 = vsel %vm1426_vm4, %v1251_v28, %v1554_v31 }
 0x162   : > { %v3049_v47 = vpack.c.bf16 %v1685_v45, %v1684_v42  ;;  %v1619_v48 = vsel %vm1363_vm6, %v998_v36, %v1491_v40  ;;  %v1683_v49 = vsel %vm1427_vm7, %v1254_v37, %v1555_v41  ;;  %v3286_v50 = vpop.f32.mrb[52].mxu0  ;;  %v3350_v51 = vpop.f32.mrb[52].mxu1 }
 0x163   : > { %3105 = vst [vmem:[%s3632_s8 + $0xc8] sm:$0xff] %v2889_v44   ;;  %v2884_v52 = vpack.c.bf16 %v1619_v48, %v1618_v43  ;;  %v3044_v53 = vpack.c.bf16 %v1683_v49, %v1682_v46  ;;  %vm1368_vm8 = vcmp.gt.f32.partialorder %v3286_v50, 0.0  ;;  %v1496_v54 = vmul.f32 0.2, %v3286_v50  ;;  %v1011_v55 = vpop.f32.mrb[53].mxu0  ;;  %v1267_v56 = vpop.f32.mrb[53].mxu1 }
 0x164   : > { %3137 = vst [vmem:[%s3632_s8 + $0x1c8] sm:$0xff] %v3049_v47   ;;  %vm1432_vm9 = vcmp.gt.f32.partialorder %v3350_v51, 0.0  ;;  %v1560_v57 = vmul.f32 0.2, %v3350_v51  ;;  %v1494_v58 = vmul.f32 0.2, %v1011_v55 }
 0x165   : > { %3104 = vst [vmem:[%s3632_s8 + $0xc0] sm:$0xff] %v2884_v52   ;;  %3136 = vst [vmem:[%s3632_s8 + $0x1c0] sm:$0xff] %v3044_v53   ;;  %v1558_v59 = vmul.f32 0.2, %v1267_v56  ;;  %v3287_v60 = vpop.f32.mrb[54].mxu0  ;;  %v3351_v61 = vpop.f32.mrb[54].mxu1  ;;  %v1624_v62 = vsel %vm1368_vm8, %v3286_v50, %v1496_v54 }
 0x166   : > { %vm1366_vm10 = vcmp.gt.f32.partialorder %v1011_v55, 0.0  ;;  %vm1369_vm11 = vcmp.gt.f32.partialorder %v3287_v60, 0.0  ;;  %v1497_v63 = vmul.f32 0.2, %v3287_v60  ;;  %v1014_v0 = vpop.f32.mrb[55].mxu0  ;;  %v1270_v1 = vpop.f32.mrb[55].mxu1  ;;  %v1688_v6 = vsel %vm1432_vm9, %v3350_v51, %v1560_v57 }
 0x167   : > { %vm1430_vm12 = vcmp.gt.f32.partialorder %v1267_v56, 0.0  ;;  %vm1433_vm13 = vcmp.gt.f32.partialorder %v3351_v61, 0.0  ;;  %v1561_v2 = vmul.f32 0.2, %v3351_v61  ;;  %vm1367_vm14 = vcmp.gt.f32.partialorder %v1014_v0, 0.0 }
 0x168   : > { %v1625_v3 = vsel %vm1369_vm11, %v3287_v60, %v1497_v63  ;;  %v1495_v4 = vmul.f32 0.2, %v1014_v0  ;;  %vm1431_vm15 = vcmp.gt.f32.partialorder %v1270_v1, 0.0  ;;  %v1559_v5 = vmul.f32 0.2, %v1270_v1 }
 0x169   : > { %v1622_v7 = vsel %vm1366_vm10, %v1011_v55, %v1494_v58  ;;  %v2899_v8 = vpack.c.bf16 %v1625_v3, %v1624_v62  ;;  %v1689_v9 = vsel %vm1433_vm13, %v3351_v61, %v1561_v2  ;;  %v1686_v10 = vsel %vm1430_vm12, %v1267_v56, %v1558_v59 }
 0x16a   : > { %v3059_v11 = vpack.c.bf16 %v1689_v9, %v1688_v6  ;;  %v1623_v12 = vsel %vm1367_vm14, %v1014_v0, %v1495_v4  ;;  %v1687_v13 = vsel %vm1431_vm15, %v1270_v1, %v1559_v5  ;;  %v3290_v14 = vpop.f32.mrb[56].mxu0  ;;  %v3354_v15 = vpop.f32.mrb[56].mxu1 }
 0x16b   : > { %3107 = vst [vmem:[%s3632_s8 + $0xd8] sm:$0xff] %v2899_v8   ;;  %v2894_v16 = vpack.c.bf16 %v1623_v12, %v1622_v7  ;;  %v3054_v17 = vpack.c.bf16 %v1687_v13, %v1686_v10  ;;  %vm1372_vm0 = vcmp.gt.f32.partialorder %v3290_v14, 0.0  ;;  %v1500_v18 = vmul.f32 0.2, %v3290_v14  ;;  %v1027_v19 = vpop.f32.mrb[57].mxu0  ;;  %v1283_v20 = vpop.f32.mrb[57].mxu1 }
 0x16c   : > { %3139 = vst [vmem:[%s3632_s8 + $0x1d8] sm:$0xff] %v3059_v11   ;;  %vm1436_vm1 = vcmp.gt.f32.partialorder %v3354_v15, 0.0  ;;  %v1564_v21 = vmul.f32 0.2, %v3354_v15  ;;  %v1498_v22 = vmul.f32 0.2, %v1027_v19 }
 0x16d   : > { %3106 = vst [vmem:[%s3632_s8 + $0xd0] sm:$0xff] %v2894_v16   ;;  %3138 = vst [vmem:[%s3632_s8 + $0x1d0] sm:$0xff] %v3054_v17   ;;  %v1562_v23 = vmul.f32 0.2, %v1283_v20  ;;  %v3291_v24 = vpop.f32.mrb[58].mxu0  ;;  %v3355_v25 = vpop.f32.mrb[58].mxu1  ;;  %v1628_v26 = vsel %vm1372_vm0, %v3290_v14, %v1500_v18 }
 0x16e   : > { %vm1370_vm2 = vcmp.gt.f32.partialorder %v1027_v19, 0.0  ;;  %vm1373_vm3 = vcmp.gt.f32.partialorder %v3291_v24, 0.0  ;;  %v1501_v27 = vmul.f32 0.2, %v3291_v24  ;;  %v1030_v28 = vpop.f32.mrb[59].mxu0  ;;  %v1286_v29 = vpop.f32.mrb[59].mxu1  ;;  %v1692_v34 = vsel %vm1436_vm1, %v3354_v15, %v1564_v21 }
 0x16f   : > { %vm1434_vm4 = vcmp.gt.f32.partialorder %v1283_v20, 0.0  ;;  %vm1437_vm5 = vcmp.gt.f32.partialorder %v3355_v25, 0.0  ;;  %v1565_v30 = vmul.f32 0.2, %v3355_v25  ;;  %vm1371_vm6 = vcmp.gt.f32.partialorder %v1030_v28, 0.0 }
 0x170   : > { %v1629_v31 = vsel %vm1373_vm3, %v3291_v24, %v1501_v27  ;;  %v1499_v32 = vmul.f32 0.2, %v1030_v28  ;;  %vm1435_vm7 = vcmp.gt.f32.partialorder %v1286_v29, 0.0  ;;  %v1563_v33 = vmul.f32 0.2, %v1286_v29 }
 0x171   : > { %v1626_v35 = vsel %vm1370_vm2, %v1027_v19, %v1498_v22  ;;  %v2909_v36 = vpack.c.bf16 %v1629_v31, %v1628_v26  ;;  %v1693_v37 = vsel %vm1437_vm5, %v3355_v25, %v1565_v30  ;;  %v1690_v38 = vsel %vm1434_vm4, %v1283_v20, %v1562_v23 }
 0x172   : > { %v3069_v39 = vpack.c.bf16 %v1693_v37, %v1692_v34  ;;  %v1627_v40 = vsel %vm1371_vm6, %v1030_v28, %v1499_v32  ;;  %v1691_v41 = vsel %vm1435_vm7, %v1286_v29, %v1563_v33  ;;  %v3294_v42 = vpop.f32.mrb[60].mxu0  ;;  %v3358_v43 = vpop.f32.mrb[60].mxu1 }
 0x173   : > { %3109 = vst [vmem:[%s3632_s8 + $0xe8] sm:$0xff] %v2909_v36   ;;  %v2904_v44 = vpack.c.bf16 %v1627_v40, %v1626_v35  ;;  %v3064_v45 = vpack.c.bf16 %v1691_v41, %v1690_v38  ;;  %vm1376_vm8 = vcmp.gt.f32.partialorder %v3294_v42, 0.0  ;;  %v1504_v46 = vmul.f32 0.2, %v3294_v42  ;;  %v1043_v47 = vpop.f32.mrb[61].mxu0  ;;  %v1299_v48 = vpop.f32.mrb[61].mxu1 }
 0x174   : > { %3141 = vst [vmem:[%s3632_s8 + $0x1e8] sm:$0xff] %v3069_v39   ;;  %vm1440_vm9 = vcmp.gt.f32.partialorder %v3358_v43, 0.0  ;;  %v1568_v49 = vmul.f32 0.2, %v3358_v43  ;;  %v1502_v50 = vmul.f32 0.2, %v1043_v47 }
 0x175   : > { %3108 = vst [vmem:[%s3632_s8 + $0xe0] sm:$0xff] %v2904_v44   ;;  %3140 = vst [vmem:[%s3632_s8 + $0x1e0] sm:$0xff] %v3064_v45   ;;  %v1566_v51 = vmul.f32 0.2, %v1299_v48  ;;  %v3295_v52 = vpop.f32.mrb[62].mxu0  ;;  %v3359_v53 = vpop.f32.mrb[62].mxu1  ;;  %v1632_v54 = vsel %vm1376_vm8, %v3294_v42, %v1504_v46 }
 0x176   : > { %vm1374_vm10 = vcmp.gt.f32.partialorder %v1043_v47, 0.0  ;;  %vm1377_vm11 = vcmp.gt.f32.partialorder %v3295_v52, 0.0  ;;  %v1505_v55 = vmul.f32 0.2, %v3295_v52  ;;  %v1046_v56 = vpop.f32.mrb[63].mxu0  ;;  %v1302_v57 = vpop.f32.mrb[63].mxu1  ;;  %v1696_v62 = vsel %vm1440_vm9, %v3358_v43, %v1568_v49 }
 0x177   : > { %vm1438_vm12 = vcmp.gt.f32.partialorder %v1299_v48, 0.0  ;;  %vm1441_vm13 = vcmp.gt.f32.partialorder %v3359_v53, 0.0  ;;  %v1569_v58 = vmul.f32 0.2, %v3359_v53  ;;  %vm1375_vm14 = vcmp.gt.f32.partialorder %v1046_v56, 0.0 }
 0x178   : > { %v1633_v59 = vsel %vm1377_vm11, %v3295_v52, %v1505_v55  ;;  %v1503_v60 = vmul.f32 0.2, %v1046_v56  ;;  %vm1439_vm15 = vcmp.gt.f32.partialorder %v1302_v57, 0.0  ;;  %v1567_v61 = vmul.f32 0.2, %v1302_v57 }
 0x179   : > { %v1630_v63 = vsel %vm1374_vm10, %v1043_v47, %v1502_v50  ;;  %v2919_v0 = vpack.c.bf16 %v1633_v59, %v1632_v54  ;;  %v1697_v1 = vsel %vm1441_vm13, %v3359_v53, %v1569_v58  ;;  %v1694_v2 = vsel %vm1438_vm12, %v1299_v48, %v1566_v51 }
 0x17a   : > { %v3079_v3 = vpack.c.bf16 %v1697_v1, %v1696_v62  ;;  %v1631_v4 = vsel %vm1375_vm14, %v1046_v56, %v1503_v60  ;;  %v1695_v5 = vsel %vm1439_vm15, %v1302_v57, %v1567_v61 }
 0x17b   : > { %3111 = vst [vmem:[%s3632_s8 + $0xf8] sm:$0xff] %v2919_v0   ;;  %v2914_v6 = vpack.c.bf16 %v1631_v4, %v1630_v63  ;;  %v3074_v7 = vpack.c.bf16 %v1695_v5, %v1694_v2 }
 0x17c   : > { %3143 = vst [vmem:[%s3632_s8 + $0x1f8] sm:$0xff] %v3079_v3  }
 0x17d   : > { %3110 = vst [vmem:[%s3632_s8 + $0xf0] sm:$0xff] %v2914_v6   ;;  %3142 = vst [vmem:[%s3632_s8 + $0x1f0] sm:$0xff] %v3074_v7  }
 0x17e PF: > { %s12_s11 = sadd.s32 1, %s3494_s11   ;;  %s3725_s9 = smov %s3490_s10 }
 0x17f   : > { %p9_p5 = scmp.ge.s32.totalorder %s12_s11, 4   ;;  %s3726_s10 = smov %s3728_s12 }
 0x181   :  { %11 = sbr.rel (!%p9_p5) target bundleno = 2 (0x2), region = 61 }

// kernel: discriminator_forward.6
= control target key start
LH: loop header
LB: loop body
LE: loop exit
PB: predicated region body
PF: predicated region fallthrough
CT: control target
= control target key end

     0   :  { %s1719_s12 = smov 0   ;;  %s1721_s13 = smov 0   ;;  %s2000_s0 = inlined_call_operand.vmem [shape: bf16[512,256], index: 0, kind: input, shape index: {}]   ;;  %s2001_s1 = inlined_call_operand.vmem [shape: bf16[256,128], index: 1, kind: input, shape index: {}]   ;;  %s2002_s2 = inlined_call_operand.vmem [shape: bf16[512,128], index: 2, kind: output, shape index: {0}]   ;;  %s2003_s3 = inlined_call_operand.vmem [shape: f32[2,2,128], index: 3, kind: output, shape index: {1}]  }
   0x1   :  { %s1723_s14 = smov 0  }
   0x2 LB: > { %s26_s15 = sadd.s32 1, %s1693_s13  ;;  %p1241_p0 = scmp.ge.s32.totalorder %s1697_s14, 1  ;;  %s1697_s14 = sphi %s1723_s14, %s14_s14   ;;  %s1693_s13 = sphi %s1721_s13, %s2005_s13   ;;  %s1689_s12 = sphi %s1719_s12, %s2004_s12  }
   0x3   : > { %p28_p1 = scmp.ge.s32.totalorder %s26_s15, 2  ;;  %p172_p2 = scmp.lt.s32.totalorder %s1697_s14, 3 }
   0x5   : > { %s2007_s15 = smov (%p28_p1, %s26_s15), 0  ;;  %p173_p3 = pnand %p1241_p0, %p172_p2 }
   0x6   : > { %v1611_v0 = vld [vmem:[%s2001_s1 + $0x40] sm:$0xff] (!%p173_p3)   ;;  %s1242_s18 = sshll.u32 (!%p173_p3), %s1689_s12, 5  ;;  %v1613_v2 = vld [vmem:[%s2001_s1 + $0x48] sm:$0xff] (!%p173_p3)   ;;  %v1615_v4 = vld [vmem:[%s2001_s1 + $0x50] sm:$0xff] (!%p173_p3)   ;;  %v721_v48 = vlaneseq (!%p173_p3)  ;;  %s1248_s4 = sshll.u32 (!%p173_p3), %s1689_s12, 8 }
   0x7   : > { %176 = sbr.rel (%p173_p3) target bundleno = 362 (0x16a), region = 28  ;;  %v1612_v1 = vld [vmem:[%s2001_s1] sm:$0xff] (!%p173_p3)   ;;  %1459 = vmatprep.subr.bf16.mxu0 (!%p173_p3), %v1611_v0  ;;  %1571 = vmatprep.subr.bf16.mxu1 (!%p173_p3), %v1611_v0  ;;  %v1614_v3 = vld [vmem:[%s2001_s1 + $0x8] sm:$0xff] (!%p173_p3)   ;;  %p212_p4 = scmp.lt.s32.totalorder (!%p173_p3), %s1242_s18, 63  ;;  %v1616_v5 = vld [vmem:[%s2001_s1 + $0x10] sm:$0xff] (!%p173_p3)   ;;  %v1831_v50 = vstv (!%p173_p3), %s1248_s4 }
   0x8   : > { %1460 = vmatpush3.bf16.msra.mxu0 (!%p173_p3), %v1612_v1  ;;  %1579 = vmatpush3.bf16.msra.mxu1 (!%p173_p3), %v1612_v1  ;;  %v1617_v6 = vld [vmem:[%s2001_s1 + $0x58] sm:$0xff] (!%p173_p3)   ;;  %v1619_v8 = vld [vmem:[%s2001_s1 + $0x60] sm:$0xff] (!%p173_p3)   ;;  %v1621_v10 = vld [vmem:[%s2001_s1 + $0x68] sm:$0xff] (!%p173_p3)   ;;  %v1829_v49 = vshrl.u32 (!%p173_p3), %v721_v48, 7  ;;  %p234_p5 = scmp.lt.s32.totalorder (!%p173_p3), %s1689_s12, 1 }
   0x9   : > { %1461 = vmatprep.subr.bf16.mxu0 (!%p173_p3), %v1613_v2  ;;  %1572 = vmatprep.subr.bf16.mxu1 (!%p173_p3), %v1613_v2  ;;  %v1618_v7 = vld [vmem:[%s2001_s1 + $0x18] sm:$0xff] (!%p173_p3)   ;;  %v1620_v9 = vld [vmem:[%s2001_s1 + $0x20] sm:$0xff] (!%p173_p3)   ;;  %v1622_v12 = vld [vmem:[%s2001_s1 + $0x28] sm:$0xff] (!%p173_p3)  }
   0xa   : > { %v1623_v13 = vld [vmem:[%s2001_s1 + $0x70] sm:$0xff] (!%p173_p3)   ;;  %v1625_v16 = vld [vmem:[%s2001_s1 + $0x78] sm:$0xff] (!%p173_p3)   ;;  %v723_v51 = vadd.s32 (!%p173_p3), 8, %v1829_v49  ;;  %v755_v52 = vadd.s32 (!%p173_p3), %v1831_v50, %v1829_v49  ;;  %v724_v56 = vadd.s32 (!%p173_p3), 16, %v1829_v49  ;;  %v725_v60 = vadd.s32 (!%p173_p3), 24, %v1829_v49 }
   0xb   : > { %v1624_v15 = vld [vmem:[%s2001_s1 + $0x30] sm:$0xff] (!%p173_p3)   ;;  %v1626_v17 = vld [vmem:[%s2001_s1 + $0x38] sm:$0xff] (!%p173_p3)   ;;  %v729_v48 = vadd.s32 (!%p173_p3), 56, %v1829_v49 }
   0xc   : > { %1462 = vmatpush3.bf16.msra.mxu0 (!%p173_p3), %v1614_v3  ;;  %1580 = vmatpush3.bf16.msra.mxu1 (!%p173_p3), %v1614_v3  ;;  %v756_v53 = vadd.s32 (!%p173_p3), %v1831_v50, %v723_v51  ;;  %vm787_vm0 = vcmp.lt.s32.totalorder (!%p173_p3), %v755_v52, 512 }
   0xd   : > { %1463 = vmatprep.subr.bf16.mxu0 (!%p173_p3), %v1615_v4  ;;  %1573 = vmatprep.subr.bf16.mxu1 (!%p173_p3), %v1615_v4  ;;  %v757_v4 = vadd.s32 (!%p173_p3), %v1831_v50, %v724_v56 }
   0xe   : > { %s2009_s18 = smov (!%p212_p4, %s1242_s18), 63  ;;  %vm788_vm1 = vcmp.lt.s32.totalorder %v756_v53, 512  ;;  %s2011_s12 = smov (!%p234_p5, %s1689_s12), 1 }
   0xf   : > { %s1331_s6 = sshll.u32 %s2009_s18, 3  ;;  %s1246_s5 = sshll.u32 %s2009_s18, 2  ;;  %vm789_vm2 = vcmp.lt.s32.totalorder %v757_v4, 512 }
  0x10   : > { %1464 = vmatpush3.bf16.msra.mxu0 %v1616_v5  ;;  %1581 = vmatpush3.bf16.msra.mxu1 %v1616_v5  ;;  %s1773_s11 = scalar_lea.vmem %s2000_s0, %s1331_s6  ;;  %s1845_s8 = scalar_lea.vmem %s2002_s2, %s1246_s5 }
  0x11   : > { %1465 = vmatprep.subr.bf16.mxu0 %v1617_v6  ;;  %1574 = vmatprep.subr.bf16.mxu1 %v1617_v6  ;;  %v1629_v11 = vld [vmem:[%s1773_s11 + $0x4] ss:$8 sps:$4 sm:$0xff]   ;;  %v1627_v18 = vld [vmem:[%s1773_s11] ss:$8 sps:$4 sm:$0xff]   ;;  %v1630_v19 = vld [vmem:[%s1773_s11 + $0x14] ss:$8 sps:$4 sm:$0xff]  }
  0x12   : > { %592 = vmatprep.mubr.bf16.mxu0 %v1629_v11  ;;  %v1641_v14 = vld [vmem:[%s1773_s11 + $0x84] ss:$8 sps:$4 sm:$0xff]   ;;  %v1639_v20 = vld [vmem:[%s1773_s11 + $0x80] ss:$8 sps:$4 sm:$0xff]   ;;  %v1645_v21 = vld [vmem:[%s1773_s11 + $0x94] ss:$8 sps:$4 sm:$0xff]  }
  0x13   : > { %656 = vmatprep.mubr.bf16.mxu1 %v1641_v14  ;;  %v1632_v22 = vld [vmem:[%s1773_s11 + $0x10] ss:$8 sps:$4 sm:$0xff]   ;;  %v1633_v23 = vld [vmem:[%s1773_s11 + $0x24] ss:$8 sps:$4 sm:$0xff]   ;;  %v1635_v26 = vld [vmem:[%s1773_s11 + $0x20] ss:$8 sps:$4 sm:$0xff]  }
  0x14   : > { %1466 = vmatpush3.bf16.msra.mxu0 %v1618_v7  ;;  %1582 = vmatpush3.bf16.msra.mxu1 %v1618_v7  ;;  %v1647_v24 = vld [vmem:[%s1773_s11 + $0x90] ss:$8 sps:$4 sm:$0xff]   ;;  %v1651_v25 = vld [vmem:[%s1773_s11 + $0xa4] ss:$8 sps:$4 sm:$0xff]   ;;  %v1636_v27 = vld [vmem:[%s1773_s11 + $0x34] ss:$8 sps:$4 sm:$0xff]  }
  0x15   : > { %1467 = vmatprep.subr.bf16.mxu0 %v1619_v8  ;;  %1575 = vmatprep.subr.bf16.mxu1 %v1619_v8  ;;  %v1653_v28 = vld [vmem:[%s1773_s11 + $0xa0] ss:$8 sps:$4 sm:$0xff]   ;;  %v1657_v29 = vld [vmem:[%s1773_s11 + $0xb4] ss:$8 sps:$4 sm:$0xff]   ;;  %v1638_v30 = vld [vmem:[%s1773_s11 + $0x30] ss:$8 sps:$4 sm:$0xff]   ;;  %v758_v8 = vadd.s32 %v1831_v50, %v725_v60 }
  0x16   : > { %v1642_v31 = vld [vmem:[%s1773_s11 + $0x44] ss:$8 sps:$4 sm:$0xff]   ;;  %v1659_v32 = vld [vmem:[%s1773_s11 + $0xb0] ss:$8 sps:$4 sm:$0xff]   ;;  %v1644_v34 = vld [vmem:[%s1773_s11 + $0x40] ss:$8 sps:$4 sm:$0xff]  }
  0x17   : > { %v1663_v33 = vld [vmem:[%s1773_s11 + $0xc4] ss:$8 sps:$4 sm:$0xff]   ;;  %v1648_v35 = vld [vmem:[%s1773_s11 + $0x54] ss:$8 sps:$4 sm:$0xff]   ;;  %v1665_v36 = vld [vmem:[%s1773_s11 + $0xc0] ss:$8 sps:$4 sm:$0xff]  }
  0x18   : > { %1468 = vmatpush3.bf16.msra.mxu0 %v1620_v9  ;;  %1583 = vmatpush3.bf16.msra.mxu1 %v1620_v9  ;;  %v1666_v37 = vld [vmem:[%s1773_s11 + $0xd4] ss:$8 sps:$4 sm:$0xff]   ;;  %v1650_v38 = vld [vmem:[%s1773_s11 + $0x50] ss:$8 sps:$4 sm:$0xff]   ;;  %v1654_v39 = vld [vmem:[%s1773_s11 + $0x64] ss:$8 sps:$4 sm:$0xff]  }
  0x19   : > { %1469 = vmatprep.subr.bf16.mxu0 %v1621_v10  ;;  %1576 = vmatprep.subr.bf16.mxu1 %v1621_v10  ;;  %v1668_v40 = vld [vmem:[%s1773_s11 + $0xd0] ss:$8 sps:$4 sm:$0xff]   ;;  %v1669_v41 = vld [vmem:[%s1773_s11 + $0xe4] ss:$8 sps:$4 sm:$0xff]   ;;  %v1656_v42 = vld [vmem:[%s1773_s11 + $0x60] ss:$8 sps:$4 sm:$0xff]  }
  0x1a   : > { %v1660_v43 = vld [vmem:[%s1773_s11 + $0x74] ss:$8 sps:$4 sm:$0xff]   ;;  %v1671_v44 = vld [vmem:[%s1773_s11 + $0xe0] ss:$8 sps:$4 sm:$0xff]   ;;  %v1662_v46 = vld [vmem:[%s1773_s11 + $0x70] ss:$8 sps:$4 sm:$0xff]  }
  0x1b   : > { %v1672_v45 = vld [vmem:[%s1773_s11 + $0xf4] ss:$8 sps:$4 sm:$0xff]   ;;  %v1674_v47 = vld [vmem:[%s1773_s11 + $0xf0] ss:$8 sps:$4 sm:$0xff]   ;;  %vm790_vm3 = vcmp.lt.s32.totalorder %v758_v8, 512  ;;  %v730_v8 = vadd.s32 64, %v1829_v49 }
  0x1c   : > { %1470 = vmatpush3.bf16.msra.mxu0 %v1622_v12  ;;  %1584 = vmatpush3.bf16.msra.mxu1 %v1622_v12  ;;  %s1247_s18 = sshll.u32 %s2011_s12, 1 }
  0x1d   : > { %1471 = vmatprep.subr.bf16.mxu0 %v1623_v13  ;;  %1577 = vmatprep.subr.bf16.mxu1 %v1623_v13  ;;  %s237_s11 = scalar_lea.vmem %s2003_s3, %s1247_s18 }
  0x20   : > { %1472 = vmatpush3.bf16.msra.mxu0 %v1624_v15  ;;  %1585 = vmatpush3.bf16.msra.mxu1 %v1624_v15 }
  0x21   : > { %1473 = vmatprep.subr.bf16.mxu0 %v1625_v16  ;;  %1578 = vmatprep.subr.bf16.mxu1 %v1625_v16  ;;  %v726_v16 = vadd.s32 32, %v1829_v49 }
  0x24   : > { %1474 = vmatpush3.bf16.msra.mxu0 %v1626_v17  ;;  %1586 = vmatpush3.bf16.msra.mxu1 %v1626_v17 }
  0x27   : > { %593 = vmatmul.mubr.bf16.vlgmr.msra.gmra.mrb[0].mxu0 %v1627_v18  ;;  %657 = vmatmul.mubr.bf16.vlgmr.msra.gmra.mrb[0].mxu1 %v1639_v20 }
  0x28   : > { %600 = vmatprep.mubr.bf16.mxu0 %v1630_v19  ;;  %664 = vmatprep.mubr.bf16.mxu1 %v1645_v21 }
  0x2f   : > { %601 = vmatmul.mubr.bf16.gmra.mrb[4].mxu0 %v1632_v22  ;;  %665 = vmatmul.mubr.bf16.gmra.mrb[4].mxu1 %v1647_v24  ;;  %v727_v22 = vadd.s32 40, %v1829_v49 }
  0x30   : > { %608 = vmatprep.mubr.bf16.mxu0 %v1633_v23  ;;  %672 = vmatprep.mubr.bf16.mxu1 %v1651_v25 }
  0x37   : > { %609 = vmatmul.mubr.bf16.gmra.mrb[8].mxu0 %v1635_v26  ;;  %673 = vmatmul.mubr.bf16.gmra.mrb[8].mxu1 %v1653_v28 }
  0x38   : > { %616 = vmatprep.mubr.bf16.mxu0 %v1636_v27  ;;  %680 = vmatprep.mubr.bf16.mxu1 %v1657_v29 }
  0x3f   : > { %617 = vmatmul.mubr.bf16.gmra.mrb[12].mxu0 %v1638_v30  ;;  %681 = vmatmul.mubr.bf16.gmra.mrb[12].mxu1 %v1659_v32  ;;  %v759_v30 = vadd.s32 %v1831_v50, %v726_v16 }
  0x40   : > { %624 = vmatprep.mubr.bf16.mxu0 %v1642_v31  ;;  %688 = vmatprep.mubr.bf16.mxu1 %v1663_v33 }
  0x41   : > { %vm791_vm4 = vcmp.lt.s32.totalorder %v759_v30, 512 }
  0x47   : > { %625 = vmatmul.mubr.bf16.gmra.mrb[16].mxu0 %v1644_v34  ;;  %689 = vmatmul.mubr.bf16.gmra.mrb[16].mxu1 %v1665_v36 }
  0x48   : > { %632 = vmatprep.mubr.bf16.mxu0 %v1648_v35  ;;  %696 = vmatprep.mubr.bf16.mxu1 %v1666_v37  ;;  %v760_v37 = vadd.s32 %v1831_v50, %v727_v22  ;;  %v763_v22 = vadd.s32 %v1831_v50, %v730_v8 }
  0x4a   : > { %vm792_vm5 = vcmp.lt.s32.totalorder %v760_v37, 512  ;;  %vm795_vm8 = vcmp.lt.s32.totalorder %v763_v22, 512 }
  0x4f   : > { %633 = vmatmul.mubr.bf16.gmra.mrb[20].mxu0 %v1650_v38  ;;  %697 = vmatmul.mubr.bf16.gmra.mrb[20].mxu1 %v1668_v40 }
  0x50   : > { %640 = vmatprep.mubr.bf16.mxu0 %v1654_v39  ;;  %704 = vmatprep.mubr.bf16.mxu1 %v1669_v41 }
  0x57   : > { %641 = vmatmul.mubr.bf16.gmra.mrb[24].mxu0 %v1656_v42  ;;  %705 = vmatmul.mubr.bf16.gmra.mrb[24].mxu1 %v1671_v44  ;;  %v728_v42 = vadd.s32 48, %v1829_v49 }
  0x58   : > { %648 = vmatprep.mubr.bf16.mxu0 %v1660_v43  ;;  %712 = vmatprep.mubr.bf16.mxu1 %v1672_v45 }
  0x5f   : > { %649 = vmatmul.mubr.bf16.gmra.mrb[28].mxu0 %v1662_v46  ;;  %713 = vmatmul.mubr.bf16.gmra.mrb[28].mxu1 %v1674_v47 }
  0xfa   : > { %v1475_v54 = vpop.f32.mrb[0].mxu0  ;;  %v1523_v57 = vpop.f32.mrb[0].mxu1 }
  0xfb   : > { %v1476_v55 = vpop.f32.mrb[1].mxu0  ;;  %v1524_v61 = vpop.f32.mrb[1].mxu1 }
  0xfc   : > { %v1477_v58 = vadd.f32 %v1476_v55, %v1475_v54  ;;  %v1478_v59 = vpop.f32.mrb[2].mxu0  ;;  %v1840_v63 = vadd.f32 %v1524_v61, %v1523_v57  ;;  %v1526_v0 = vpop.f32.mrb[2].mxu1 }
  0xfd   : > { %v1479_v62 = vpop.f32.mrb[3].mxu0  ;;  %v1527_v3 = vpop.f32.mrb[3].mxu1 }
  0xfe   : > { %v819_v1 = vsel %vm787_vm0, %v1477_v58, 0.0  ;;  %v1480_v2 = vadd.f32 %v1479_v62, %v1478_v59  ;;  %v1848_v5 = vadd.f32 %v1527_v3, %v1526_v0 }
  0xff   : > { %v889_v9 = vmul.f32 %v819_v1, %v819_v1 }
 0x100   : > { %v820_v6 = vsel %vm788_vm1, %v1480_v2, 0.0  ;;  %v1367_v7 = vpack.c.bf16 %v1480_v2, %v1477_v58  ;;  %v1407_v12 = vpack.c.bf16 %v1848_v5, %v1840_v63  ;;  %v761_v58 = vadd.s32 %v1831_v50, %v728_v42 }
 0x101   : > { %v851_v10 = vadd.f32 %v820_v6, %v819_v1  ;;  %v890_v11 = vmul.f32 %v820_v6, %v820_v6  ;;  %v762_v2 = vadd.s32 %v1831_v50, %v729_v48  ;;  %v733_v42 = vadd.s32 88, %v1829_v49 }
 0x102   : > { %1368 = vst [vmem:[%s1845_s8] sm:$0xff] %v1367_v7   ;;  %v1481_v13 = vpop.f32.mrb[4].mxu0  ;;  %1451 = vst [vmem:[%s1845_s8 + $0x40] sm:$0xff] %v1407_v12   ;;  %v1529_v17 = vpop.f32.mrb[4].mxu1  ;;  %vm793_vm6 = vcmp.lt.s32.totalorder %v761_v58, 512 }
 0x103   : > { %v921_v14 = vadd.f32 %v890_v11, %v889_v9  ;;  %v1482_v15 = vpop.f32.mrb[5].mxu0  ;;  %v1530_v20 = vpop.f32.mrb[5].mxu1  ;;  %vm794_vm7 = vcmp.lt.s32.totalorder %v762_v2, 512 }
 0x104   : > { %v1483_v18 = vadd.f32 %v1482_v15, %v1481_v13  ;;  %v1484_v19 = vpop.f32.mrb[6].mxu0  ;;  %v1857_v23 = vadd.f32 %v1530_v20, %v1529_v17  ;;  %v1532_v24 = vpop.f32.mrb[6].mxu1 }
 0x105   : > { %v1485_v21 = vpop.f32.mrb[7].mxu0  ;;  %v1533_v27 = vpop.f32.mrb[7].mxu1 }
 0x106   : > { %v821_v25 = vsel %vm789_vm2, %v1483_v18, 0.0  ;;  %v1486_v26 = vadd.f32 %v1485_v21, %v1484_v19  ;;  %v1860_v31 = vadd.f32 %v1533_v27, %v1532_v24 }
 0x107   : > { %v852_v28 = vadd.f32 %v851_v10, %v821_v25  ;;  %v891_v29 = vmul.f32 %v821_v25, %v821_v25 }
 0x108   : > { %v822_v32 = vsel %vm790_vm3, %v1486_v26, 0.0  ;;  %v1372_v33 = vpack.c.bf16 %v1486_v26, %v1483_v18  ;;  %v1412_v39 = vpack.c.bf16 %v1860_v31, %v1857_v23 }
 0x109   : > { %v922_v34 = vadd.f32 %v921_v14, %v891_v29  ;;  %v853_v35 = vadd.f32 %v852_v28, %v822_v32  ;;  %v892_v36 = vmul.f32 %v822_v32, %v822_v32  ;;  %v731_v14 = vadd.s32 72, %v1829_v49 }
 0x10a   : > { %1444 = vst [vmem:[%s1845_s8 + $0x8] sm:$0xff] %v1372_v33   ;;  %v1487_v38 = vpop.f32.mrb[8].mxu0  ;;  %v1535_v43 = vpop.f32.mrb[8].mxu1  ;;  %1452 = vst [vmem:[%s1845_s8 + $0x48] sm:$0xff] %v1412_v39  }
 0x10b   : > { %v923_v40 = vadd.f32 %v922_v34, %v892_v36  ;;  %v1488_v41 = vpop.f32.mrb[9].mxu0  ;;  %v1536_v46 = vpop.f32.mrb[9].mxu1  ;;  %v764_v30 = vadd.s32 %v1831_v50, %v731_v14  ;;  %v732_v36 = vadd.s32 80, %v1829_v49 }
 0x10c   : > { %v1489_v44 = vadd.f32 %v1488_v41, %v1487_v38  ;;  %v1490_v45 = vpop.f32.mrb[10].mxu0  ;;  %v1869_v51 = vadd.f32 %v1536_v46, %v1535_v43  ;;  %v1538_v52 = vpop.f32.mrb[10].mxu1 }
 0x10d   : > { %v1491_v47 = vpop.f32.mrb[11].mxu0  ;;  %v1539_v55 = vpop.f32.mrb[11].mxu1  ;;  %vm796_vm9 = vcmp.lt.s32.totalorder %v764_v30, 512 }
 0x10e   : > { %v823_v53 = vsel %vm791_vm4, %v1489_v44, 0.0  ;;  %v1492_v54 = vadd.f32 %v1491_v47, %v1490_v45  ;;  %v1872_v59 = vadd.f32 %v1539_v55, %v1538_v52 }
 0x10f   : > { %v854_v56 = vadd.f32 %v853_v35, %v823_v53  ;;  %v893_v57 = vmul.f32 %v823_v53, %v823_v53  ;;  %v765_v53 = vadd.s32 %v1831_v50, %v732_v36  ;;  %v738_v36 = vadd.s32 128, %v1829_v49 }
 0x110   : > { %v824_v60 = vsel %vm792_vm5, %v1492_v54, 0.0  ;;  %v1377_v61 = vpack.c.bf16 %v1492_v54, %v1489_v44  ;;  %v1417_v4 = vpack.c.bf16 %v1872_v59, %v1869_v51 }
 0x111   : > { %v924_v62 = vadd.f32 %v923_v40, %v893_v57  ;;  %v855_v0 = vadd.f32 %v854_v56, %v824_v60  ;;  %v894_v1 = vmul.f32 %v824_v60, %v824_v60  ;;  %vm797_vm10 = vcmp.lt.s32.totalorder %v765_v53, 512 }
 0x112   : > { %1445 = vst [vmem:[%s1845_s8 + $0x10] sm:$0xff] %v1377_v61   ;;  %v1493_v3 = vpop.f32.mrb[12].mxu0  ;;  %v1541_v9 = vpop.f32.mrb[12].mxu1  ;;  %1453 = vst [vmem:[%s1845_s8 + $0x50] sm:$0xff] %v1417_v4   ;;  %v766_v61 = vadd.s32 %v1831_v50, %v733_v42  ;;  %v737_v42 = vadd.s32 120, %v1829_v49 }
 0x113   : > { %v925_v6 = vadd.f32 %v924_v62, %v894_v1  ;;  %v1494_v7 = vpop.f32.mrb[13].mxu0  ;;  %v1542_v12 = vpop.f32.mrb[13].mxu1 }
 0x114   : > { %v1495_v10 = vadd.f32 %v1494_v7, %v1493_v3  ;;  %v1496_v11 = vpop.f32.mrb[14].mxu0  ;;  %v1881_v15 = vadd.f32 %v1542_v12, %v1541_v9  ;;  %v1544_v16 = vpop.f32.mrb[14].mxu1  ;;  %v734_v3 = vadd.s32 96, %v1829_v49  ;;  %vm798_vm11 = vcmp.lt.s32.totalorder %v766_v61, 512 }
 0x115   : > { %v1497_v13 = vpop.f32.mrb[15].mxu0  ;;  %v1545_v19 = vpop.f32.mrb[15].mxu1 }
 0x116   : > { %v825_v17 = vsel %vm793_vm6, %v1495_v10, 0.0  ;;  %v1498_v18 = vadd.f32 %v1497_v13, %v1496_v11  ;;  %v1884_v24 = vadd.f32 %v1545_v19, %v1544_v16  ;;  %v767_v19 = vadd.s32 %v1831_v50, %v734_v3 }
 0x117   : > { %v856_v20 = vadd.f32 %v855_v0, %v825_v17  ;;  %v895_v21 = vmul.f32 %v825_v17, %v825_v17  ;;  %v770_v3 = vadd.s32 %v1831_v50, %v737_v42 }
 0x118   : > { %v826_v25 = vsel %vm794_vm7, %v1498_v18, 0.0  ;;  %v1382_v26 = vpack.c.bf16 %v1498_v18, %v1495_v10  ;;  %v1422_v33 = vpack.c.bf16 %v1884_v24, %v1881_v15  ;;  %v735_v10 = vadd.s32 104, %v1829_v49 }
 0x119   : > { %v926_v27 = vadd.f32 %v925_v6, %v895_v21  ;;  %v857_v28 = vadd.f32 %v856_v20, %v826_v25  ;;  %v896_v29 = vmul.f32 %v826_v25, %v826_v25  ;;  %vm799_vm12 = vcmp.lt.s32.totalorder %v767_v19, 512 }
 0x11a   : > { %1446 = vst [vmem:[%s1845_s8 + $0x18] sm:$0xff] %v1382_v26   ;;  %v1499_v32 = vpop.f32.mrb[16].mxu0  ;;  %v1547_v37 = vpop.f32.mrb[16].mxu1  ;;  %1454 = vst [vmem:[%s1845_s8 + $0x58] sm:$0xff] %v1422_v33   ;;  %vm802_vm1 = vcmp.lt.s32.totalorder %v770_v3, 512 }
 0x11b   : > { %v927_v34 = vadd.f32 %v926_v27, %v896_v29  ;;  %v1500_v35 = vpop.f32.mrb[17].mxu0  ;;  %v1548_v40 = vpop.f32.mrb[17].mxu1 }
 0x11c   : > { %v1501_v38 = vadd.f32 %v1500_v35, %v1499_v32  ;;  %v1502_v39 = vpop.f32.mrb[18].mxu0  ;;  %v1893_v43 = vadd.f32 %v1548_v40, %v1547_v37  ;;  %v1550_v44 = vpop.f32.mrb[18].mxu1  ;;  %v739_v37 = vadd.s32 136, %v1829_v49 }
 0x11d   : > { %v1503_v41 = vpop.f32.mrb[19].mxu0  ;;  %v1551_v47 = vpop.f32.mrb[19].mxu1 }
 0x11e   : > { %v827_v45 = vsel %vm795_vm8, %v1501_v38, 0.0  ;;  %v1504_v46 = vadd.f32 %v1503_v41, %v1502_v39  ;;  %v1896_v54 = vadd.f32 %v1551_v47, %v1550_v44 }
 0x11f   : > { %v858_v48 = vadd.f32 %v857_v28, %v827_v45  ;;  %v897_v52 = vmul.f32 %v827_v45, %v827_v45  ;;  %v768_v28 = vadd.s32 %v1831_v50, %v735_v10 }
 0x120   : > { %v828_v55 = vsel %vm796_vm9, %v1504_v46, 0.0  ;;  %v1387_v56 = vpack.c.bf16 %v1504_v46, %v1501_v38  ;;  %v1427_v0 = vpack.c.bf16 %v1896_v54, %v1893_v43  ;;  %v740_v46 = vadd.s32 144, %v1829_v49 }
 0x121   : > { %v928_v57 = vadd.f32 %v927_v34, %v897_v52  ;;  %v859_v58 = vadd.f32 %v858_v48, %v828_v55  ;;  %v898_v60 = vmul.f32 %v828_v55, %v828_v55  ;;  %v736_v34 = vadd.s32 112, %v1829_v49 }
 0x122   : > { %1447 = vst [vmem:[%s1845_s8 + $0x20] sm:$0xff] %v1387_v56   ;;  %v1505_v62 = vpop.f32.mrb[20].mxu0  ;;  %v1553_v4 = vpop.f32.mrb[20].mxu1  ;;  %1455 = vst [vmem:[%s1845_s8 + $0x60] sm:$0xff] %v1427_v0   ;;  %vm800_vm13 = vcmp.lt.s32.totalorder %v768_v28, 512 }
 0x123   : > { %v929_v1 = vadd.f32 %v928_v57, %v898_v60  ;;  %v1506_v2 = vpop.f32.mrb[21].mxu0  ;;  %v1554_v8 = vpop.f32.mrb[21].mxu1  ;;  %v769_v56 = vadd.s32 %v1831_v50, %v736_v34  ;;  %v772_v60 = vadd.s32 %v1831_v50, %v739_v37  ;;  %v744_v37 = vadd.s32 176, %v1829_v49 }
 0x124   : > { %v1507_v6 = vadd.f32 %v1506_v2, %v1505_v62  ;;  %v1508_v7 = vpop.f32.mrb[22].mxu0  ;;  %v1905_v11 = vadd.f32 %v1554_v8, %v1553_v4  ;;  %v1556_v12 = vpop.f32.mrb[22].mxu1  ;;  %v741_v4 = vadd.s32 152, %v1829_v49  ;;  %v773_v8 = vadd.s32 %v1831_v50, %v740_v46 }
 0x125   : > { %v1509_v9 = vpop.f32.mrb[23].mxu0  ;;  %v1557_v16 = vpop.f32.mrb[23].mxu1  ;;  %vm801_vm14 = vcmp.lt.s32.totalorder %v769_v56, 512  ;;  %vm804_vm0 = vcmp.lt.s32.totalorder %v772_v60, 512  ;;  %v745_v46 = vadd.s32 184, %v1829_v49 }
 0x126   : > { %v829_v13 = vsel %vm797_vm10, %v1507_v6, 0.0  ;;  %v1510_v14 = vadd.f32 %v1509_v9, %v1508_v7  ;;  %v1908_v20 = vadd.f32 %v1557_v16, %v1556_v12  ;;  %vm805_vm2 = vcmp.lt.s32.totalorder %v773_v8, 512 }
 0x127   : > { %v860_v17 = vadd.f32 %v859_v58, %v829_v13  ;;  %v899_v18 = vmul.f32 %v829_v13, %v829_v13  ;;  %v771_v58 = vadd.s32 %v1831_v50, %v738_v36  ;;  %v742_v13 = vadd.s32 160, %v1829_v49 }
 0x128   : > { %v830_v21 = vsel %vm798_vm11, %v1510_v14, 0.0  ;;  %v1392_v22 = vpack.c.bf16 %v1510_v14, %v1507_v6  ;;  %v1432_v30 = vpack.c.bf16 %v1908_v20, %v1905_v11 }
 0x129   : > { %v930_v25 = vadd.f32 %v929_v1, %v899_v18  ;;  %v861_v26 = vadd.f32 %v860_v17, %v830_v21  ;;  %v900_v27 = vmul.f32 %v830_v21, %v830_v21  ;;  %vm803_vm15 = vcmp.lt.s32.totalorder %v771_v58, 512 }
 0x12a   : > { %1448 = vst [vmem:[%s1845_s8 + $0x28] sm:$0xff] %v1392_v22   ;;  %v1511_v29 = vpop.f32.mrb[24].mxu0  ;;  %v1559_v35 = vpop.f32.mrb[24].mxu1  ;;  %1456 = vst [vmem:[%s1845_s8 + $0x68] sm:$0xff] %v1432_v30   ;;  %v774_v22 = vadd.s32 %v1831_v50, %v741_v4  ;;  %v775_v34 = vadd.s32 %v1831_v50, %v742_v13  ;;  %v748_v4 = vadd.s32 208, %v1829_v49 }
 0x12b   : > { %v931_v32 = vadd.f32 %v930_v25, %v900_v27  ;;  %v1512_v33 = vpop.f32.mrb[25].mxu0  ;;  %v1560_v40 = vpop.f32.mrb[25].mxu1  ;;  %v743_v25 = vadd.s32 168, %v1829_v49 }
 0x12c   : > { %v1513_v38 = vadd.f32 %v1512_v33, %v1511_v29  ;;  %v1514_v39 = vpop.f32.mrb[26].mxu0  ;;  %v1919_v44 = vadd.f32 %v1560_v40, %v1559_v35  ;;  %v1562_v45 = vpop.f32.mrb[26].mxu1  ;;  %v835_v33 = vsel %vm803_vm15, %v1840_v63, 0.0  ;;  %vm806_vm3 = vcmp.lt.s32.totalorder %v774_v22, 512 }
 0x12d   : > { %v1515_v41 = vpop.f32.mrb[27].mxu0  ;;  %v1563_v52 = vpop.f32.mrb[27].mxu1  ;;  %v776_v42 = vadd.s32 %v1831_v50, %v743_v25  ;;  %vm807_vm4 = vcmp.lt.s32.totalorder %v775_v34, 512  ;;  %v838_v60 = vsel %vm806_vm3, %v1860_v31, 0.0  ;;  %v750_v22 = vadd.s32 224, %v1829_v49 }
 0x12e   : > { %v831_v47 = vsel %vm799_vm12, %v1513_v38, 0.0  ;;  %v1516_v48 = vadd.f32 %v1515_v41, %v1514_v39  ;;  %v1923_v57 = vadd.f32 %v1563_v52, %v1562_v45  ;;  %v836_v41 = vsel %vm804_vm0, %v1848_v5, 0.0 }
 0x12f   : > { %v862_v53 = vadd.f32 %v861_v26, %v831_v47  ;;  %v901_v55 = vmul.f32 %v831_v47, %v831_v47  ;;  %v905_v45 = vmul.f32 %v835_v33, %v835_v33  ;;  %v837_v52 = vsel %vm805_vm2, %v1857_v23, 0.0 }
 0x130   : > { %v832_v61 = vsel %vm800_vm13, %v1516_v48, 0.0  ;;  %v1397_v62 = vpack.c.bf16 %v1516_v48, %v1513_v38  ;;  %v1437_v7 = vpack.c.bf16 %v1923_v57, %v1919_v44  ;;  %v906_v5 = vmul.f32 %v836_v41, %v836_v41 }
 0x131   : > { %v932_v0 = vadd.f32 %v931_v32, %v901_v55  ;;  %v863_v1 = vadd.f32 %v862_v53, %v832_v61  ;;  %v902_v2 = vmul.f32 %v832_v61, %v832_v61  ;;  %v746_v53 = vadd.s32 192, %v1829_v49 }
 0x132   : > { %1449 = vst [vmem:[%s1845_s8 + $0x30] sm:$0xff] %v1397_v62   ;;  %v1517_v6 = vpop.f32.mrb[28].mxu0  ;;  %v1565_v12 = vpop.f32.mrb[28].mxu1  ;;  %1457 = vst [vmem:[%s1845_s8 + $0x70] sm:$0xff] %v1437_v7   ;;  %v777_v55 = vadd.s32 %v1831_v50, %v744_v37  ;;  %vm808_vm5 = vcmp.lt.s32.totalorder %v776_v42, 512  ;;  %v747_v61 = vadd.s32 200, %v1829_v49  ;;  %v907_v62 = vmul.f32 %v837_v52, %v837_v52 }
 0x133   : > { %v933_v9 = vadd.f32 %v932_v0, %v902_v2  ;;  %v1518_v10 = vpop.f32.mrb[29].mxu0  ;;  %v1566_v17 = vpop.f32.mrb[29].mxu1  ;;  %v778_v0 = vadd.s32 %v1831_v50, %v745_v46  ;;  %v839_v2 = vsel %vm807_vm4, %v1869_v51, 0.0  ;;  %v779_v3 = vadd.s32 %v1831_v50, %v746_v53 }
 0x134   : > { %v1519_v14 = vadd.f32 %v1518_v10, %v1517_v6  ;;  %v1520_v16 = vpop.f32.mrb[30].mxu0  ;;  %v1935_v19 = vadd.f32 %v1566_v17, %v1565_v12  ;;  %v1568_v21 = vpop.f32.mrb[30].mxu1  ;;  %v908_v6 = vmul.f32 %v838_v60, %v838_v60  ;;  %vm809_vm6 = vcmp.lt.s32.totalorder %v777_v55, 512 }
 0x135   : > { %v1521_v18 = vpop.f32.mrb[31].mxu0  ;;  %v1569_v28 = vpop.f32.mrb[31].mxu1  ;;  %v840_v31 = vsel %vm808_vm5, %v1872_v59, 0.0  ;;  %v749_v10 = vadd.s32 216, %v1829_v49  ;;  %v909_v12 = vmul.f32 %v839_v2, %v839_v2  ;;  %vm810_vm7 = vcmp.lt.s32.totalorder %v778_v0, 512 }
 0x136   : > { %v833_v26 = vsel %vm801_vm14, %v1519_v14, 0.0  ;;  %v1522_v27 = vadd.f32 %v1521_v18, %v1520_v16  ;;  %v1939_v32 = vadd.f32 %v1569_v28, %v1568_v21  ;;  %v841_v51 = vsel %vm809_vm6, %v1881_v15, 0.0 }
 0x137   : > { %v864_v29 = vadd.f32 %v863_v1, %v833_v26  ;;  %v903_v30 = vmul.f32 %v833_v26, %v833_v26  ;;  %vm811_vm8 = vcmp.lt.s32.totalorder %v779_v3, 512  ;;  %v781_v16 = vadd.s32 %v1831_v50, %v748_v4 }
 0x138   : > { %v834_v35 = vsel %vm802_vm1, %v1522_v27, 0.0  ;;  %v1402_v36 = vpack.c.bf16 %v1522_v27, %v1519_v14  ;;  %v1442_v63 = vpack.c.bf16 %v1939_v32, %v1935_v19  ;;  %v910_v17 = vmul.f32 %v840_v31, %v840_v31 }
 0x139   : > { %v934_v38 = vadd.f32 %v933_v9, %v903_v30  ;;  %v865_v39 = vadd.f32 %v864_v29, %v834_v35  ;;  %v904_v40 = vmul.f32 %v834_v35, %v834_v35  ;;  %v780_v9 = vadd.s32 %v1831_v50, %v747_v61 }
 0x13a   : > { %1450 = vst [vmem:[%s1845_s8 + $0x38] sm:$0xff] %v1402_v36   ;;  %1458 = vst [vmem:[%s1845_s8 + $0x78] sm:$0xff] %v1442_v63   ;;  %v842_v59 = vsel %vm810_vm7, %v1884_v24, 0.0  ;;  %v782_v25 = vadd.s32 %v1831_v50, %v749_v10  ;;  %v751_v26 = vadd.s32 232, %v1829_v49  ;;  %v911_v27 = vmul.f32 %v841_v51, %v841_v51 }
 0x13b   : > { %v866_v47 = vadd.f32 %v865_v39, %v835_v33  ;;  %v935_v48 = vadd.f32 %v934_v38, %v904_v40  ;;  %vm812_vm9 = vcmp.lt.s32.totalorder %v780_v9, 512  ;;  %v752_v15 = vadd.s32 240, %v1829_v49 }
 0x13c   : > { %v843_v30 = vsel %vm811_vm8, %v1893_v43, 0.0  ;;  %vm813_vm10 = vcmp.lt.s32.totalorder %v781_v16, 512  ;;  %v912_v33 = vmul.f32 %v842_v59, %v842_v59  ;;  %v783_v36 = vadd.s32 %v1831_v50, %v750_v22 }
 0x13d   : > { %v867_v56 = vadd.f32 %v866_v47, %v836_v41  ;;  %v936_v58 = vadd.f32 %v935_v48, %v905_v45  ;;  %v844_v24 = vsel %vm812_vm9, %v1896_v54, 0.0  ;;  %vm814_vm11 = vcmp.lt.s32.totalorder %v782_v25, 512 }
 0x13e   : > { %v784_v37 = vadd.s32 %v1831_v50, %v751_v26  ;;  %v753_v38 = vadd.s32 248, %v1829_v49  ;;  %v913_v40 = vmul.f32 %v843_v30, %v843_v30  ;;  %v785_v42 = vadd.s32 %v1831_v50, %v752_v15 }
 0x13f   : > { %v868_v1 = vadd.f32 %v867_v56, %v837_v52  ;;  %v937_v23 = vadd.f32 %v936_v58, %v906_v5  ;;  %v845_v43 = vsel %vm813_vm10, %v1905_v11, 0.0  ;;  %v914_v46 = vmul.f32 %v844_v24, %v844_v24 }
 0x140   : > { %vm815_vm12 = vcmp.lt.s32.totalorder %v783_v36, 512  ;;  %v846_v47 = vsel %vm814_vm11, %v1908_v20, 0.0  ;;  %vm816_vm13 = vcmp.lt.s32.totalorder %v784_v37, 512  ;;  %v786_v54 = vadd.s32 %v1831_v50, %v753_v38 }
 0x141   : > { %v869_v7 = vadd.f32 %v868_v1, %v838_v60  ;;  %v938_v8 = vadd.f32 %v937_v23, %v907_v62  ;;  %v915_v53 = vmul.f32 %v845_v43, %v845_v43  ;;  %vm817_vm14 = vcmp.lt.s32.totalorder %v785_v42, 512 }
 0x142   : > { %v847_v49 = vsel %vm815_vm12, %v1919_v44, 0.0  ;;  %v916_v56 = vmul.f32 %v846_v47, %v846_v47  ;;  %v848_v11 = vsel %vm816_vm13, %v1923_v57, 0.0  ;;  %v849_v58 = vsel %vm817_vm14, %v1935_v19, 0.0 }
 0x143   : > { %v939_v13 = vadd.f32 %v938_v8, %v908_v6  ;;  %v870_v14 = vadd.f32 %v869_v7, %v839_v2  ;;  %v917_v20 = vmul.f32 %v847_v49, %v847_v49  ;;  %vm818_vm15 = vcmp.lt.s32.totalorder %v786_v54, 512 }
 0x144   : > { %v918_v0 = vmul.f32 %v848_v11, %v848_v11  ;;  %v919_v1 = vmul.f32 %v849_v58, %v849_v58  ;;  %v850_v23 = vsel %vm818_vm15, %v1939_v32, 0.0 }
 0x145   : > { %v871_v18 = vadd.f32 %v870_v14, %v840_v31  ;;  %v940_v21 = vadd.f32 %v939_v13, %v909_v12  ;;  %v920_v6 = vmul.f32 %v850_v23, %v850_v23 }
 0x147   : > { %v872_v28 = vadd.f32 %v871_v18, %v841_v51  ;;  %v941_v29 = vadd.f32 %v940_v21, %v910_v17 }
 0x149   : > { %v873_v34 = vadd.f32 %v872_v28, %v842_v59  ;;  %v942_v35 = vadd.f32 %v941_v29, %v911_v27 }
 0x14b   : > { %v874_v39 = vadd.f32 %v873_v34, %v843_v30  ;;  %v943_v41 = vadd.f32 %v942_v35, %v912_v33 }
 0x14d   : > { %v944_v63 = vadd.f32 %v943_v41, %v913_v40  ;;  %v875_v45 = vadd.f32 %v874_v39, %v844_v24 }
 0x14f   : > { %v945_v48 = vadd.f32 %v944_v63, %v914_v46  ;;  %v876_v52 = vadd.f32 %v875_v45, %v845_v43 }
 0x151   : > { %v946_v5 = vadd.f32 %v945_v48, %v915_v53  ;;  %v877_v55 = vadd.f32 %v876_v52, %v846_v47 }
 0x153   : > { %v947_v60 = vadd.f32 %v946_v5, %v916_v56  ;;  %v878_v61 = vadd.f32 %v877_v55, %v847_v49 }
 0x155   : > { %v948_v50 = vadd.f32 %v947_v60, %v917_v20  ;;  %v879_v62 = vadd.f32 %v878_v61, %v848_v11 }
 0x157   : > { %v949_v44 = vadd.f32 %v948_v50, %v918_v0  ;;  %v880_v2 = vadd.f32 %v879_v62, %v849_v58 }
 0x159   : > { %v950_v3 = vadd.f32 %v949_v44, %v919_v1  ;;  %v881_v4 = vadd.f32 %v880_v2, %v850_v23 }
 0x15b   : > { %v882_v57 = vrot.slane %v881_v4, 4  ;;  %v951_v7 = vadd.f32 %v950_v3, %v920_v6 }
 0x15d   : > { %v883_v19 = vadd.f32 %v882_v57, %v881_v4  ;;  %v952_v8 = vrot.slane %v951_v7, 4 }
 0x15f   : > { %v884_v31 = vrot.slane %v883_v19, 2  ;;  %v953_v9 = vadd.f32 %v952_v8, %v951_v7 }
 0x161   : > { %v885_v10 = vadd.f32 %v884_v31, %v883_v19  ;;  %v954_v12 = vrot.slane %v953_v9, 2 }
 0x163   : > { %v886_v13 = vrot.slane %v885_v10, 1  ;;  %v955_v14 = vadd.f32 %v954_v12, %v953_v9 }
 0x165   : > { %v887_v32 = vadd.f32 %v886_v13, %v885_v10  ;;  %v956_v51 = vrot.slane %v955_v14, 1 }
 0x167   : > { %888 = vst [vmem:[%s237_s11] sm:$0x1] %v887_v32  ;;  %v957_v16 = vadd.f32 %v956_v51, %v955_v14 }
 0x169   : > { %958 = vst [vmem:[%s237_s11 + $0x1] sm:$0x1] %v957_v16 }
 0x16a PF: > { %s14_s14 = sadd.s32 1, %s1697_s14   ;;  %s2004_s12 = smov %s1693_s13 }
 0x16b   : > { %p11_p6 = scmp.ge.s32.totalorder %s14_s14, 4   ;;  %s2005_s13 = smov %s2007_s15 }
 0x16d   :  { %13 = sbr.rel (!%p11_p6) target bundleno = 2 (0x2), region = 73 }

// kernel: tile.33
= control target key start
LH: loop header
LB: loop body
LE: loop exit
PB: predicated region body
PF: predicated region fallthrough
CT: control target
= control target key end

     0   :  { %s28_s0 = inlined_call_operand.vmem [shape: f32[32], index: 0, kind: input, shape index: {}]   ;;  %s29_s1 = inlined_call_operand.vmem [shape: f32[16,32], index: 1, kind: output, shape index: {}]  }
   0x1   :  { %v4_v0 = vld [vmem:[%s28_s0] ss:$0 sm:$0xff] }
   0x2   :  { %5 = vst [vmem:[%s29_s1] sm:$0xff] %v4_v0  ;;  %8 = vst [vmem:[%s29_s1 + $0x8] sm:$0xff] %v4_v0 }

// kernel: discriminator_forward.7
= control target key start
LH: loop header
LB: loop body
LE: loop exit
PB: predicated region body
PF: predicated region fallthrough
CT: control target
= control target key end

     0   :  { %s1459_s18 = smov 0   ;;  %s1461_s19 = smov 0   ;;  %s1739_s0 = inlined_call_operand.vmem [shape: bf16[128,512], index: 0, kind: input, shape index: {}]   ;;  %s1740_s1 = inlined_call_operand.vmem [shape: bf16[512,128], index: 1, kind: input, shape index: {}]   ;;  %s1741_s2 = inlined_call_operand.vmem [shape: f32[1,512], index: 2, kind: input, shape index: {}]   ;;  %s1742_s3 = inlined_call_operand.vmem [shape: f32[1,512], index: 3, kind: input, shape index: {}]   ;;  %s1743_s4 = inlined_call_operand.vmem [shape: bf16[128,128], index: 4, kind: output, shape index: {0}]   ;;  %s1744_s5 = inlined_call_operand.vmem [shape: f32[2,2,128], index: 5, kind: output, shape index: {1}]  }
   0x1   :  { %s1463_s20 = smov 0  }
   0x2 LB: > { %s28_s21 = sadd.s32 1, %s1423_s19  ;;  %p1187_p0 = scmp.ge.s32.totalorder %s1427_s20, 1  ;;  %s1427_s20 = sphi %s1463_s20, %s16_s20   ;;  %s1423_s19 = sphi %s1461_s19, %s1746_s19   ;;  %s1419_s18 = sphi %s1459_s18, %s1745_s18  }
   0x3   : > { %p30_p1 = scmp.ge.s32.totalorder %s28_s21, 2  ;;  %p222_p2 = scmp.lt.s32.totalorder %s1427_s20, 3 }
   0x5   : > { %s1748_s21 = smov (%p30_p1, %s28_s21), 0  ;;  %p223_p3 = pnand %p1187_p0, %p222_p2 }
   0x6   : > { %v1373_v0 = vld [vmem:[%s1740_s1 + $0x40] sm:$0xff] (!%p223_p3)   ;;  %v1377_v4 = vld [vmem:[%s1740_s1 + $0x48] sm:$0xff] (!%p223_p3)   ;;  %v1381_v8 = vld [vmem:[%s1740_s1 + $0x50] sm:$0xff] (!%p223_p3)   ;;  %s1188_s8 = sshll.u32 (!%p223_p3), %s1419_s18, 3  ;;  %v346_v22 = vlaneseq (!%p223_p3)  ;;  %s1194_s9 = sshll.u32 (!%p223_p3), %s1419_s18, 6 }
   0x7   : > { %226 = sbr.rel (%p223_p3) target bundleno = 313 (0x139), region = 36  ;;  %v1374_v1 = vld [vmem:[%s1740_s1 + $0xc0] sm:$0xff] (!%p223_p3)   ;;  %1269 = vmatprep.subr.bf16.mxu0 (!%p223_p3), %v1373_v0  ;;  %v1378_v5 = vld [vmem:[%s1740_s1 + $0xc8] sm:$0xff] (!%p223_p3)   ;;  %v1382_v9 = vld [vmem:[%s1740_s1 + $0xd0] sm:$0xff] (!%p223_p3)   ;;  %p266_p4 = scmp.lt.s32.totalorder (!%p223_p3), %s1188_s8, 15 }
   0x8   : > { %v1375_v2 = vld [vmem:[%s1740_s1] sm:$0xff] (!%p223_p3)   ;;  %1309 = vmatprep.subr.bf16.mxu1 (!%p223_p3), %v1374_v1  ;;  %v1379_v6 = vld [vmem:[%s1740_s1 + $0x8] sm:$0xff] (!%p223_p3)   ;;  %v1383_v10 = vld [vmem:[%s1740_s1 + $0x10] sm:$0xff] (!%p223_p3)   ;;  %v1560_v27 = vshrl.u32 (!%p223_p3), %v346_v22, 7  ;;  %p288_p5 = scmp.lt.s32.totalorder (!%p223_p3), %s1419_s18, 1 }
   0x9   : > { %v1376_v3 = vld [vmem:[%s1740_s1 + $0x80] sm:$0xff] (!%p223_p3)   ;;  %1270 = vmatpush3.bf16.msra.mxu0 (!%p223_p3), %v1375_v2  ;;  %v1380_v7 = vld [vmem:[%s1740_s1 + $0x88] sm:$0xff] (!%p223_p3)   ;;  %v1384_v11 = vld [vmem:[%s1740_s1 + $0x90] sm:$0xff] (!%p223_p3)  }
   0xa   : > { %1310 = vmatpush3.bf16.msra.mxu1 (!%p223_p3), %v1376_v3  ;;  %1271 = vmatprep.subr.bf16.mxu0 (!%p223_p3), %v1377_v4  ;;  %v1385_v12 = vld [vmem:[%s1740_s1 + $0x58] sm:$0xff] (!%p223_p3)   ;;  %v1389_v16 = vld [vmem:[%s1740_s1 + $0x60] sm:$0xff] (!%p223_p3)   ;;  %v1393_v20 = vld [vmem:[%s1740_s1 + $0x68] sm:$0xff] (!%p223_p3)   ;;  %v352_v33 = vsub.s32 (!%p223_p3), 1, %v1560_v27  ;;  %v360_v35 = vsub.s32 (!%p223_p3), 3, %v1560_v27  ;;  %v348_v39 = vsub.s32 (!%p223_p3), 0, %v1560_v27 }
   0xb   : > { %1311 = vmatprep.subr.bf16.mxu1 (!%p223_p3), %v1378_v5  ;;  %v1386_v13 = vld [vmem:[%s1740_s1 + $0xd8] sm:$0xff] (!%p223_p3)   ;;  %v1390_v17 = vld [vmem:[%s1740_s1 + $0xe0] sm:$0xff] (!%p223_p3)   ;;  %v1394_v21 = vld [vmem:[%s1740_s1 + $0xe8] sm:$0xff] (!%p223_p3)   ;;  %v356_v40 = vsub.s32 (!%p223_p3), 2, %v1560_v27 }
   0xc   : > { %v1387_v14 = vld [vmem:[%s1740_s1 + $0x18] sm:$0xff] (!%p223_p3)   ;;  %v1391_v18 = vld [vmem:[%s1740_s1 + $0x20] sm:$0xff] (!%p223_p3)   ;;  %v1395_v23 = vld [vmem:[%s1740_s1 + $0x28] sm:$0xff] (!%p223_p3)  }
   0xd   : > { %1272 = vmatpush3.bf16.msra.mxu0 (!%p223_p3), %v1379_v6  ;;  %v1388_v15 = vld [vmem:[%s1740_s1 + $0x98] sm:$0xff] (!%p223_p3)   ;;  %v1392_v19 = vld [vmem:[%s1740_s1 + $0xa0] sm:$0xff] (!%p223_p3)   ;;  %v1396_v24 = vld [vmem:[%s1740_s1 + $0xa8] sm:$0xff] (!%p223_p3)  }
   0xe   : > { %1312 = vmatpush3.bf16.msra.mxu1 %v1380_v7  ;;  %1273 = vmatprep.subr.bf16.mxu0 %v1381_v8  ;;  %s1750_s8 = smov (!%p266_p4, %s1188_s8), 15  ;;  %v1397_v25 = vld [vmem:[%s1740_s1 + $0x70] sm:$0xff]   ;;  %v1401_v30 = vld [vmem:[%s1740_s1 + $0x78] sm:$0xff]   ;;  %v344_v38 = vld [vmem:[%s1741_s2] sm:$0xf]  ;;  %s1752_s18 = smov (!%p288_p5, %s1419_s18), 1 }
   0xf   : > { %1313 = vmatprep.subr.bf16.mxu1 %v1382_v9  ;;  %v1398_v26 = vld [vmem:[%s1740_s1 + $0xf0] sm:$0xff]   ;;  %s1237_s11 = sshll.u32 %s1750_s8, 4  ;;  %v1402_v31 = vld [vmem:[%s1740_s1 + $0xf8] sm:$0xff]   ;;  %v399_v45 = vld [vmem:[%s1742_s3] sm:$0xf]  ;;  %v1600_v48 = vrot.slane %v344_v38, %v352_v33  ;;  %v1604_v54 = vrot.slane %v344_v38, %v360_v35  ;;  %v1610_v58 = vrot.slane %v344_v38, %v348_v39  ;;  %v1616_v62 = vrot.slane %v344_v38, %v356_v40  ;;  %s1192_s10 = sshll.u32 %s1750_s8, 2 }
  0x10   : > { %v1399_v28 = vld [vmem:[%s1740_s1 + $0x30] sm:$0xff]   ;;  %s1578_s24 = scalar_lea.vmem %s1739_s0, %s1237_s11  ;;  %v1403_v32 = vld [vmem:[%s1740_s1 + $0x38] sm:$0xff]   ;;  %v1602_v49 = vrot.slane %v399_v45, %v352_v33  ;;  %v1606_v55 = vrot.slane %v399_v45, %v360_v35  ;;  %v1612_v59 = vrot.slane %v399_v45, %v348_v39  ;;  %v1618_v63 = vrot.slane %v399_v45, %v356_v40  ;;  %s1707_s13 = scalar_lea.vmem %s1743_s4, %s1192_s10 }
  0x11   : > { %1274 = vmatpush3.bf16.msra.mxu0 %v1383_v10  ;;  %v1400_v29 = vld [vmem:[%s1740_s1 + $0xb0] sm:$0xff]   ;;  %v1404_v34 = vld [vmem:[%s1740_s1 + $0xb8] sm:$0xff]   ;;  %v294_v36 = vld [vmem:[%s1578_s24] sm:$0xff]  ;;  %s1193_s8 = sshll.u32 %s1752_s18, 1 }
  0x12   : > { %1314 = vmatpush3.bf16.msra.mxu1 %v1384_v11  ;;  %1275 = vmatprep.subr.bf16.mxu0 %v1385_v12  ;;  %v296_v37 = vld [vmem:[%s1578_s24 + $0x10] sm:$0xff]  ;;  %v310_v41 = vunpack.c.l.bf16 %v294_v36  ;;  %v311_v42 = vunpack.c.h.bf16 %v294_v36  ;;  %v295_v46 = vld [vmem:[%s1578_s24 + $0x8] sm:$0xff]  ;;  %v297_v47 = vld [vmem:[%s1578_s24 + $0x18] sm:$0xff]  ;;  %s291_s16 = scalar_lea.vmem %s1744_s5, %s1193_s8 }
  0x13   : > { %1315 = vmatprep.subr.bf16.mxu1 %v1386_v13  ;;  %v314_v43 = vunpack.c.l.bf16 %v296_v37  ;;  %v315_v44 = vunpack.c.h.bf16 %v296_v37  ;;  %v312_v50 = vunpack.c.l.bf16 %v295_v46  ;;  %v313_v51 = vunpack.c.h.bf16 %v295_v46  ;;  %v1634_v22 = vld [vmem:[%s1578_s24 + $0x28] sm:$0xff] }
  0x14   : > { %v316_v52 = vunpack.c.l.bf16 %v297_v47  ;;  %v317_v53 = vunpack.c.h.bf16 %v297_v47  ;;  %v367_v56 = vmul.f32 %v1600_v48, %v311_v42  ;;  %v366_v2 = vmul.f32 %v1610_v58, %v310_v41 }
  0x15   : > { %1276 = vmatpush3.bf16.msra.mxu0 %v1387_v14  ;;  %v371_v57 = vmul.f32 %v1600_v48, %v315_v44  ;;  %v369_v60 = vmul.f32 %v1604_v54, %v313_v51  ;;  %v370_v3 = vmul.f32 %v1610_v58, %v314_v43  ;;  %v368_v6 = vmul.f32 %v1616_v62, %v312_v50 }
  0x16   : > { %1316 = vmatpush3.bf16.msra.mxu1 %v1388_v15  ;;  %1277 = vmatprep.subr.bf16.mxu0 %v1389_v16  ;;  %v373_v61 = vmul.f32 %v1604_v54, %v317_v53  ;;  %v422_v0 = vadd.f32 %v1602_v49, %v367_v56  ;;  %v372_v7 = vmul.f32 %v1616_v62, %v316_v52  ;;  %v321_v33 = vunpack.c.h.bf16 %v1634_v22 }
  0x17   : > { %1317 = vmatprep.subr.bf16.mxu1 %v1390_v17  ;;  %v426_v1 = vadd.f32 %v1602_v49, %v371_v57  ;;  %v424_v4 = vadd.f32 %v1606_v55, %v369_v60  ;;  %v421_v14 = vadd.f32 %v1612_v59, %v366_v2  ;;  %v425_v15 = vadd.f32 %v1612_v59, %v370_v3 }
  0x18   : > { %v428_v5 = vadd.f32 %v1606_v55, %v373_v61  ;;  %vm454_vm0 = vcmp.gt.f32.partialorder %v422_v0, 0.0  ;;  %v486_v8 = vmul.f32 0.2, %v422_v0  ;;  %v377_v42 = vmul.f32 %v1604_v54, %v321_v33 }
  0x19   : > { %1278 = vmatpush3.bf16.msra.mxu0 %v1391_v18  ;;  %vm458_vm1 = vcmp.gt.f32.partialorder %v426_v1, 0.0  ;;  %v490_v9 = vmul.f32 0.2, %v426_v1  ;;  %vm456_vm2 = vcmp.gt.f32.partialorder %v424_v4, 0.0  ;;  %v488_v10 = vmul.f32 0.2, %v424_v4 }
  0x1a   : > { %1318 = vmatpush3.bf16.msra.mxu1 %v1392_v19  ;;  %1279 = vmatprep.subr.bf16.mxu0 %v1393_v20  ;;  %vm460_vm3 = vcmp.gt.f32.partialorder %v428_v5, 0.0  ;;  %v492_v11 = vmul.f32 0.2, %v428_v5  ;;  %v518_v12 = vsel %vm454_vm0, %v422_v0, %v486_v8  ;;  %v423_v19 = vadd.f32 %v1618_v63, %v368_v6  ;;  %v298_v20 = vld [vmem:[%s1578_s24 + $0x20] sm:$0xff] }
  0x1b   : > { %1319 = vmatprep.subr.bf16.mxu1 %v1394_v21  ;;  %v522_v13 = vsel %vm458_vm1, %v426_v1, %v490_v9  ;;  %v520_v17 = vsel %vm456_vm2, %v424_v4, %v488_v10  ;;  %v300_v21 = vld [vmem:[%s1578_s24 + $0x30] sm:$0xff]  ;;  %vm453_vm4 = vcmp.gt.f32.partialorder %v421_v14, 0.0  ;;  %vm457_vm5 = vcmp.gt.f32.partialorder %v425_v15, 0.0  ;;  %v302_v6 = vld [vmem:[%s1578_s24 + $0x40] sm:$0xff] }
  0x1c   : > { %v550_v16 = vpack.c.bf16 %v522_v13, %v518_v12  ;;  %v524_v18 = vsel %vm460_vm3, %v428_v5, %v492_v11  ;;  %vm455_vm6 = vcmp.gt.f32.partialorder %v423_v19, 0.0  ;;  %v318_v43 = vunpack.c.l.bf16 %v298_v20  ;;  %v304_v10 = vld [vmem:[%s1578_s24 + $0x50] sm:$0xff] }
  0x1d   : > { %1280 = vmatpush3.bf16.msra.mxu0 %v1395_v23  ;;  %v552_v23 = vpack.c.bf16 %v524_v18, %v520_v17  ;;  %v322_v44 = vunpack.c.l.bf16 %v300_v21  ;;  %v432_v51 = vadd.f32 %v1606_v55, %v377_v42  ;;  %v320_v56 = vunpack.c.l.bf16 %v1634_v22  ;;  %v303_v17 = vld [vmem:[%s1578_s24 + $0x48] sm:$0xff]  ;;  %v305_v18 = vld [vmem:[%s1578_s24 + $0x58] sm:$0xff] }
  0x1e   : > { %1320 = vmatpush3.bf16.msra.mxu1 %v1396_v24  ;;  %1281 = vmatprep.subr.bf16.mxu0 %v1397_v25  ;;  %v485_v24 = vmul.f32 0.2, %v421_v14  ;;  %v489_v25 = vmul.f32 0.2, %v425_v15  ;;  %v374_v52 = vmul.f32 %v1610_v58, %v318_v43  ;;  %v331_v22 = vunpack.c.h.bf16 %v304_v10 }
  0x1f   : > { %1321 = vmatprep.subr.bf16.mxu1 %v1398_v26  ;;  %853 = vmatprep.mubr.bf16.mxu0 %v550_v16  ;;  %v427_v26 = vadd.f32 %v1618_v63, %v372_v7  ;;  %v378_v53 = vmul.f32 %v1610_v58, %v322_v44  ;;  %vm464_vm10 = vcmp.gt.f32.partialorder %v432_v51, 0.0  ;;  %v496_v0 = vmul.f32 0.2, %v432_v51 }
  0x20   : > { %918 = vmatprep.mubr.bf16.mxu1 %v552_v23  ;;  %v429_v1 = vadd.f32 %v1612_v59, %v374_v52  ;;  %v327_v16 = vunpack.c.h.bf16 %v302_v6  ;;  %v328_v52 = vunpack.c.l.bf16 %v303_v17 }
  0x21   : > { %1282 = vmatpush3.bf16.msra.mxu0 %v1399_v28  ;;  %v487_v28 = vmul.f32 0.2, %v423_v19  ;;  %vm459_vm7 = vcmp.gt.f32.partialorder %v427_v26, 0.0  ;;  %v491_v35 = vmul.f32 0.2, %v427_v26  ;;  %v433_v4 = vadd.f32 %v1612_v59, %v378_v53 }
  0x22   : > { %1322 = vmatpush3.bf16.msra.mxu1 %v1400_v29  ;;  %1283 = vmatprep.subr.bf16.mxu0 %v1401_v30  ;;  %v301_v29 = vld [vmem:[%s1578_s24 + $0x38] sm:$0xff]  ;;  %v517_v30 = vsel %vm453_vm4, %v421_v14, %v485_v24  ;;  %v528_v9 = vsel %vm464_vm10, %v432_v51, %v496_v0  ;;  %vm461_vm12 = vcmp.gt.f32.partialorder %v429_v1, 0.0  ;;  %v493_v11 = vmul.f32 0.2, %v429_v1 }
  0x23   : > { %1323 = vmatprep.subr.bf16.mxu1 %v1402_v31  ;;  %v319_v31 = vunpack.c.h.bf16 %v298_v20  ;;  %v519_v36 = vsel %vm455_vm6, %v423_v19, %v487_v28  ;;  %v325_v40 = vunpack.c.h.bf16 %v301_v29  ;;  %v523_v41 = vsel %vm459_vm7, %v427_v26, %v491_v35 }
  0x24   : > { %v551_v45 = vpack.c.bf16 %v523_v41, %v519_v36  ;;  %v324_v5 = vunpack.c.l.bf16 %v301_v29  ;;  %vm465_vm13 = vcmp.gt.f32.partialorder %v433_v4, 0.0  ;;  %v497_v12 = vmul.f32 0.2, %v433_v4 }
  0x25   : > { %1284 = vmatpush3.bf16.msra.mxu0 %v1403_v32  ;;  %v323_v32 = vunpack.c.h.bf16 %v300_v21  ;;  %v375_v38 = vmul.f32 %v1600_v48, %v319_v31  ;;  %v381_v50 = vmul.f32 %v1604_v54, %v325_v40  ;;  %v376_v14 = vmul.f32 %v1616_v62, %v320_v56 }
  0x26   : > { %1324 = vmatpush3.bf16.msra.mxu1 %v1404_v34  ;;  %v521_v34 = vsel %vm457_vm5, %v425_v15, %v489_v25  ;;  %v380_v15 = vmul.f32 %v1616_v62, %v324_v5  ;;  %v525_v20 = vsel %vm461_vm12, %v429_v1, %v493_v11  ;;  %v529_v21 = vsel %vm465_vm13, %v433_v4, %v497_v12 }
  0x27   : > { %v549_v37 = vpack.c.bf16 %v521_v34, %v517_v30  ;;  %v379_v39 = vmul.f32 %v1600_v48, %v323_v32  ;;  %v430_v46 = vadd.f32 %v1602_v49, %v375_v38  ;;  %v436_v61 = vadd.f32 %v1606_v55, %v381_v50 }
  0x28   : > { %v553_v23 = vpack.c.bf16 %v529_v21, %v525_v20  ;;  %v431_v24 = vadd.f32 %v1618_v63, %v376_v14  ;;  %v435_v25 = vadd.f32 %v1618_v63, %v380_v15  ;;  %v383_v26 = vmul.f32 %v1600_v48, %v327_v16  ;;  %v309_v15 = vld [vmem:[%s1578_s24 + $0x78] sm:$0xff] }
  0x29   : > { %854 = vmatmul.mubr.bf16.vlgmr.msra.gmra.mrb[0].mxu0 %v549_v37  ;;  %v434_v47 = vadd.f32 %v1602_v49, %v379_v39  ;;  %919 = vmatmul.mubr.bf16.vlgmr.msra.gmra.mrb[0].mxu1 %v551_v45  ;;  %vm462_vm8 = vcmp.gt.f32.partialorder %v430_v46, 0.0  ;;  %v494_v57 = vmul.f32 0.2, %v430_v46  ;;  %vm468_vm11 = vcmp.gt.f32.partialorder %v436_v61, 0.0 }
  0x2a   : > { %v500_v8 = vmul.f32 0.2, %v436_v61  ;;  %v387_v28 = vmul.f32 %v1600_v48, %v331_v22  ;;  %v329_v29 = vunpack.c.h.bf16 %v303_v17  ;;  %v333_v30 = vunpack.c.h.bf16 %v305_v18 }
  0x2b   : > { %vm466_vm9 = vcmp.gt.f32.partialorder %v434_v47, 0.0  ;;  %v498_v60 = vmul.f32 0.2, %v434_v47  ;;  %v526_v2 = vsel %vm462_vm8, %v430_v46, %v494_v57  ;;  %v326_v31 = vunpack.c.l.bf16 %v302_v6  ;;  %v308_v6 = vld [vmem:[%s1578_s24 + $0x70] sm:$0xff] }
  0x2c   : > { %v532_v13 = vsel %vm468_vm11, %v436_v61, %v500_v8  ;;  %vm463_vm14 = vcmp.gt.f32.partialorder %v431_v24, 0.0  ;;  %vm467_vm15 = vcmp.gt.f32.partialorder %v435_v25, 0.0  ;;  %v495_v32 = vmul.f32 0.2, %v431_v24 }
  0x2d   : > { %v530_v3 = vsel %vm466_vm9, %v434_v47, %v498_v60  ;;  %v556_v19 = vpack.c.bf16 %v532_v13, %v528_v9  ;;  %v499_v33 = vmul.f32 0.2, %v435_v25  ;;  %v438_v34 = vadd.f32 %v1602_v49, %v383_v26  ;;  %v306_v60 = vld [vmem:[%s1578_s24 + $0x60] sm:$0xff] }
  0x2e   : > { %v554_v7 = vpack.c.bf16 %v530_v3, %v526_v2  ;;  %v442_v35 = vadd.f32 %v1602_v49, %v387_v28  ;;  %v385_v36 = vmul.f32 %v1604_v54, %v329_v29  ;;  %v389_v37 = vmul.f32 %v1604_v54, %v333_v30 }
  0x2f   : > { %926 = vmatprep.mubr.bf16.mxu1 %v556_v19  ;;  %v527_v38 = vsel %vm463_vm14, %v431_v24, %v495_v32  ;;  %v531_v39 = vsel %vm467_vm15, %v435_v25, %v499_v33  ;;  %v330_v40 = vunpack.c.l.bf16 %v304_v10  ;;  %v382_v41 = vmul.f32 %v1610_v58, %v326_v31 }
  0x30   : > { %861 = vmatprep.mubr.bf16.mxu0 %v554_v7  ;;  %v555_v42 = vpack.c.bf16 %v531_v39, %v527_v38  ;;  %vm470_vm0 = vcmp.gt.f32.partialorder %v438_v34, 0.0  ;;  %vm474_vm1 = vcmp.gt.f32.partialorder %v442_v35, 0.0  ;;  %v502_v43 = vmul.f32 0.2, %v438_v34  ;;  %v307_v7 = vld [vmem:[%s1578_s24 + $0x68] sm:$0xff] }
  0x31   : > { %862 = vmatmul.mubr.bf16.gmra.mrb[4].mxu0 %v553_v23  ;;  %v506_v44 = vmul.f32 0.2, %v442_v35  ;;  %v440_v45 = vadd.f32 %v1606_v55, %v385_v36  ;;  %v444_v46 = vadd.f32 %v1606_v55, %v389_v37  ;;  %v386_v47 = vmul.f32 %v1610_v58, %v330_v40 }
  0x32   : > { %927 = vmatmul.mubr.bf16.gmra.mrb[4].mxu1 %v555_v42  ;;  %v534_v50 = vsel %vm470_vm0, %v438_v34, %v502_v43  ;;  %v437_v51 = vadd.f32 %v1612_v59, %v382_v41  ;;  %v332_v53 = vunpack.c.l.bf16 %v305_v18  ;;  %v384_v4 = vmul.f32 %v1616_v62, %v328_v52 }
  0x33   : > { %v538_v56 = vsel %vm474_vm1, %v442_v35, %v506_v44  ;;  %vm472_vm2 = vcmp.gt.f32.partialorder %v440_v45, 0.0  ;;  %vm476_vm3 = vcmp.gt.f32.partialorder %v444_v46, 0.0  ;;  %v504_v57 = vmul.f32 0.2, %v440_v45 }
  0x34   : > { %v558_v61 = vpack.c.bf16 %v538_v56, %v534_v50  ;;  %v508_v0 = vmul.f32 0.2, %v444_v46  ;;  %v441_v1 = vadd.f32 %v1612_v59, %v386_v47  ;;  %vm469_vm4 = vcmp.gt.f32.partialorder %v437_v51, 0.0 }
  0x35   : > { %v536_v2 = vsel %vm472_vm2, %v440_v45, %v504_v57  ;;  %v501_v3 = vmul.f32 0.2, %v437_v51  ;;  %v388_v5 = vmul.f32 %v1616_v62, %v332_v53  ;;  %v335_v10 = vunpack.c.h.bf16 %v306_v60 }
  0x36   : > { %869 = vmatprep.mubr.bf16.mxu0 %v558_v61  ;;  %v540_v8 = vsel %vm476_vm3, %v444_v46, %v508_v0  ;;  %vm473_vm5 = vcmp.gt.f32.partialorder %v441_v1, 0.0  ;;  %v505_v9 = vmul.f32 0.2, %v441_v1  ;;  %v439_v13 = vadd.f32 %v1618_v63, %v384_v4 }
  0x37   : > { %v560_v11 = vpack.c.bf16 %v540_v8, %v536_v2  ;;  %v533_v12 = vsel %vm469_vm4, %v437_v51, %v501_v3  ;;  %v443_v14 = vadd.f32 %v1618_v63, %v388_v5  ;;  %v339_v17 = vunpack.c.h.bf16 %v308_v6 }
  0x38   : > { %v537_v16 = vsel %vm473_vm5, %v441_v1, %v505_v9  ;;  %v391_v18 = vmul.f32 %v1600_v48, %v335_v10  ;;  %v337_v19 = vunpack.c.h.bf16 %v307_v7  ;;  %vm471_vm6 = vcmp.gt.f32.partialorder %v439_v13, 0.0 }
  0x39   : > { %934 = vmatprep.mubr.bf16.mxu1 %v560_v11  ;;  %v557_v20 = vpack.c.bf16 %v537_v16, %v533_v12  ;;  %vm475_vm7 = vcmp.gt.f32.partialorder %v443_v14, 0.0  ;;  %v503_v21 = vmul.f32 0.2, %v439_v13  ;;  %v507_v22 = vmul.f32 0.2, %v443_v14 }
  0x3a   : > { %v395_v23 = vmul.f32 %v1600_v48, %v339_v17  ;;  %v446_v24 = vadd.f32 %v1602_v49, %v391_v18  ;;  %v341_v25 = vunpack.c.h.bf16 %v309_v15  ;;  %v393_v28 = vmul.f32 %v1604_v54, %v337_v19 }
  0x3b   : > { %870 = vmatmul.mubr.bf16.gmra.mrb[8].mxu0 %v557_v20  ;;  %v535_v26 = vsel %vm471_vm6, %v439_v13, %v503_v21  ;;  %v334_v29 = vunpack.c.l.bf16 %v306_v60  ;;  %v338_v30 = vunpack.c.l.bf16 %v308_v6  ;;  %v539_v31 = vsel %vm475_vm7, %v443_v14, %v507_v22 }
  0x3c   : > { %v450_v32 = vadd.f32 %v1602_v49, %v395_v23  ;;  %vm478_vm8 = vcmp.gt.f32.partialorder %v446_v24, 0.0  ;;  %v510_v33 = vmul.f32 0.2, %v446_v24  ;;  %v559_v34 = vpack.c.bf16 %v539_v31, %v535_v26 }
  0x3d   : > { %v397_v35 = vmul.f32 %v1604_v54, %v341_v25  ;;  %v448_v36 = vadd.f32 %v1606_v55, %v393_v28  ;;  %v390_v48 = vmul.f32 %v1610_v58, %v334_v29  ;;  %v394_v39 = vmul.f32 %v1610_v58, %v338_v30 }
  0x3e   : > { %vm482_vm9 = vcmp.gt.f32.partialorder %v450_v32, 0.0  ;;  %v514_v37 = vmul.f32 0.2, %v450_v32  ;;  %v542_v38 = vsel %vm478_vm8, %v446_v24, %v510_v33  ;;  %935 = vmatmul.mubr.bf16.gmra.mrb[8].mxu1 %v559_v34  ;;  %v336_v54 = vunpack.c.l.bf16 %v307_v7 }
  0x3f   : > { %v452_v40 = vadd.f32 %v1606_v55, %v397_v35  ;;  %vm480_vm10 = vcmp.gt.f32.partialorder %v448_v36, 0.0  ;;  %v512_v41 = vmul.f32 0.2, %v448_v36  ;;  %v445_v49 = vadd.f32 %v1612_v59, %v390_v48 }
  0x40   : > { %v546_v42 = vsel %vm482_vm9, %v450_v32, %v514_v37  ;;  %v449_v43 = vadd.f32 %v1612_v59, %v394_v39  ;;  %v340_v44 = vunpack.c.l.bf16 %v309_v15  ;;  %v392_v55 = vmul.f32 %v1616_v62, %v336_v54 }
  0x41   : > { %v562_v45 = vpack.c.bf16 %v546_v42, %v542_v38  ;;  %vm484_vm11 = vcmp.gt.f32.partialorder %v452_v40, 0.0  ;;  %v516_v46 = vmul.f32 0.2, %v452_v40  ;;  %v544_v47 = vsel %vm480_vm10, %v448_v36, %v512_v41 }
  0x42   : > { %vm477_vm12 = vcmp.gt.f32.partialorder %v445_v49, 0.0  ;;  %vm481_vm13 = vcmp.gt.f32.partialorder %v449_v43, 0.0  ;;  %v509_v50 = vmul.f32 0.2, %v445_v49  ;;  %v513_v58 = vmul.f32 0.2, %v449_v43 }
  0x43   : > { %877 = vmatprep.mubr.bf16.mxu0 %v562_v45  ;;  %v548_v51 = vsel %vm484_vm11, %v452_v40, %v516_v46  ;;  %v396_v52 = vmul.f32 %v1616_v62, %v340_v44  ;;  %v447_v60 = vadd.f32 %v1618_v63, %v392_v55  ;;  %v1697_v62 = vstv %s1194_s9 }
  0x44   : > { %v564_v53 = vpack.c.bf16 %v548_v51, %v544_v47  ;;  %v541_v56 = vsel %vm477_vm12, %v445_v49, %v509_v50  ;;  %v545_v59 = vsel %vm481_vm13, %v449_v43, %v513_v58  ;;  %v953_v5 = vadd.s32 8, %v1560_v27 }
  0x45   : > { %v561_v57 = vpack.c.bf16 %v545_v59, %v541_v56  ;;  %v451_v61 = vadd.f32 %v1618_v63, %v396_v52  ;;  %vm479_vm14 = vcmp.gt.f32.partialorder %v447_v60, 0.0  ;;  %v511_v0 = vmul.f32 0.2, %v447_v60 }
  0x46   : > { %942 = vmatprep.mubr.bf16.mxu1 %v564_v53  ;;  %v961_v63 = vadd.s32 %v1697_v62, %v1560_v27  ;;  %v962_v13 = vadd.s32 %v1697_v62, %v953_v5  ;;  %v954_v29 = vadd.s32 16, %v1560_v27  ;;  %v955_v34 = vadd.s32 24, %v1560_v27 }
  0x47   : > { %878 = vmatmul.mubr.bf16.gmra.mrb[12].mxu0 %v561_v57  ;;  %vm483_vm15 = vcmp.gt.f32.partialorder %v451_v61, 0.0  ;;  %v515_v1 = vmul.f32 0.2, %v451_v61  ;;  %v543_v2 = vsel %vm479_vm14, %v447_v60, %v511_v0  ;;  %v956_v58 = vadd.s32 32, %v1560_v27 }
  0x48   : > { %vm969_vm0 = vcmp.lt.s32.totalorder %v961_v63, 128  ;;  %vm970_vm1 = vcmp.lt.s32.totalorder %v962_v13, 128  ;;  %v963_v36 = vadd.s32 %v1697_v62, %v954_v29  ;;  %v964_v39 = vadd.s32 %v1697_v62, %v955_v34 }
  0x49   : > { %v547_v3 = vsel %vm483_vm15, %v451_v61, %v515_v1  ;;  %v957_v59 = vadd.s32 40, %v1560_v27  ;;  %v965_v0 = vadd.s32 %v1697_v62, %v956_v58 }
  0x4a   : > { %v563_v4 = vpack.c.bf16 %v547_v3, %v543_v2  ;;  %vm971_vm2 = vcmp.lt.s32.totalorder %v963_v36, 128  ;;  %vm972_vm3 = vcmp.lt.s32.totalorder %v964_v39, 128 }
  0x4b   : > { %v966_v5 = vadd.s32 %v1697_v62, %v957_v59  ;;  %vm973_vm4 = vcmp.lt.s32.totalorder %v965_v0, 128 }
  0x4c   : > { %943 = vmatmul.mubr.bf16.gmra.mrb[12].mxu1 %v563_v4 }
  0x4d   : > { %vm974_vm5 = vcmp.lt.s32.totalorder %v966_v5, 128 }
  0xfc   : > { %v1285_v6 = vpop.f32.mrb[0].mxu0  ;;  %v1325_v8 = vpop.f32.mrb[0].mxu1 }
  0xfd   : > { %v1286_v7 = vpop.f32.mrb[1].mxu0  ;;  %v1326_v11 = vpop.f32.mrb[1].mxu1 }
  0xfe   : > { %v1287_v9 = vadd.f32 %v1286_v7, %v1285_v6  ;;  %v1288_v10 = vpop.f32.mrb[2].mxu0  ;;  %v1327_v14 = vadd.f32 %v1326_v11, %v1325_v8  ;;  %v1328_v15 = vpop.f32.mrb[2].mxu1 }
  0xff   : > { %v1289_v12 = vpop.f32.mrb[3].mxu0  ;;  %v1329_v17 = vpop.f32.mrb[3].mxu1 }
 0x100   : > { %v1290_v16 = vadd.f32 %v1289_v12, %v1288_v10  ;;  %v921_v18 = vadd.f32 %v1327_v14, %v1287_v9  ;;  %v1330_v19 = vadd.f32 %v1329_v17, %v1328_v15  ;;  %v958_v17 = vadd.s32 48, %v1560_v27 }
 0x102   : > { %v977_v20 = vsel %vm969_vm0, %v921_v18, 0.0  ;;  %v924_v21 = vadd.f32 %v1330_v19, %v1290_v16 }
 0x103   : > { %v999_v24 = vmul.f32 %v977_v20, %v977_v20 }
 0x104   : > { %v978_v22 = vsel %vm970_vm1, %v924_v21, 0.0  ;;  %v1249_v23 = vpack.c.bf16 %v924_v21, %v921_v18  ;;  %v1291_v28 = vpop.f32.mrb[4].mxu0 }
 0x105   : > { %v985_v25 = vadd.f32 %v978_v22, %v977_v20  ;;  %v1000_v26 = vmul.f32 %v978_v22, %v978_v22  ;;  %v1292_v30 = vpop.f32.mrb[5].mxu0  ;;  %v1331_v37 = vpop.f32.mrb[4].mxu1 }
 0x106   : > { %1250 = vst [vmem:[%s1707_s13] sm:$0xff] %v1249_v23   ;;  %v1293_v32 = vadd.f32 %v1292_v30, %v1291_v28  ;;  %v1294_v33 = vpop.f32.mrb[6].mxu0  ;;  %v1332_v38 = vpop.f32.mrb[5].mxu1  ;;  %v967_v28 = vadd.s32 %v1697_v62, %v958_v17 }
 0x107   : > { %v1007_v31 = vadd.f32 %v1000_v26, %v999_v24  ;;  %v1295_v35 = vpop.f32.mrb[7].mxu0  ;;  %v1333_v40 = vadd.f32 %v1332_v38, %v1331_v37  ;;  %v1334_v41 = vpop.f32.mrb[6].mxu1  ;;  %v959_v24 = vadd.s32 56, %v1560_v27 }
 0x108   : > { %v1296_v48 = vadd.f32 %v1295_v35, %v1294_v33  ;;  %v1335_v49 = vpop.f32.mrb[7].mxu1  ;;  %vm975_vm6 = vcmp.lt.s32.totalorder %v967_v28, 128 }
 0x109   : > { %v929_v42 = vadd.f32 %v1333_v40, %v1293_v32  ;;  %v1336_v43 = vadd.f32 %v1335_v49, %v1334_v41  ;;  %v968_v32 = vadd.s32 %v1697_v62, %v959_v24 }
 0x10b   : > { %v979_v54 = vsel %vm971_vm2, %v929_v42, 0.0  ;;  %v932_v44 = vadd.f32 %v1336_v43, %v1296_v48  ;;  %vm976_vm7 = vcmp.lt.s32.totalorder %v968_v32, 128 }
 0x10c   : > { %v986_v45 = vadd.f32 %v985_v25, %v979_v54  ;;  %v1001_v46 = vmul.f32 %v979_v54, %v979_v54 }
 0x10d   : > { %v980_v47 = vsel %vm972_vm3, %v932_v44, 0.0  ;;  %v1254_v50 = vpack.c.bf16 %v932_v44, %v929_v42 }
 0x10e   : > { %v1008_v51 = vadd.f32 %v1007_v31, %v1001_v46  ;;  %v987_v55 = vadd.f32 %v986_v45, %v980_v47  ;;  %v1002_v52 = vmul.f32 %v980_v47, %v980_v47  ;;  %v1297_v53 = vpop.f32.mrb[8].mxu0 }
 0x10f   : > { %1266 = vst [vmem:[%s1707_s13 + $0x8] sm:$0xff] %v1254_v50   ;;  %v1298_v56 = vpop.f32.mrb[9].mxu0 }
 0x110   : > { %v1009_v57 = vadd.f32 %v1008_v51, %v1002_v52  ;;  %v1299_v60 = vadd.f32 %v1298_v56, %v1297_v53  ;;  %v1300_v61 = vpop.f32.mrb[10].mxu0 }
 0x111   : > { %v1301_v1 = vpop.f32.mrb[11].mxu0  ;;  %v1337_v2 = vpop.f32.mrb[8].mxu1 }
 0x112   : > { %v1302_v3 = vadd.f32 %v1301_v1, %v1300_v61  ;;  %v1338_v4 = vpop.f32.mrb[9].mxu1 }
 0x113   : > { %v1339_v6 = vadd.f32 %v1338_v4, %v1337_v2  ;;  %v1340_v7 = vpop.f32.mrb[10].mxu1 }
 0x114   : > { %v1341_v63 = vpop.f32.mrb[11].mxu1 }
 0x115   : > { %v937_v8 = vadd.f32 %v1339_v6, %v1299_v60  ;;  %v1342_v9 = vadd.f32 %v1341_v63, %v1340_v7 }
 0x117   : > { %v981_v10 = vsel %vm973_vm4, %v937_v8, 0.0  ;;  %v940_v11 = vadd.f32 %v1342_v9, %v1302_v3 }
 0x118   : > { %v988_v12 = vadd.f32 %v987_v55, %v981_v10  ;;  %v1003_v13 = vmul.f32 %v981_v10, %v981_v10 }
 0x119   : > { %v982_v14 = vsel %vm974_vm5, %v940_v11, 0.0  ;;  %v1259_v15 = vpack.c.bf16 %v940_v11, %v937_v8 }
 0x11a   : > { %v1303_v16 = vpop.f32.mrb[12].mxu0  ;;  %v1010_v18 = vadd.f32 %v1009_v57, %v1003_v13  ;;  %v989_v19 = vadd.f32 %v988_v12, %v982_v14  ;;  %v1004_v20 = vmul.f32 %v982_v14, %v982_v14 }
 0x11b   : > { %v1304_v21 = vpop.f32.mrb[13].mxu0  ;;  %1267 = vst [vmem:[%s1707_s13 + $0x10] sm:$0xff] %v1259_v15  }
 0x11c   : > { %v1305_v22 = vadd.f32 %v1304_v21, %v1303_v16  ;;  %v1306_v23 = vpop.f32.mrb[14].mxu0  ;;  %v1011_v25 = vadd.f32 %v1010_v18, %v1004_v20 }
 0x11d   : > { %v1307_v26 = vpop.f32.mrb[15].mxu0 }
 0x11e   : > { %v1308_v29 = vadd.f32 %v1307_v26, %v1306_v23 }
 0x11f   : > { %v1343_v30 = vpop.f32.mrb[12].mxu1 }
 0x120   : > { %v1344_v31 = vpop.f32.mrb[13].mxu1 }
 0x121   : > { %v1345_v33 = vadd.f32 %v1344_v31, %v1343_v30  ;;  %v1346_v34 = vpop.f32.mrb[14].mxu1 }
 0x122   : > { %v1347_v35 = vpop.f32.mrb[15].mxu1 }
 0x123   : > { %v945_v36 = vadd.f32 %v1345_v33, %v1305_v22  ;;  %v1348_v48 = vadd.f32 %v1347_v35, %v1346_v34 }
 0x125   : > { %v983_v27 = vsel %vm975_vm6, %v945_v36, 0.0  ;;  %v948_v37 = vadd.f32 %v1348_v48, %v1308_v29 }
 0x126   : > { %v990_v38 = vadd.f32 %v989_v19, %v983_v27  ;;  %v1005_v39 = vmul.f32 %v983_v27, %v983_v27 }
 0x127   : > { %v984_v40 = vsel %vm976_vm7, %v948_v37, 0.0  ;;  %v1264_v41 = vpack.c.bf16 %v948_v37, %v945_v36 }
 0x128   : > { %v1012_v49 = vadd.f32 %v1011_v25, %v1005_v39  ;;  %v991_v42 = vadd.f32 %v990_v38, %v984_v40  ;;  %v1006_v43 = vmul.f32 %v984_v40, %v984_v40 }
 0x129   : > { %1268 = vst [vmem:[%s1707_s13 + $0x18] sm:$0xff] %v1264_v41  }
 0x12a   : > { %v992_v62 = vrot.slane %v991_v42, 4  ;;  %v1013_v54 = vadd.f32 %v1012_v49, %v1006_v43 }
 0x12c   : > { %v993_v44 = vadd.f32 %v992_v62, %v991_v42  ;;  %v1014_v45 = vrot.slane %v1013_v54, 4 }
 0x12e   : > { %v994_v46 = vrot.slane %v993_v44, 2  ;;  %v1015_v47 = vadd.f32 %v1014_v45, %v1013_v54 }
 0x130   : > { %v995_v50 = vadd.f32 %v994_v46, %v993_v44  ;;  %v1016_v58 = vrot.slane %v1015_v47, 2 }
 0x132   : > { %v996_v51 = vrot.slane %v995_v50, 1  ;;  %v1017_v55 = vadd.f32 %v1016_v58, %v1015_v47 }
 0x134   : > { %v997_v52 = vadd.f32 %v996_v51, %v995_v50  ;;  %v1018_v53 = vrot.slane %v1017_v55, 1 }
 0x136   : > { %998 = vst [vmem:[%s291_s16] sm:$0x1] %v997_v52  ;;  %v1019_v56 = vadd.f32 %v1018_v53, %v1017_v55 }
 0x138   : > { %1020 = vst [vmem:[%s291_s16 + $0x1] sm:$0x1] %v1019_v56 }
 0x139 PF: > { %s16_s20 = sadd.s32 1, %s1427_s20   ;;  %s1745_s18 = smov %s1423_s19 }
 0x13a   : > { %p13_p6 = scmp.ge.s32.totalorder %s16_s20, 4   ;;  %s1746_s19 = smov %s1748_s21 }
 0x13c   :  { %15 = sbr.rel (!%p13_p6) target bundleno = 2 (0x2), region = 83 }

// kernel: tile.43
= control target key start
LH: loop header
LB: loop body
LE: loop exit
PB: predicated region body
PF: predicated region fallthrough
CT: control target
= control target key end

     0   :  { %s28_s0 = inlined_call_operand.vmem [shape: f32[64], index: 0, kind: input, shape index: {}]   ;;  %s29_s1 = inlined_call_operand.vmem [shape: f32[16,64], index: 1, kind: output, shape index: {}]  }
   0x1   :  { %v4_v0 = vld [vmem:[%s28_s0] ss:$0 sm:$0xff] }
   0x2   :  { %5 = vst [vmem:[%s29_s1] sm:$0xff] %v4_v0  ;;  %8 = vst [vmem:[%s29_s1 + $0x8] sm:$0xff] %v4_v0 }

// kernel: tile.53
= control target key start
LH: loop header
LB: loop body
LE: loop exit
PB: predicated region body
PF: predicated region fallthrough
CT: control target
= control target key end

     0   :  { %s28_s0 = inlined_call_operand.vmem [shape: f32[128], index: 0, kind: input, shape index: {}]   ;;  %s29_s1 = inlined_call_operand.vmem [shape: f32[16,128], index: 1, kind: output, shape index: {}]  }
   0x1   :  { %v4_v0 = vld [vmem:[%s28_s0] ss:$0 sm:$0xff] }
   0x2   :  { %5 = vst [vmem:[%s29_s1] sm:$0xff] %v4_v0  ;;  %8 = vst [vmem:[%s29_s1 + $0x8] sm:$0xff] %v4_v0 }

// kernel: discriminator_forward.8
= control target key start
LH: loop header
LB: loop body
LE: loop exit
PB: predicated region body
PF: predicated region fallthrough
CT: control target
= control target key end

     0   :  { %s1647_s18 = smov 0   ;;  %s1649_s19 = smov 0   ;;  %s1934_s0 = inlined_call_operand.vmem [shape: bf16[32,1024], index: 0, kind: input, shape index: {}]   ;;  %s1935_s1 = inlined_call_operand.vmem [shape: bf16[1024,128], index: 1, kind: input, shape index: {}]   ;;  %s1936_s2 = inlined_call_operand.vmem [shape: f32[1,1024], index: 2, kind: input, shape index: {}]   ;;  %s1937_s3 = inlined_call_operand.vmem [shape: f32[1,1024], index: 3, kind: input, shape index: {}]   ;;  %s1938_s4 = inlined_call_operand.vmem [shape: bf16[32,128], index: 4, kind: output, shape index: {0}]   ;;  %s1939_s5 = inlined_call_operand.vmem [shape: f32[2,2,128], index: 5, kind: output, shape index: {1}]  }
   0x1   :  { %s1651_s20 = smov 0  }
   0x2 LB: > { %s28_s21 = sadd.s32 1, %s1611_s19  ;;  %p1333_p0 = scmp.ge.s32.totalorder %s1615_s20, 1  ;;  %s1615_s20 = sphi %s1651_s20, %s16_s20   ;;  %s1611_s19 = sphi %s1649_s19, %s1941_s19   ;;  %s1607_s18 = sphi %s1647_s18, %s1940_s18  }
   0x3   : > { %p30_p1 = scmp.ge.s32.totalorder %s28_s21, 2  ;;  %p222_p2 = scmp.lt.s32.totalorder %s1615_s20, 3 }
   0x5   : > { %s1943_s21 = smov (%p30_p1, %s28_s21), 0  ;;  %p223_p3 = pnand %p1333_p0, %p222_p2 }
   0x6   : > { %v1529_v0 = vld [vmem:[%s1935_s1 + $0x40] sm:$0xff] (!%p223_p3)   ;;  %v1533_v4 = vld [vmem:[%s1935_s1 + $0x48] sm:$0xff] (!%p223_p3)   ;;  %v1537_v8 = vld [vmem:[%s1935_s1 + $0x50] sm:$0xff] (!%p223_p3)   ;;  %s1334_s8 = sshll.u32 (!%p223_p3), %s1607_s18, 1  ;;  %v322_v22 = vlaneseq (!%p223_p3)  ;;  %s1340_s15 = sshll.u32 (!%p223_p3), %s1607_s18, 4 }
   0x7   : > { %226 = sbr.rel (%p223_p3) target bundleno = 311 (0x137), region = 36  ;;  %v1530_v1 = vld [vmem:[%s1935_s1 + $0xc0] sm:$0xff] (!%p223_p3)   ;;  %1417 = vmatprep.subr.bf16.mxu0 (!%p223_p3), %v1529_v0  ;;  %v1534_v5 = vld [vmem:[%s1935_s1 + $0xc8] sm:$0xff] (!%p223_p3)   ;;  %v1538_v9 = vld [vmem:[%s1935_s1 + $0xd0] sm:$0xff] (!%p223_p3)   ;;  %p266_p4 = scmp.lt.s32.totalorder (!%p223_p3), %s1334_s8, 3 }
   0x8   : > { %v1531_v2 = vld [vmem:[%s1935_s1] sm:$0xff] (!%p223_p3)   ;;  %1439 = vmatprep.subr.bf16.mxu1 (!%p223_p3), %v1530_v1  ;;  %v1535_v6 = vld [vmem:[%s1935_s1 + $0x8] sm:$0xff] (!%p223_p3)   ;;  %v1539_v10 = vld [vmem:[%s1935_s1 + $0x10] sm:$0xff] (!%p223_p3)   ;;  %v1748_v27 = vshrl.u32 (!%p223_p3), %v322_v22, 7  ;;  %p288_p5 = scmp.lt.s32.totalorder (!%p223_p3), %s1607_s18, 1 }
   0x9   : > { %v1532_v3 = vld [vmem:[%s1935_s1 + $0x80] sm:$0xff] (!%p223_p3)   ;;  %1418 = vmatpush3.bf16.msra.mxu0 (!%p223_p3), %v1531_v2  ;;  %v1536_v7 = vld [vmem:[%s1935_s1 + $0x88] sm:$0xff] (!%p223_p3)   ;;  %v1540_v11 = vld [vmem:[%s1935_s1 + $0x90] sm:$0xff] (!%p223_p3)  }
   0xa   : > { %1440 = vmatpush3.bf16.msra.mxu1 (!%p223_p3), %v1532_v3  ;;  %1419 = vmatprep.subr.bf16.mxu0 (!%p223_p3), %v1533_v4  ;;  %v1541_v12 = vld [vmem:[%s1935_s1 + $0x58] sm:$0xff] (!%p223_p3)   ;;  %v1545_v16 = vld [vmem:[%s1935_s1 + $0x60] sm:$0xff] (!%p223_p3)   ;;  %v1549_v20 = vld [vmem:[%s1935_s1 + $0x68] sm:$0xff] (!%p223_p3)   ;;  %v328_v33 = vsub.s32 (!%p223_p3), 1, %v1748_v27  ;;  %v336_v35 = vsub.s32 (!%p223_p3), 3, %v1748_v27  ;;  %v324_v39 = vsub.s32 (!%p223_p3), 0, %v1748_v27 }
   0xb   : > { %1441 = vmatprep.subr.bf16.mxu1 (!%p223_p3), %v1534_v5  ;;  %v1542_v13 = vld [vmem:[%s1935_s1 + $0xd8] sm:$0xff] (!%p223_p3)   ;;  %v1546_v17 = vld [vmem:[%s1935_s1 + $0xe0] sm:$0xff] (!%p223_p3)   ;;  %v1550_v21 = vld [vmem:[%s1935_s1 + $0xe8] sm:$0xff] (!%p223_p3)   ;;  %v332_v40 = vsub.s32 (!%p223_p3), 2, %v1748_v27 }
   0xc   : > { %v1543_v14 = vld [vmem:[%s1935_s1 + $0x18] sm:$0xff] (!%p223_p3)   ;;  %v1547_v18 = vld [vmem:[%s1935_s1 + $0x20] sm:$0xff] (!%p223_p3)   ;;  %v1551_v23 = vld [vmem:[%s1935_s1 + $0x28] sm:$0xff] (!%p223_p3)  }
   0xd   : > { %1420 = vmatpush3.bf16.msra.mxu0 (!%p223_p3), %v1535_v6  ;;  %v1544_v15 = vld [vmem:[%s1935_s1 + $0x98] sm:$0xff] (!%p223_p3)   ;;  %v1548_v19 = vld [vmem:[%s1935_s1 + $0xa0] sm:$0xff] (!%p223_p3)   ;;  %v1552_v24 = vld [vmem:[%s1935_s1 + $0xa8] sm:$0xff] (!%p223_p3)  }
   0xe   : > { %1442 = vmatpush3.bf16.msra.mxu1 %v1536_v7  ;;  %1421 = vmatprep.subr.bf16.mxu0 %v1537_v8  ;;  %s1945_s8 = smov (!%p266_p4, %s1334_s8), 3  ;;  %v1553_v25 = vld [vmem:[%s1935_s1 + $0x70] sm:$0xff]   ;;  %v1557_v30 = vld [vmem:[%s1935_s1 + $0x78] sm:$0xff]   ;;  %v1781_v38 = vld [vmem:[%s1936_s2] sm:$0xff]  ;;  %s1947_s18 = smov (!%p288_p5, %s1607_s18), 1 }
   0xf   : > { %1443 = vmatprep.subr.bf16.mxu1 %v1538_v9  ;;  %v1554_v26 = vld [vmem:[%s1935_s1 + $0xf0] sm:$0xff]   ;;  %s1409_s11 = sshll.u32 %s1945_s8, 5  ;;  %v1558_v31 = vld [vmem:[%s1935_s1 + $0xf8] sm:$0xff]   ;;  %v1788_v45 = vld [vmem:[%s1937_s3] sm:$0xff]  ;;  %v329_v48 = vrot.slane %v1781_v38, %v328_v33  ;;  %v337_v55 = vrot.slane %v1781_v38, %v336_v35  ;;  %v325_v60 = vrot.slane %v1781_v38, %v324_v39  ;;  %v333_v0 = vrot.slane %v1781_v38, %v332_v40  ;;  %s1338_s16 = sshll.u32 %s1945_s8, 2 }
  0x10   : > { %v1555_v28 = vld [vmem:[%s1935_s1 + $0x30] sm:$0xff]   ;;  %s1766_s24 = scalar_lea.vmem %s1934_s0, %s1409_s11  ;;  %v1559_v32 = vld [vmem:[%s1935_s1 + $0x38] sm:$0xff]   ;;  %v388_v49 = vrot.slane %v1788_v45, %v328_v33  ;;  %v1561_v52 = vld [vmem:[%s1935_s1 + $0x140] sm:$0xff]   ;;  %v396_v56 = vrot.slane %v1788_v45, %v336_v35  ;;  %v384_v61 = vrot.slane %v1788_v45, %v324_v39  ;;  %v392_v1 = vrot.slane %v1788_v45, %v332_v40  ;;  %s286_s23 = scalar_lea.vmem %s1938_s4, %s1338_s16 }
  0x11   : > { %1422 = vmatpush3.bf16.msra.mxu0 %v1539_v10  ;;  %v1556_v29 = vld [vmem:[%s1935_s1 + $0xb0] sm:$0xff]   ;;  %v1560_v34 = vld [vmem:[%s1935_s1 + $0xb8] sm:$0xff]   ;;  %v294_v36 = vld [vmem:[%s1766_s24] sm:$0xff]  ;;  %s1339_s8 = sshll.u32 %s1947_s18, 1 }
  0x12   : > { %1444 = vmatpush3.bf16.msra.mxu1 %v1540_v11  ;;  %1423 = vmatprep.subr.bf16.mxu0 %v1541_v12  ;;  %v298_v37 = vld [vmem:[%s1766_s24 + $0x20] sm:$0xff]  ;;  %v302_v41 = vunpack.c.l.bf16 %v294_v36  ;;  %v303_v42 = vunpack.c.h.bf16 %v294_v36  ;;  %v295_v46 = vld [vmem:[%s1766_s24 + $0x8] sm:$0xff]  ;;  %s291_s27 = scalar_lea.vmem %s1939_s5, %s1339_s8 }
  0x13   : > { %1445 = vmatprep.subr.bf16.mxu1 %v1542_v13  ;;  %v310_v43 = vunpack.c.l.bf16 %v298_v37  ;;  %v311_v44 = vunpack.c.h.bf16 %v298_v37  ;;  %v299_v47 = vld [vmem:[%s1766_s24 + $0x28] sm:$0xff]  ;;  %v304_v50 = vunpack.c.l.bf16 %v295_v46  ;;  %v305_v51 = vunpack.c.h.bf16 %v295_v46  ;;  %v1562_v57 = vld [vmem:[%s1935_s1 + $0x1c0] sm:$0xff]   ;;  %v1572_v46 = vld [vmem:[%s1935_s1 + $0x190] sm:$0xff]  }
  0x14   : > { %v312_v53 = vunpack.c.l.bf16 %v299_v47  ;;  %v313_v54 = vunpack.c.h.bf16 %v299_v47  ;;  %v363_v58 = vmul.f32 %v329_v48, %v303_v42  ;;  %v362_v4 = vmul.f32 %v325_v60, %v302_v41  ;;  %v1564_v33 = vld [vmem:[%s1935_s1 + $0x180] sm:$0xff]   ;;  %v1565_v35 = vld [vmem:[%s1935_s1 + $0x148] sm:$0xff]   ;;  %v1569_v42 = vld [vmem:[%s1935_s1 + $0x150] sm:$0xff]  }
  0x15   : > { %1424 = vmatpush3.bf16.msra.mxu0 %v1543_v14  ;;  %v371_v59 = vmul.f32 %v329_v48, %v311_v44  ;;  %v365_v62 = vmul.f32 %v337_v55, %v305_v51  ;;  %v370_v5 = vmul.f32 %v325_v60, %v310_v43  ;;  %v364_v8 = vmul.f32 %v333_v0, %v304_v50  ;;  %v1566_v37 = vld [vmem:[%s1935_s1 + $0x1c8] sm:$0xff]   ;;  %v1570_v43 = vld [vmem:[%s1935_s1 + $0x1d0] sm:$0xff]   ;;  %v1573_v47 = vld [vmem:[%s1935_s1 + $0x158] sm:$0xff]  }
  0x16   : > { %1446 = vmatpush3.bf16.msra.mxu1 %v1544_v15  ;;  %1425 = vmatprep.subr.bf16.mxu0 %v1545_v16  ;;  %v373_v63 = vmul.f32 %v337_v55, %v313_v54  ;;  %v422_v2 = vadd.f32 %v388_v49, %v363_v58  ;;  %v372_v9 = vmul.f32 %v333_v0, %v312_v53  ;;  %v1567_v40 = vld [vmem:[%s1935_s1 + $0x108] sm:$0xff]   ;;  %v1571_v44 = vld [vmem:[%s1935_s1 + $0x110] sm:$0xff]   ;;  %v1574_v48 = vld [vmem:[%s1935_s1 + $0x1d8] sm:$0xff]   ;;  %v344_v54 = vsub.s32 5, %v1748_v27 }
  0x17   : > { %1447 = vmatprep.subr.bf16.mxu1 %v1546_v17  ;;  %v430_v3 = vadd.f32 %v388_v49, %v371_v59  ;;  %v424_v6 = vadd.f32 %v396_v56, %v365_v62  ;;  %v421_v16 = vadd.f32 %v384_v61, %v362_v4  ;;  %v429_v17 = vadd.f32 %v384_v61, %v370_v5  ;;  %v1568_v41 = vld [vmem:[%s1935_s1 + $0x188] sm:$0xff]   ;;  %v1575_v49 = vld [vmem:[%s1935_s1 + $0x118] sm:$0xff]   ;;  %v1577_v51 = vld [vmem:[%s1935_s1 + $0x160] sm:$0xff]  }
  0x18   : > { %v432_v7 = vadd.f32 %v396_v56, %v373_v63  ;;  %vm438_vm0 = vcmp.gt.f32.partialorder %v422_v2, 0.0  ;;  %v454_v10 = vmul.f32 0.2, %v422_v2  ;;  %v1576_v50 = vld [vmem:[%s1935_s1 + $0x198] sm:$0xff]   ;;  %v1579_v53 = vld [vmem:[%s1935_s1 + $0x120] sm:$0xff]   ;;  %v352_v56 = vsub.s32 7, %v1748_v27 }
  0x19   : > { %1426 = vmatpush3.bf16.msra.mxu0 %v1547_v18  ;;  %vm446_vm1 = vcmp.gt.f32.partialorder %v430_v3, 0.0  ;;  %v462_v11 = vmul.f32 0.2, %v430_v3  ;;  %vm440_vm2 = vcmp.gt.f32.partialorder %v424_v6, 0.0  ;;  %v456_v12 = vmul.f32 0.2, %v424_v6 }
  0x1a   : > { %1448 = vmatpush3.bf16.msra.mxu1 %v1548_v19  ;;  %1427 = vmatprep.subr.bf16.mxu0 %v1549_v20  ;;  %vm448_vm3 = vcmp.gt.f32.partialorder %v432_v7, 0.0  ;;  %v464_v13 = vmul.f32 0.2, %v432_v7  ;;  %v470_v14 = vsel %vm438_vm0, %v422_v2, %v454_v10  ;;  %vm437_vm4 = vcmp.gt.f32.partialorder %v421_v16, 0.0  ;;  %v1580_v55 = vld [vmem:[%s1935_s1 + $0x1a0] sm:$0xff]   ;;  %v1582_v59 = vld [vmem:[%s1935_s1 + $0x1e8] sm:$0xff]  }
  0x1b   : > { %1449 = vmatprep.subr.bf16.mxu1 %v1550_v21  ;;  %v478_v15 = vsel %vm446_vm1, %v430_v3, %v462_v11  ;;  %v472_v19 = vsel %vm440_vm2, %v424_v6, %v456_v12  ;;  %v423_v21 = vadd.f32 %v392_v1, %v364_v8  ;;  %vm445_vm5 = vcmp.gt.f32.partialorder %v429_v17, 0.0  ;;  %v1583_v61 = vld [vmem:[%s1935_s1 + $0x128] sm:$0xff]   ;;  %v1585_v63 = vld [vmem:[%s1935_s1 + $0x170] sm:$0xff]   ;;  %v297_v11 = vld [vmem:[%s1766_s24 + $0x18] sm:$0xff] }
  0x1c   : > { %v486_v18 = vpack.c.bf16 %v478_v15, %v470_v14  ;;  %v480_v20 = vsel %vm448_vm3, %v432_v7, %v464_v13  ;;  %v340_v58 = vsub.s32 4, %v1748_v27  ;;  %v348_v60 = vsub.s32 6, %v1748_v27  ;;  %v1584_v62 = vld [vmem:[%s1935_s1 + $0x1a8] sm:$0xff]   ;;  %v1586_v2 = vld [vmem:[%s1935_s1 + $0x1f0] sm:$0xff]   ;;  %v301_v12 = vld [vmem:[%s1766_s24 + $0x38] sm:$0xff] }
  0x1d   : > { %1428 = vmatpush3.bf16.msra.mxu0 %v1551_v23  ;;  %v488_v22 = vpack.c.bf16 %v480_v20, %v472_v19  ;;  %v453_v23 = vmul.f32 0.2, %v421_v16  ;;  %vm439_vm6 = vcmp.gt.f32.partialorder %v423_v21, 0.0  ;;  %v345_v0 = vrot.slane %v1781_v38, %v344_v54  ;;  %v296_v3 = vld [vmem:[%s1766_s24 + $0x10] sm:$0xff] }
  0x1e   : > { %1450 = vmatpush3.bf16.msra.mxu1 %v1552_v24  ;;  %1429 = vmatprep.subr.bf16.mxu0 %v1553_v25  ;;  %v461_v24 = vmul.f32 0.2, %v429_v17  ;;  %v431_v25 = vadd.f32 %v392_v1, %v372_v9  ;;  %v341_v1 = vrot.slane %v1781_v38, %v340_v58  ;;  %v404_v4 = vrot.slane %v1788_v45, %v344_v54  ;;  %v300_v8 = vld [vmem:[%s1766_s24 + $0x30] sm:$0xff] }
  0x1f   : > { %1451 = vmatprep.subr.bf16.mxu1 %v1554_v26  ;;  %1037 = vmatprep.mubr.bf16.mxu0 %v486_v18  ;;  %v455_v26 = vmul.f32 0.2, %v423_v21  ;;  %v353_v5 = vrot.slane %v1781_v38, %v352_v56  ;;  %v412_v6 = vrot.slane %v1788_v45, %v352_v56  ;;  %v349_v7 = vrot.slane %v1781_v38, %v348_v60  ;;  %v1587_v15 = vld [vmem:[%s1935_s1 + $0x130] sm:$0xff]   ;;  %v1589_v38 = vld [vmem:[%s1935_s1 + $0x178] sm:$0xff]  }
  0x20   : > { %1078 = vmatprep.mubr.bf16.mxu1 %v488_v22  ;;  %vm447_vm7 = vcmp.gt.f32.partialorder %v431_v25, 0.0  ;;  %v306_v9 = vunpack.c.l.bf16 %v296_v3  ;;  %v307_v10 = vunpack.c.h.bf16 %v296_v3  ;;  %v400_v13 = vrot.slane %v1788_v45, %v340_v58 }
  0x21   : > { %1430 = vmatpush3.bf16.msra.mxu0 %v1555_v28  ;;  %v1563_v28 = vld [vmem:[%s1935_s1 + $0x100] sm:$0xff]   ;;  %v408_v14 = vrot.slane %v1788_v45, %v348_v60  ;;  %v308_v18 = vunpack.c.l.bf16 %v297_v11  ;;  %v309_v19 = vunpack.c.h.bf16 %v297_v11  ;;  %v317_v22 = vunpack.c.h.bf16 %v301_v12  ;;  %v1588_v45 = vld [vmem:[%s1935_s1 + $0x1b0] sm:$0xff]  }
  0x22   : > { %1452 = vmatpush3.bf16.msra.mxu1 %v1556_v29  ;;  %1431 = vmatprep.subr.bf16.mxu0 %v1557_v30  ;;  %v469_v29 = vsel %vm437_vm4, %v421_v16, %v453_v23  ;;  %v477_v30 = vsel %vm445_vm5, %v429_v17, %v461_v24  ;;  %v314_v16 = vunpack.c.l.bf16 %v300_v8  ;;  %v315_v17 = vunpack.c.h.bf16 %v300_v8 }
  0x23   : > { %1453 = vmatprep.subr.bf16.mxu1 %v1558_v31  ;;  %v463_v31 = vmul.f32 0.2, %v431_v25  ;;  %v367_v20 = vmul.f32 %v345_v0, %v307_v10  ;;  %v366_v23 = vmul.f32 %v341_v1, %v306_v9 }
  0x24   : > { %v375_v24 = vmul.f32 %v345_v0, %v315_v17 }
  0x25   : > { %1432 = vmatpush3.bf16.msra.mxu0 %v1559_v32  ;;  %v471_v32 = vsel %vm439_vm6, %v423_v21, %v455_v26  ;;  %v479_v36 = vsel %vm447_vm7, %v431_v25, %v463_v31  ;;  %v316_v21 = vunpack.c.l.bf16 %v301_v12  ;;  %v369_v25 = vmul.f32 %v353_v5, %v309_v19 }
  0x26   : > { %1454 = vmatpush3.bf16.msra.mxu1 %v1560_v34  ;;  %1461 = vmatprep.subr.bf16.mxu0 %v1561_v52  ;;  %v485_v34 = vpack.c.bf16 %v477_v30, %v469_v29  ;;  %v487_v39 = vpack.c.bf16 %v479_v36, %v471_v32  ;;  %v1578_v52 = vld [vmem:[%s1935_s1 + $0x1e0] sm:$0xff]   ;;  %v374_v26 = vmul.f32 %v341_v1, %v314_v16  ;;  %v1590_v29 = vld [vmem:[%s1935_s1 + $0x1f8] sm:$0xff]   ;;  %v1171_v16 = vadd.s32 8, %v1748_v27 }
  0x27   : > { %1483 = vmatprep.subr.bf16.mxu1 %v1562_v57  ;;  %v1581_v57 = vld [vmem:[%s1935_s1 + $0x168] sm:$0xff]   ;;  %v426_v30 = vadd.f32 %v404_v4, %v367_v20  ;;  %v377_v31 = vmul.f32 %v353_v5, %v317_v22  ;;  %v425_v32 = vadd.f32 %v400_v13, %v366_v23  ;;  %v428_v36 = vadd.f32 %v412_v6, %v369_v25 }
  0x28   : > { %1038 = vmatmul.mubr.bf16.vlgmr.msra.gmra.mrb[0].mxu0 %v485_v34  ;;  %v1591_v34 = vld [vmem:[%s1935_s1 + $0x138] sm:$0xff]  }
  0x29   : > { %1462 = vmatpush3.bf16.msra.mxu0 %v1563_v28  ;;  %1079 = vmatmul.mubr.bf16.vlgmr.msra.gmra.mrb[0].mxu1 %v487_v39  ;;  %v368_v28 = vmul.f32 %v349_v7, %v308_v18  ;;  %vm442_vm8 = vcmp.gt.f32.partialorder %v426_v30, 0.0  ;;  %vm441_vm9 = vcmp.gt.f32.partialorder %v425_v32, 0.0  ;;  %vm444_vm11 = vcmp.gt.f32.partialorder %v428_v36, 0.0 }
  0x2a   : > { %1463 = vmatprep.subr.bf16.mxu0 %v1565_v35  ;;  %1484 = vmatpush3.bf16.msra.mxu1 %v1564_v33  ;;  %v376_v33 = vmul.f32 %v349_v7, %v316_v21  ;;  %v434_v35 = vadd.f32 %v404_v4, %v375_v24 }
  0x2b   : > { %1485 = vmatprep.subr.bf16.mxu1 %v1566_v37  ;;  %v433_v37 = vadd.f32 %v400_v13, %v374_v26  ;;  %v427_v39 = vadd.f32 %v408_v14, %v368_v28 }
  0x2c   : > { %vm450_vm10 = vcmp.gt.f32.partialorder %v434_v35, 0.0  ;;  %v435_v54 = vadd.f32 %v408_v14, %v376_v33  ;;  %v1172_v14 = vstv %s1340_s15 }
  0x2d   : > { %1464 = vmatpush3.bf16.msra.mxu0 %v1567_v40  ;;  %v1592_v40 = vld [vmem:[%s1935_s1 + $0x1b8] sm:$0xff]   ;;  %vm449_vm13 = vcmp.gt.f32.partialorder %v433_v37, 0.0  ;;  %vm443_vm14 = vcmp.gt.f32.partialorder %v427_v39, 0.0  ;;  %v459_v58 = vmul.f32 0.2, %v427_v39  ;;  %v1173_v19 = vadd.s32 %v1172_v14, %v1748_v27 }
  0x2e   : > { %1465 = vmatprep.subr.bf16.mxu0 %v1569_v42  ;;  %1486 = vmatpush3.bf16.msra.mxu1 %v1568_v41  ;;  %v458_v41 = vmul.f32 0.2, %v426_v30  ;;  %v436_v42 = vadd.f32 %v412_v6, %v377_v31  ;;  %vm451_vm15 = vcmp.gt.f32.partialorder %v435_v54, 0.0  ;;  %v467_v60 = vmul.f32 0.2, %v435_v54 }
  0x2f   : > { %1487 = vmatprep.subr.bf16.mxu1 %v1570_v43  ;;  %v466_v43 = vmul.f32 0.2, %v434_v35  ;;  %v1174_v24 = vadd.s32 %v1172_v14, %v1171_v16  ;;  %vm1175_vm0 = vcmp.lt.s32.totalorder %v1173_v19, 32 }
  0x30   : > { %vm452_vm12 = vcmp.gt.f32.partialorder %v436_v42, 0.0 }
  0x31   : > { %1466 = vmatpush3.bf16.msra.mxu0 %v1571_v44  ;;  %v460_v44 = vmul.f32 0.2, %v428_v36  ;;  %vm1176_vm1 = vcmp.lt.s32.totalorder %v1174_v24, 32 }
  0x32   : > { %1467 = vmatprep.subr.bf16.mxu0 %v1573_v47  ;;  %1488 = vmatpush3.bf16.msra.mxu1 %v1572_v46  ;;  %v474_v46 = vsel %vm442_vm8, %v426_v30, %v458_v41  ;;  %v468_v47 = vmul.f32 0.2, %v436_v42 }
  0x33   : > { %1489 = vmatprep.subr.bf16.mxu1 %v1574_v48  ;;  %v482_v48 = vsel %vm450_vm10, %v434_v35, %v466_v43 }
  0x35   : > { %1468 = vmatpush3.bf16.msra.mxu0 %v1575_v49  ;;  %v476_v49 = vsel %vm444_vm11, %v428_v36, %v460_v44 }
  0x36   : > { %1469 = vmatprep.subr.bf16.mxu0 %v1577_v51  ;;  %1490 = vmatpush3.bf16.msra.mxu1 %v1576_v50  ;;  %v457_v50 = vmul.f32 0.2, %v425_v32  ;;  %v465_v51 = vmul.f32 0.2, %v433_v37 }
  0x37   : > { %1491 = vmatprep.subr.bf16.mxu1 %v1578_v52  ;;  %v490_v52 = vpack.c.bf16 %v482_v48, %v474_v46 }
  0x38   : > { %v473_v56 = vsel %vm441_vm9, %v425_v32, %v457_v50 }
  0x39   : > { %1470 = vmatpush3.bf16.msra.mxu0 %v1579_v53  ;;  %v484_v53 = vsel %vm452_vm12, %v436_v42, %v468_v47  ;;  %1119 = vmatprep.mubr.bf16.mxu0 %v490_v52 }
  0x3a   : > { %1471 = vmatprep.subr.bf16.mxu0 %v1581_v57  ;;  %1492 = vmatpush3.bf16.msra.mxu1 %v1580_v55  ;;  %v492_v55 = vpack.c.bf16 %v484_v53, %v476_v49  ;;  %v481_v57 = vsel %vm449_vm13, %v433_v37, %v465_v51 }
  0x3b   : > { %1493 = vmatprep.subr.bf16.mxu1 %v1582_v59  ;;  %v489_v59 = vpack.c.bf16 %v481_v57, %v473_v56 }
  0x3c   : > { %1160 = vmatprep.mubr.bf16.mxu1 %v492_v55 }
  0x3d   : > { %1472 = vmatpush3.bf16.msra.mxu0 %v1583_v61  ;;  %v475_v61 = vsel %vm443_vm14, %v427_v39, %v459_v58 }
  0x3e   : > { %1473 = vmatprep.subr.bf16.mxu0 %v1585_v63  ;;  %1494 = vmatpush3.bf16.msra.mxu1 %v1584_v62  ;;  %v483_v62 = vsel %vm451_vm15, %v435_v54, %v467_v60 }
  0x3f   : > { %1495 = vmatprep.subr.bf16.mxu1 %v1586_v2  ;;  %v491_v63 = vpack.c.bf16 %v483_v62, %v475_v61 }
  0x41   : > { %1474 = vmatpush3.bf16.msra.mxu0 %v1587_v15 }
  0x42   : > { %1475 = vmatprep.subr.bf16.mxu0 %v1589_v38  ;;  %1496 = vmatpush3.bf16.msra.mxu1 %v1588_v45 }
  0x43   : > { %1497 = vmatprep.subr.bf16.mxu1 %v1590_v29 }
  0x45   : > { %1476 = vmatpush3.bf16.msra.mxu0 %v1591_v34 }
  0x46   : > { %1498 = vmatpush3.bf16.msra.mxu1 %v1592_v40 }
  0x48   : > { %1120 = vmatmul.mubr.bf16.vlgmr.msra.gmra.mrb[4].mxu0 %v489_v59 }
  0x49   : > { %1161 = vmatmul.mubr.bf16.vlgmr.msra.gmra.mrb[4].mxu1 %v491_v63 }
  0xfb   : > { %v1433_v0 = vpop.f32.mrb[0].mxu0 }
  0xfc   : > { %v1434_v1 = vpop.f32.mrb[1].mxu0  ;;  %v1455_v2 = vpop.f32.mrb[0].mxu1 }
  0xfd   : > { %v1435_v3 = vadd.f32 %v1434_v1, %v1433_v0  ;;  %v1436_v4 = vpop.f32.mrb[2].mxu0  ;;  %v1456_v5 = vpop.f32.mrb[1].mxu1 }
  0xfe   : > { %v1437_v6 = vpop.f32.mrb[3].mxu0  ;;  %v1457_v7 = vadd.f32 %v1456_v5, %v1455_v2  ;;  %v1458_v8 = vpop.f32.mrb[2].mxu1 }
  0xff   : > { %v1438_v9 = vadd.f32 %v1437_v6, %v1436_v4  ;;  %v1459_v10 = vpop.f32.mrb[3].mxu1 }
 0x100   : > { %v1081_v11 = vadd.f32 %v1457_v7, %v1435_v3  ;;  %v1460_v12 = vadd.f32 %v1459_v10, %v1458_v8 }
 0x102   : > { %v1084_v13 = vadd.f32 %v1460_v12, %v1438_v9 }
 0x11b   : > { %v1477_v15 = vpop.f32.mrb[4].mxu0 }
 0x11c   : > { %v1478_v17 = vpop.f32.mrb[5].mxu0  ;;  %v1499_v20 = vpop.f32.mrb[4].mxu1 }
 0x11d   : > { %v1479_v18 = vadd.f32 %v1478_v17, %v1477_v15  ;;  %v1480_v38 = vpop.f32.mrb[6].mxu0  ;;  %v1500_v23 = vpop.f32.mrb[5].mxu1 }
 0x11e   : > { %v1481_v21 = vpop.f32.mrb[7].mxu0  ;;  %v1501_v25 = vadd.f32 %v1500_v23, %v1499_v20  ;;  %v1502_v26 = vpop.f32.mrb[6].mxu1 }
 0x11f   : > { %v1122_v22 = vadd.f32 %v1479_v18, %v1081_v11  ;;  %v1482_v45 = vadd.f32 %v1481_v21, %v1480_v38  ;;  %v1503_v29 = vpop.f32.mrb[7].mxu1 }
 0x120   : > { %v1504_v31 = vadd.f32 %v1503_v29, %v1502_v26 }
 0x121   : > { %v1125_v28 = vadd.f32 %v1482_v45, %v1084_v13  ;;  %v1163_v30 = vadd.f32 %v1501_v25, %v1122_v22 }
 0x123   : > { %v1177_v32 = vsel %vm1175_vm0, %v1163_v30, 0.0  ;;  %v1166_v27 = vadd.f32 %v1504_v31, %v1125_v28 }
 0x124   : > { %v1187_v35 = vmul.f32 %v1177_v32, %v1177_v32 }
 0x125   : > { %v1178_v33 = vsel %vm1176_vm1, %v1166_v27, 0.0  ;;  %v1415_v34 = vpack.c.bf16 %v1166_v27, %v1163_v30 }
 0x126   : > { %v1179_v36 = vadd.f32 %v1178_v33, %v1177_v32  ;;  %v1188_v37 = vmul.f32 %v1178_v33, %v1178_v33 }
 0x127   : > { %1416 = vst [vmem:[%s286_s23] sm:$0xff] %v1415_v34  }
 0x128   : > { %v1180_v39 = vrot.slane %v1179_v36, 4  ;;  %v1189_v40 = vadd.f32 %v1188_v37, %v1187_v35 }
 0x12a   : > { %v1181_v41 = vadd.f32 %v1180_v39, %v1179_v36  ;;  %v1190_v42 = vrot.slane %v1189_v40, 4 }
 0x12c   : > { %v1182_v43 = vrot.slane %v1181_v41, 2  ;;  %v1191_v44 = vadd.f32 %v1190_v42, %v1189_v40 }
 0x12e   : > { %v1183_v46 = vadd.f32 %v1182_v43, %v1181_v41  ;;  %v1192_v47 = vrot.slane %v1191_v44, 2 }
 0x130   : > { %v1184_v48 = vrot.slane %v1183_v46, 1  ;;  %v1193_v49 = vadd.f32 %v1192_v47, %v1191_v44 }
 0x132   : > { %v1185_v50 = vadd.f32 %v1184_v48, %v1183_v46  ;;  %v1194_v51 = vrot.slane %v1193_v49, 1 }
 0x134   : > { %1186 = vst [vmem:[%s291_s27] sm:$0x1] %v1185_v50  ;;  %v1195_v52 = vadd.f32 %v1194_v51, %v1193_v49 }
 0x136   : > { %1196 = vst [vmem:[%s291_s27 + $0x1] sm:$0x1] %v1195_v52 }
 0x137 PF: > { %s16_s20 = sadd.s32 1, %s1615_s20   ;;  %s1940_s18 = smov %s1611_s19 }
 0x138   : > { %p13_p6 = scmp.ge.s32.totalorder %s16_s20, 4   ;;  %s1941_s19 = smov %s1943_s21 }
 0x13a   :  { %15 = sbr.rel (!%p13_p6) target bundleno = 2 (0x2), region = 83 }

// kernel: discriminator_forward.9
= control target key start
LH: loop header
LB: loop body
LE: loop exit
PB: predicated region body
PF: predicated region fallthrough
CT: control target
= control target key end

     0   :  { %v48_v21 = vlaneseq  ;;  %s2688_s1 = inlined_call_operand.vmem [shape: bf16[2048,128], index: 1, kind: input, shape index: {}]   ;;  %s2689_s0 = inlined_call_operand.vmem [shape: bf16[8,2048], index: 0, kind: input, shape index: {}]   ;;  %s2690_s2 = inlined_call_operand.vmem [shape: f32[1,2048], index: 2, kind: input, shape index: {}]   ;;  %s2691_s3 = inlined_call_operand.vmem [shape: f32[1,2048], index: 3, kind: input, shape index: {}]   ;;  %s2692_s4 = inlined_call_operand.vmem [shape: f32[8,128], index: 4, kind: output, shape index: {}]  }
   0x1   :  { %v1972_v0 = vld [vmem:[%s2688_s1 + $0x40] sm:$0xff]   ;;  %v1976_v4 = vld [vmem:[%s2688_s1 + $0x48] sm:$0xff]   ;;  %v1980_v8 = vld [vmem:[%s2688_s1 + $0x50] sm:$0xff]  }
   0x2   :  { %v1973_v1 = vld [vmem:[%s2688_s1 + $0xc0] sm:$0xff]   ;;  %1796 = vmatprep.subr.bf16.mxu0 %v1972_v0  ;;  %v1977_v5 = vld [vmem:[%s2688_s1 + $0xc8] sm:$0xff]   ;;  %v1981_v9 = vld [vmem:[%s2688_s1 + $0xd0] sm:$0xff]   ;;  %v49_v26 = vshrl.u32 %v48_v21, 7 }
   0x3   :  { %v1974_v2 = vld [vmem:[%s2688_s1] sm:$0xff]   ;;  %1818 = vmatprep.subr.bf16.mxu1 %v1973_v1  ;;  %v1978_v6 = vld [vmem:[%s2688_s1 + $0x8] sm:$0xff]   ;;  %v1982_v10 = vld [vmem:[%s2688_s1 + $0x10] sm:$0xff]  }
   0x4   :  { %v1975_v3 = vld [vmem:[%s2688_s1 + $0x80] sm:$0xff]   ;;  %1797 = vmatpush3.bf16.msra.mxu0 %v1974_v2  ;;  %v1979_v7 = vld [vmem:[%s2688_s1 + $0x88] sm:$0xff]   ;;  %v1983_v11 = vld [vmem:[%s2688_s1 + $0x90] sm:$0xff]   ;;  %v2216_v31 = vsub.s32 1, %v49_v26  ;;  %v2221_v33 = vsub.s32 3, %v49_v26  ;;  %v2226_v35 = vsub.s32 0, %v49_v26 }
   0x5   :  { %1819 = vmatpush3.bf16.msra.mxu1 %v1975_v3  ;;  %1798 = vmatprep.subr.bf16.mxu0 %v1976_v4  ;;  %v1984_v12 = vld [vmem:[%s2688_s1 + $0x58] sm:$0xff]   ;;  %v1988_v16 = vld [vmem:[%s2688_s1 + $0x60] sm:$0xff]   ;;  %v1992_v20 = vld [vmem:[%s2688_s1 + $0x68] sm:$0xff]   ;;  %v2231_v37 = vsub.s32 2, %v49_v26  ;;  %v2271_v58 = vsub.s32 5, %v49_v26  ;;  %v2273_v62 = vsub.s32 7, %v49_v26 }
   0x6   :  { %1820 = vmatprep.subr.bf16.mxu1 %v1977_v5  ;;  %v1985_v13 = vld [vmem:[%s2688_s1 + $0xd8] sm:$0xff]   ;;  %v1989_v17 = vld [vmem:[%s2688_s1 + $0xe0] sm:$0xff]   ;;  %v1993_v22 = vld [vmem:[%s2688_s1 + $0xe8] sm:$0xff]   ;;  %v2275_v0 = vsub.s32 4, %v49_v26  ;;  %v2277_v1 = vsub.s32 6, %v49_v26 }
   0x7   :  { %v1986_v14 = vld [vmem:[%s2688_s1 + $0x18] sm:$0xff]   ;;  %v1990_v18 = vld [vmem:[%s2688_s1 + $0x20] sm:$0xff]   ;;  %v1994_v23 = vld [vmem:[%s2688_s1 + $0x28] sm:$0xff]  }
   0x8   :  { %1799 = vmatpush3.bf16.msra.mxu0 %v1978_v6  ;;  %v1987_v15 = vld [vmem:[%s2688_s1 + $0x98] sm:$0xff]   ;;  %v1991_v19 = vld [vmem:[%s2688_s1 + $0xa0] sm:$0xff]   ;;  %v1995_v24 = vld [vmem:[%s2688_s1 + $0xa8] sm:$0xff]  }
   0x9   :  { %1821 = vmatpush3.bf16.msra.mxu1 %v1979_v7  ;;  %1800 = vmatprep.subr.bf16.mxu0 %v1980_v8  ;;  %v1996_v25 = vld [vmem:[%s2688_s1 + $0x70] sm:$0xff]   ;;  %v2000_v30 = vld [vmem:[%s2688_s1 + $0x78] sm:$0xff]   ;;  %v18_v38 = vld [vmem:[%s2689_s0] sm:$0xff] }
   0xa   :  { %1822 = vmatprep.subr.bf16.mxu1 %v1981_v9  ;;  %v1997_v27 = vld [vmem:[%s2688_s1 + $0xf0] sm:$0xff]   ;;  %v2001_v32 = vld [vmem:[%s2688_s1 + $0xf8] sm:$0xff]   ;;  %v2239_v39 = vld [vmem:[%s2690_s2] sm:$0xff]  ;;  %v26_v40 = vunpack.c.l.bf16 %v18_v38  ;;  %v27_v41 = vunpack.c.h.bf16 %v18_v38 }
   0xb   :  { %v1998_v28 = vld [vmem:[%s2688_s1 + $0x30] sm:$0xff]   ;;  %v2002_v34 = vld [vmem:[%s2688_s1 + $0x38] sm:$0xff]   ;;  %v55_v42 = vrot.slane %v2239_v39, %v2216_v31  ;;  %v2246_v43 = vld [vmem:[%s2691_s3] sm:$0xff]  ;;  %v63_v45 = vrot.slane %v2239_v39, %v2221_v33  ;;  %v51_v52 = vrot.slane %v2239_v39, %v2226_v35  ;;  %v59_v54 = vrot.slane %v2239_v39, %v2231_v37 }
   0xc   :  { %1801 = vmatpush3.bf16.msra.mxu0 %v1982_v10  ;;  %v1999_v29 = vld [vmem:[%s2688_s1 + $0xb0] sm:$0xff]   ;;  %v2003_v36 = vld [vmem:[%s2688_s1 + $0xb8] sm:$0xff]   ;;  %v19_v44 = vld [vmem:[%s2689_s0 + $0x8] sm:$0xff]  ;;  %v156_v46 = vrot.slane %v2246_v43, %v2216_v31  ;;  %v164_v49 = vrot.slane %v2246_v43, %v2221_v33  ;;  %v152_v53 = vrot.slane %v2246_v43, %v2226_v35  ;;  %v160_v57 = vrot.slane %v2246_v43, %v2231_v37 }
   0xd   :  { %1823 = vmatpush3.bf16.msra.mxu1 %v1983_v11  ;;  %1802 = vmatprep.subr.bf16.mxu0 %v1984_v12  ;;  %v28_v47 = vunpack.c.l.bf16 %v19_v44  ;;  %v29_v48 = vunpack.c.h.bf16 %v19_v44  ;;  %v2004_v50 = vld [vmem:[%s2688_s1 + $0x140] sm:$0xff]   ;;  %v129_v51 = vmul.f32 %v55_v42, %v27_v41  ;;  %v128_v60 = vmul.f32 %v51_v52, %v26_v40  ;;  %v2282_v2 = vld [vmem:[%s2690_s2 + $0x8] sm:$0xff]  ;;  %v2012_v41 = vld [vmem:[%s2688_s1 + $0x150] sm:$0xff]  }
   0xe   :  { %1824 = vmatprep.subr.bf16.mxu1 %v1985_v13  ;;  %v2005_v55 = vld [vmem:[%s2688_s1 + $0x1c0] sm:$0xff]   ;;  %v2287_v6 = vld [vmem:[%s2691_s3 + $0x8] sm:$0xff]  ;;  %v111_v38 = vrot.slane %v2282_v2, %v2273_v62  ;;  %v99_v42 = vrot.slane %v2282_v2, %v2275_v0  ;;  %v2018_v52 = vld [vmem:[%s2688_s1 + $0x118] sm:$0xff]  }
   0xf   :  { %v131_v56 = vmul.f32 %v63_v45, %v29_v48  ;;  %v230_v59 = vadd.f32 %v156_v46, %v129_v51  ;;  %v130_v61 = vmul.f32 %v59_v54, %v28_v47  ;;  %v229_v4 = vadd.f32 %v152_v53, %v128_v60  ;;  %v2006_v10 = vld [vmem:[%s2688_s1 + $0x100] sm:$0xff]   ;;  %v2013_v46 = vld [vmem:[%s2688_s1 + $0x1d0] sm:$0xff]   ;;  %v2017_v51 = vld [vmem:[%s2688_s1 + $0x1d8] sm:$0xff]  }
  0x10   :  { %1803 = vmatpush3.bf16.msra.mxu0 %v1986_v14  ;;  %v2007_v14 = vld [vmem:[%s2688_s1 + $0x180] sm:$0xff]   ;;  %v212_v40 = vrot.slane %v2287_v6, %v2273_v62  ;;  %v200_v44 = vrot.slane %v2287_v6, %v2275_v0  ;;  %v107_v45 = vrot.slane %v2282_v2, %v2277_v1  ;;  %v208_v47 = vrot.slane %v2287_v6, %v2277_v1  ;;  %v2014_v48 = vld [vmem:[%s2688_s1 + $0x110] sm:$0xff]   ;;  %v2019_v53 = vld [vmem:[%s2688_s1 + $0x198] sm:$0xff]  }
  0x11   :  { %1825 = vmatpush3.bf16.msra.mxu1 %v1987_v15  ;;  %1804 = vmatprep.subr.bf16.mxu0 %v1988_v16  ;;  %v232_v63 = vadd.f32 %v164_v49, %v131_v56  ;;  %vm246_vm0 = vcmp.gt.f32.partialorder %v230_v59, 0.0  ;;  %v262_v3 = vmul.f32 0.2, %v230_v59  ;;  %v231_v5 = vadd.f32 %v160_v57, %v130_v61  ;;  %v2015_v49 = vld [vmem:[%s2688_s1 + $0x190] sm:$0xff]   ;;  %v2020_v54 = vld [vmem:[%s2688_s1 + $0x160] sm:$0xff]   ;;  %v2025_v60 = vld [vmem:[%s2688_s1 + $0x1e8] sm:$0xff]  }
  0x12   :  { %1826 = vmatprep.subr.bf16.mxu1 %v1989_v17  ;;  %vm245_vm2 = vcmp.gt.f32.partialorder %v229_v4, 0.0  ;;  %v261_v9 = vmul.f32 0.2, %v229_v4  ;;  %v87_v15 = vrot.slane %v2282_v2, %v2216_v31  ;;  %v2022_v56 = vld [vmem:[%s2688_s1 + $0x120] sm:$0xff]   ;;  %v2026_v61 = vld [vmem:[%s2688_s1 + $0x128] sm:$0xff]  }
  0x13   :  { %vm248_vm1 = vcmp.gt.f32.partialorder %v232_v63, 0.0  ;;  %v264_v7 = vmul.f32 0.2, %v232_v63  ;;  %v278_v8 = vsel %vm246_vm0, %v230_v59, %v262_v3  ;;  %vm247_vm3 = vcmp.gt.f32.partialorder %v231_v5, 0.0  ;;  %v2023_v57 = vld [vmem:[%s2688_s1 + $0x1a0] sm:$0xff]   ;;  %v2024_v59 = vld [vmem:[%s2688_s1 + $0x168] sm:$0xff]  }
  0x14   :  { %1805 = vmatpush3.bf16.msra.mxu0 %v1990_v18  ;;  %v294_v11 = vpack.c.bf16 %v278_v8, %v278_v8  ;;  %v263_v13 = vmul.f32 0.2, %v231_v5  ;;  %v277_v17 = vsel %vm245_vm2, %v229_v4, %v261_v9  ;;  %v2008_v18 = vld [vmem:[%s2688_s1 + $0x148] sm:$0xff]   ;;  %v2028_v3 = vld [vmem:[%s2688_s1 + $0x170] sm:$0xff]   ;;  %v71_v8 = vrot.slane %v2239_v39, %v2271_v58 }
  0x15   :  { %1827 = vmatpush3.bf16.msra.mxu1 %v1991_v19  ;;  %1806 = vmatprep.subr.bf16.mxu0 %v1992_v20  ;;  %v280_v12 = vsel %vm248_vm1, %v232_v63, %v264_v7  ;;  %v188_v19 = vrot.slane %v2287_v6, %v2216_v31  ;;  %v95_v20 = vrot.slane %v2282_v2, %v2221_v33  ;;  %v2027_v63 = vld [vmem:[%s2688_s1 + $0x1a8] sm:$0xff]   ;;  %v2029_v4 = vld [vmem:[%s2688_s1 + $0x1f0] sm:$0xff]  }
  0x16   :  { %1828 = vmatprep.subr.bf16.mxu1 %v1993_v22  ;;  %v296_v16 = vpack.c.bf16 %v280_v12, %v280_v12  ;;  %1365 = vmatprep.mubr.bf16.mxu0 %v294_v11  ;;  %v293_v21 = vpack.c.bf16 %v277_v17, %v277_v17  ;;  %v279_v22 = vsel %vm247_vm3, %v231_v5, %v263_v13  ;;  %v2030_v5 = vld [vmem:[%s2688_s1 + $0x130] sm:$0xff]  }
  0x17   :  { %v295_v26 = vpack.c.bf16 %v279_v22, %v279_v22  ;;  %v2031_v7 = vld [vmem:[%s2688_s1 + $0x1b0] sm:$0xff]   ;;  %v67_v9 = vrot.slane %v2239_v39, %v2275_v0  ;;  %v79_v12 = vrot.slane %v2239_v39, %v2273_v62  ;;  %v75_v13 = vrot.slane %v2239_v39, %v2277_v1  ;;  %v2033_v22 = vld [vmem:[%s2688_s1 + $0x1f8] sm:$0xff]  }
  0x18   :  { %1807 = vmatpush3.bf16.msra.mxu0 %v1994_v23  ;;  %v2009_v23 = vld [vmem:[%s2688_s1 + $0x1c8] sm:$0xff]   ;;  %1405 = vmatprep.mubr.bf16.mxu1 %v296_v16  ;;  %v20_v11 = vld [vmem:[%s2689_s0 + $0x10] sm:$0xff]  ;;  %v172_v17 = vrot.slane %v2246_v43, %v2271_v58 }
  0x19   :  { %1829 = vmatpush3.bf16.msra.mxu1 %v1995_v24  ;;  %1808 = vmatprep.subr.bf16.mxu0 %v1996_v25  ;;  %v196_v24 = vrot.slane %v2287_v6, %v2221_v33  ;;  %v83_v25 = vrot.slane %v2282_v2, %v2226_v35  ;;  %v31_v16 = vunpack.c.h.bf16 %v20_v11 }
  0x1a   :  { %1830 = vmatprep.subr.bf16.mxu1 %v1997_v27  ;;  %v2010_v27 = vld [vmem:[%s2688_s1 + $0x108] sm:$0xff]  }
  0x1c   :  { %1809 = vmatpush3.bf16.msra.mxu0 %v1998_v28  ;;  %v184_v28 = vrot.slane %v2287_v6, %v2226_v35  ;;  %v2070_v35 = vld [vmem:[%s2688_s1 + $0x300] sm:$0xff]  }
  0x1d   :  { %1831 = vmatpush3.bf16.msra.mxu1 %v1999_v29  ;;  %1810 = vmatprep.subr.bf16.mxu0 %v2000_v30  ;;  %v91_v29 = vrot.slane %v2282_v2, %v2231_v37  ;;  %v192_v30 = vrot.slane %v2287_v6, %v2231_v37 }
  0x1e   :  { %1832 = vmatprep.subr.bf16.mxu1 %v2001_v32  ;;  %v2011_v32 = vld [vmem:[%s2688_s1 + $0x188] sm:$0xff]  }
  0x20   :  { %1811 = vmatpush3.bf16.msra.mxu0 %v2002_v34  ;;  %v103_v34 = vrot.slane %v2282_v2, %v2271_v58 }
  0x21   :  { %1833 = vmatpush3.bf16.msra.mxu1 %v2003_v36  ;;  %1840 = vmatprep.subr.bf16.mxu0 %v2004_v50  ;;  %v204_v36 = vrot.slane %v2287_v6, %v2271_v58  ;;  %v2016_v50 = vld [vmem:[%s2688_s1 + $0x158] sm:$0xff]  }
  0x22   :  { %1862 = vmatprep.subr.bf16.mxu1 %v2005_v55  ;;  %v2021_v55 = vld [vmem:[%s2688_s1 + $0x1e0] sm:$0xff]  }
  0x23   :  { %1366 = vmatmul.mubr.bf16.vlgmr.msra.gmra.mrb[0].mxu0 %v293_v21  ;;  %v168_v21 = vrot.slane %v2246_v43, %v2275_v0 }
  0x24   :  { %1406 = vmatmul.mubr.bf16.vlgmr.msra.gmra.mrb[0].mxu1 %v295_v26  ;;  %1841 = vmatpush3.bf16.msra.mxu0 %v2006_v10  ;;  %v2032_v10 = vld [vmem:[%s2688_s1 + $0x178] sm:$0xff]   ;;  %v180_v26 = vrot.slane %v2246_v43, %v2273_v62 }
  0x25   :  { %1863 = vmatpush3.bf16.msra.mxu1 %v2007_v14  ;;  %1842 = vmatprep.subr.bf16.mxu0 %v2008_v18  ;;  %v30_v14 = vunpack.c.l.bf16 %v20_v11  ;;  %v21_v18 = vld [vmem:[%s2689_s0 + $0x18] sm:$0xff] }
  0x26   :  { %1864 = vmatprep.subr.bf16.mxu1 %v2009_v23  ;;  %v32_v39 = vunpack.c.l.bf16 %v21_v18  ;;  %v33_v23 = vunpack.c.h.bf16 %v21_v18  ;;  %v2045_v18 = vld [vmem:[%s2688_s1 + $0x2d0] sm:$0xff]  }
  0x28   :  { %1843 = vmatpush3.bf16.msra.mxu0 %v2010_v27  ;;  %v176_v27 = vrot.slane %v2246_v43, %v2277_v1  ;;  %v2036_v43 = vld [vmem:[%s2688_s1 + $0x240] sm:$0xff]  }
  0x29   :  { %1865 = vmatpush3.bf16.msra.mxu1 %v2011_v32  ;;  %1844 = vmatprep.subr.bf16.mxu0 %v2012_v41  ;;  %v2034_v32 = vld [vmem:[%s2688_s1 + $0x138] sm:$0xff]   ;;  %v133_v41 = vmul.f32 %v71_v8, %v31_v16  ;;  %v2043_v16 = vld [vmem:[%s2688_s1 + $0x288] sm:$0xff]  }
  0x2a   :  { %1866 = vmatprep.subr.bf16.mxu1 %v2013_v46  ;;  %v132_v46 = vmul.f32 %v67_v9, %v30_v14  ;;  %v2039_v9 = vld [vmem:[%s2688_s1 + $0x280] sm:$0xff]   ;;  %v2042_v14 = vld [vmem:[%s2688_s1 + $0x208] sm:$0xff]  }
  0x2c   :  { %1845 = vmatpush3.bf16.msra.mxu0 %v2014_v48  ;;  %v2035_v48 = vld [vmem:[%s2688_s1 + $0x1b8] sm:$0xff]  }
  0x2d   :  { %1867 = vmatpush3.bf16.msra.mxu1 %v2015_v49  ;;  %1846 = vmatprep.subr.bf16.mxu0 %v2016_v50  ;;  %v135_v49 = vmul.f32 %v79_v12, %v33_v23  ;;  %v134_v50 = vmul.f32 %v75_v13, %v32_v39  ;;  %v2040_v12 = vld [vmem:[%s2688_s1 + $0x248] sm:$0xff]   ;;  %v2048_v39 = vld [vmem:[%s2688_s1 + $0x258] sm:$0xff]  }
  0x2e   :  { %1868 = vmatprep.subr.bf16.mxu1 %v2017_v51  ;;  %v234_v51 = vadd.f32 %v172_v17, %v133_v41  ;;  %v2041_v13 = vld [vmem:[%s2688_s1 + $0x2c8] sm:$0xff]   ;;  %v2044_v17 = vld [vmem:[%s2688_s1 + $0x250] sm:$0xff]   ;;  %v2049_v23 = vld [vmem:[%s2688_s1 + $0x2d8] sm:$0xff]  }
  0x2f   :  { %v2053_v41 = vld [vmem:[%s2688_s1 + $0x2e0] sm:$0xff]  }
  0x30   :  { %1847 = vmatpush3.bf16.msra.mxu0 %v2018_v52  ;;  %v233_v52 = vadd.f32 %v168_v21, %v132_v46  ;;  %vm250_vm4 = vcmp.gt.f32.partialorder %v234_v51, 0.0  ;;  %v2046_v21 = vld [vmem:[%s2688_s1 + $0x210] sm:$0xff]   ;;  %v2054_v46 = vld [vmem:[%s2688_s1 + $0x220] sm:$0xff]  }
  0x31   :  { %1869 = vmatpush3.bf16.msra.mxu1 %v2019_v53  ;;  %1848 = vmatprep.subr.bf16.mxu0 %v2020_v54  ;;  %v236_v53 = vadd.f32 %v180_v26, %v135_v49  ;;  %v235_v54 = vadd.f32 %v176_v27, %v134_v50  ;;  %v2050_v26 = vld [vmem:[%s2688_s1 + $0x218] sm:$0xff]   ;;  %v2056_v49 = vld [vmem:[%s2688_s1 + $0x268] sm:$0xff]  }
  0x32   :  { %1870 = vmatprep.subr.bf16.mxu1 %v2021_v55  ;;  %v2037_v55 = vld [vmem:[%s2688_s1 + $0x2c0] sm:$0xff]   ;;  %vm249_vm5 = vcmp.gt.f32.partialorder %v233_v52, 0.0  ;;  %v2051_v27 = vld [vmem:[%s2688_s1 + $0x298] sm:$0xff]   ;;  %v2057_v50 = vld [vmem:[%s2688_s1 + $0x2e8] sm:$0xff]  }
  0x33   :  { %vm252_vm6 = vcmp.gt.f32.partialorder %v236_v53, 0.0  ;;  %vm251_vm7 = vcmp.gt.f32.partialorder %v235_v54, 0.0 }
  0x34   :  { %1849 = vmatpush3.bf16.msra.mxu0 %v2022_v56  ;;  %v266_v56 = vmul.f32 0.2, %v234_v51 }
  0x35   :  { %1871 = vmatpush3.bf16.msra.mxu1 %v2023_v57  ;;  %1850 = vmatprep.subr.bf16.mxu0 %v2024_v59  ;;  %v265_v57 = vmul.f32 0.2, %v233_v52  ;;  %v268_v59 = vmul.f32 0.2, %v236_v53 }
  0x36   :  { %1872 = vmatprep.subr.bf16.mxu1 %v2025_v60  ;;  %v267_v60 = vmul.f32 0.2, %v235_v54 }
  0x38   :  { %1851 = vmatpush3.bf16.msra.mxu0 %v2026_v61  ;;  %v282_v61 = vsel %vm250_vm4, %v234_v51, %v266_v56  ;;  %v283_v8 = vsel %vm251_vm7, %v235_v54, %v267_v60  ;;  %v2058_v51 = vld [vmem:[%s2688_s1 + $0x228] sm:$0xff]   ;;  %v2062_v54 = vld [vmem:[%s2688_s1 + $0x230] sm:$0xff]   ;;  %v2064_v56 = vld [vmem:[%s2688_s1 + $0x278] sm:$0xff]  }
  0x39   :  { %1873 = vmatpush3.bf16.msra.mxu1 %v2027_v63  ;;  %1852 = vmatprep.subr.bf16.mxu0 %v2028_v3  ;;  %v281_v63 = vsel %vm249_vm5, %v233_v52, %v265_v57  ;;  %v2038_v3 = vld [vmem:[%s2688_s1 + $0x200] sm:$0xff]   ;;  %v299_v11 = vpack.c.bf16 %v283_v8, %v283_v8  ;;  %v2059_v52 = vld [vmem:[%s2688_s1 + $0x2a8] sm:$0xff]   ;;  %v2065_v60 = vld [vmem:[%s2688_s1 + $0x2f8] sm:$0xff]  }
  0x3a   :  { %1874 = vmatprep.subr.bf16.mxu1 %v2029_v4  ;;  %v298_v4 = vpack.c.bf16 %v282_v61, %v282_v61  ;;  %v22_v57 = vld [vmem:[%s2689_s0 + $0x20] sm:$0xff] }
  0x3b   :  { %v34_v61 = vunpack.c.l.bf16 %v22_v57 }
  0x3c   :  { %1853 = vmatpush3.bf16.msra.mxu0 %v2030_v5  ;;  %v284_v5 = vsel %vm252_vm6, %v236_v53, %v268_v59  ;;  %1445 = vmatprep.mubr.bf16.mxu0 %v298_v4  ;;  %v2061_v53 = vld [vmem:[%s2688_s1 + $0x2f0] sm:$0xff]   ;;  %v23_v59 = vld [vmem:[%s2689_s0 + $0x28] sm:$0xff] }
  0x3d   :  { %1875 = vmatpush3.bf16.msra.mxu1 %v2031_v7  ;;  %1854 = vmatprep.subr.bf16.mxu0 %v2032_v10  ;;  %v297_v7 = vpack.c.bf16 %v281_v63, %v281_v63  ;;  %v300_v10 = vpack.c.bf16 %v284_v5, %v284_v5  ;;  %v35_v63 = vunpack.c.h.bf16 %v22_v57  ;;  %v37_v4 = vunpack.c.h.bf16 %v23_v59  ;;  %v2066_v5 = vld [vmem:[%s2688_s1 + $0x238] sm:$0xff]   ;;  %v2089_v57 = vld [vmem:[%s2688_s1 + $0x3e8] sm:$0xff]  }
  0x3e   :  { %1876 = vmatprep.subr.bf16.mxu1 %v2033_v22  ;;  %v2047_v22 = vld [vmem:[%s2688_s1 + $0x290] sm:$0xff]  }
  0x3f   :  { %1485 = vmatprep.mubr.bf16.mxu1 %v300_v10  ;;  %v137_v8 = vmul.f32 %v87_v15, %v35_v63  ;;  %v136_v10 = vmul.f32 %v83_v25, %v34_v61  ;;  %v2092_v61 = vld [vmem:[%s2688_s1 + $0x370] sm:$0xff]  }
  0x40   :  { %1855 = vmatpush3.bf16.msra.mxu0 %v2034_v32  ;;  %v2052_v32 = vld [vmem:[%s2688_s1 + $0x260] sm:$0xff]   ;;  %v2093_v63 = vld [vmem:[%s2688_s1 + $0x3f0] sm:$0xff]  }
  0x41   :  { %1877 = vmatpush3.bf16.msra.mxu1 %v2035_v48  ;;  %1884 = vmatprep.subr.bf16.mxu0 %v2036_v43  ;;  %v2055_v48 = vld [vmem:[%s2688_s1 + $0x2a0] sm:$0xff]   ;;  %v2060_v43 = vld [vmem:[%s2688_s1 + $0x270] sm:$0xff]   ;;  %v238_v15 = vadd.f32 %v188_v19, %v137_v8  ;;  %v237_v25 = vadd.f32 %v184_v28, %v136_v10 }
  0x42   :  { %1906 = vmatprep.subr.bf16.mxu1 %v2037_v55  ;;  %v2063_v55 = vld [vmem:[%s2688_s1 + $0x2b0] sm:$0xff]  }
  0x43   :  { %1446 = vmatmul.mubr.bf16.vlgmr.msra.gmra.mrb[4].mxu0 %v297_v7  ;;  %v2067_v7 = vld [vmem:[%s2688_s1 + $0x2b8] sm:$0xff]   ;;  %vm254_vm8 = vcmp.gt.f32.partialorder %v238_v15, 0.0  ;;  %v270_v31 = vmul.f32 0.2, %v238_v15  ;;  %vm253_vm10 = vcmp.gt.f32.partialorder %v237_v25, 0.0  ;;  %v24_v8 = vld [vmem:[%s2689_s0 + $0x30] sm:$0xff] }
  0x44   :  { %1486 = vmatmul.mubr.bf16.vlgmr.msra.gmra.mrb[4].mxu1 %v299_v11  ;;  %1885 = vmatpush3.bf16.msra.mxu0 %v2038_v3  ;;  %v36_v3 = vunpack.c.l.bf16 %v23_v59  ;;  %v269_v33 = vmul.f32 0.2, %v237_v25  ;;  %v2090_v59 = vld [vmem:[%s2688_s1 + $0x328] sm:$0xff]   ;;  %v38_v10 = vunpack.c.l.bf16 %v24_v8 }
  0x45   :  { %1907 = vmatpush3.bf16.msra.mxu1 %v2039_v9  ;;  %1886 = vmatprep.subr.bf16.mxu0 %v2040_v12  ;;  %v139_v9 = vmul.f32 %v95_v20, %v37_v4  ;;  %v2068_v12 = vld [vmem:[%s2688_s1 + $0x340] sm:$0xff]   ;;  %v286_v37 = vsel %vm254_vm8, %v238_v15, %v270_v31  ;;  %v2095_v4 = vld [vmem:[%s2688_s1 + $0x3b0] sm:$0xff]  }
  0x46   :  { %1908 = vmatprep.subr.bf16.mxu1 %v2041_v13  ;;  %v138_v11 = vmul.f32 %v91_v29, %v36_v3  ;;  %v2069_v13 = vld [vmem:[%s2688_s1 + $0x3c0] sm:$0xff]   ;;  %v2094_v3 = vld [vmem:[%s2688_s1 + $0x330] sm:$0xff]   ;;  %v140_v31 = vmul.f32 %v99_v42, %v38_v10 }
  0x47   :  { %v240_v20 = vadd.f32 %v196_v24, %v139_v9  ;;  %v25_v9 = vld [vmem:[%s2689_s0 + $0x38] sm:$0xff] }
  0x48   :  { %1887 = vmatpush3.bf16.msra.mxu0 %v2042_v14  ;;  %v239_v29 = vadd.f32 %v192_v30, %v138_v11  ;;  %v2071_v30 = vld [vmem:[%s2688_s1 + $0x380] sm:$0xff]   ;;  %v302_v14 = vpack.c.bf16 %v286_v37, %v286_v37  ;;  %v39_v11 = vunpack.c.h.bf16 %v24_v8  ;;  %v41_v15 = vunpack.c.h.bf16 %v25_v9 }
  0x49   :  { %1909 = vmatpush3.bf16.msra.mxu1 %v2043_v16  ;;  %1888 = vmatprep.subr.bf16.mxu0 %v2044_v17  ;;  %vm256_vm9 = vcmp.gt.f32.partialorder %v240_v20, 0.0  ;;  %v272_v19 = vmul.f32 0.2, %v240_v20  ;;  %v285_v17 = vsel %vm253_vm10, %v237_v25, %v269_v33  ;;  %v2099_v25 = vld [vmem:[%s2688_s1 + $0x3b8] sm:$0xff]  }
  0x4a   :  { %1910 = vmatprep.subr.bf16.mxu1 %v2045_v18  ;;  %vm255_vm11 = vcmp.gt.f32.partialorder %v239_v29, 0.0  ;;  %v271_v24 = vmul.f32 0.2, %v239_v29  ;;  %1525 = vmatprep.mubr.bf16.mxu0 %v302_v14 }
  0x4b   :  { %v288_v28 = vsel %vm256_vm9, %v240_v20, %v272_v19  ;;  %v2098_v20 = vld [vmem:[%s2688_s1 + $0x338] sm:$0xff]  }
  0x4c   :  { %1889 = vmatpush3.bf16.msra.mxu0 %v2046_v21  ;;  %v304_v16 = vpack.c.bf16 %v288_v28, %v288_v28  ;;  %v287_v18 = vsel %vm255_vm11, %v239_v29, %v271_v24  ;;  %v2072_v21 = vld [vmem:[%s2688_s1 + $0x348] sm:$0xff]   ;;  %v141_v29 = vmul.f32 %v103_v34, %v39_v11 }
  0x4d   :  { %1911 = vmatpush3.bf16.msra.mxu1 %v2047_v22  ;;  %1890 = vmatprep.subr.bf16.mxu0 %v2048_v39  ;;  %v301_v22 = vpack.c.bf16 %v285_v17, %v285_v17  ;;  %v303_v39 = vpack.c.bf16 %v287_v18, %v287_v18 }
  0x4e   :  { %1912 = vmatprep.subr.bf16.mxu1 %v2049_v23  ;;  %v2073_v23 = vld [vmem:[%s2688_s1 + $0x3c8] sm:$0xff]   ;;  %1565 = vmatprep.mubr.bf16.mxu1 %v304_v16  ;;  %v242_v33 = vadd.f32 %v204_v36, %v141_v29 }
  0x50   :  { %1891 = vmatpush3.bf16.msra.mxu0 %v2050_v26  ;;  %v2074_v26 = vld [vmem:[%s2688_s1 + $0x308] sm:$0xff]   ;;  %vm258_vm12 = vcmp.gt.f32.partialorder %v242_v33, 0.0  ;;  %v274_v2 = vmul.f32 0.2, %v242_v33 }
  0x51   :  { %1913 = vmatpush3.bf16.msra.mxu1 %v2051_v27  ;;  %1892 = vmatprep.subr.bf16.mxu0 %v2052_v32  ;;  %v2075_v27 = vld [vmem:[%s2688_s1 + $0x388] sm:$0xff]   ;;  %v2076_v32 = vld [vmem:[%s2688_s1 + $0x350] sm:$0xff]  }
  0x52   :  { %1914 = vmatprep.subr.bf16.mxu1 %v2053_v41  ;;  %v2077_v41 = vld [vmem:[%s2688_s1 + $0x3d0] sm:$0xff]   ;;  %v290_v62 = vsel %vm258_vm12, %v242_v33, %v274_v2 }
  0x53   :  { %v306_v24 = vpack.c.bf16 %v290_v62, %v290_v62 }
  0x54   :  { %1893 = vmatpush3.bf16.msra.mxu0 %v2054_v46  ;;  %v2078_v46 = vld [vmem:[%s2688_s1 + $0x310] sm:$0xff]  }
  0x55   :  { %1915 = vmatpush3.bf16.msra.mxu1 %v2055_v48  ;;  %1894 = vmatprep.subr.bf16.mxu0 %v2056_v49  ;;  %v2079_v48 = vld [vmem:[%s2688_s1 + $0x390] sm:$0xff]   ;;  %v2080_v49 = vld [vmem:[%s2688_s1 + $0x358] sm:$0xff]  }
  0x56   :  { %1916 = vmatprep.subr.bf16.mxu1 %v2057_v50  ;;  %v2081_v50 = vld [vmem:[%s2688_s1 + $0x3d8] sm:$0xff]  }
  0x58   :  { %1895 = vmatpush3.bf16.msra.mxu0 %v2058_v51  ;;  %v2082_v51 = vld [vmem:[%s2688_s1 + $0x318] sm:$0xff]  }
  0x59   :  { %1917 = vmatpush3.bf16.msra.mxu1 %v2059_v52  ;;  %1896 = vmatprep.subr.bf16.mxu0 %v2060_v43  ;;  %v2083_v52 = vld [vmem:[%s2688_s1 + $0x398] sm:$0xff]   ;;  %v2084_v43 = vld [vmem:[%s2688_s1 + $0x360] sm:$0xff]  }
  0x5a   :  { %1918 = vmatprep.subr.bf16.mxu1 %v2061_v53  ;;  %v2085_v53 = vld [vmem:[%s2688_s1 + $0x3e0] sm:$0xff]  }
  0x5c   :  { %1897 = vmatpush3.bf16.msra.mxu0 %v2062_v54  ;;  %v2086_v54 = vld [vmem:[%s2688_s1 + $0x320] sm:$0xff]  }
  0x5d   :  { %1919 = vmatpush3.bf16.msra.mxu1 %v2063_v55  ;;  %1898 = vmatprep.subr.bf16.mxu0 %v2064_v56  ;;  %v2087_v55 = vld [vmem:[%s2688_s1 + $0x3a0] sm:$0xff]   ;;  %v2088_v56 = vld [vmem:[%s2688_s1 + $0x368] sm:$0xff]  }
  0x5e   :  { %1920 = vmatprep.subr.bf16.mxu1 %v2065_v60  ;;  %v2091_v60 = vld [vmem:[%s2688_s1 + $0x3a8] sm:$0xff]  }
  0x60   :  { %1899 = vmatpush3.bf16.msra.mxu0 %v2066_v5  ;;  %v2096_v5 = vld [vmem:[%s2688_s1 + $0x378] sm:$0xff]  }
  0x61   :  { %1921 = vmatpush3.bf16.msra.mxu1 %v2067_v7  ;;  %1928 = vmatprep.subr.bf16.mxu0 %v2068_v12  ;;  %v2097_v7 = vld [vmem:[%s2688_s1 + $0x3f8] sm:$0xff]   ;;  %v40_v12 = vunpack.c.l.bf16 %v25_v9 }
  0x62   :  { %1950 = vmatprep.subr.bf16.mxu1 %v2069_v13  ;;  %v143_v13 = vmul.f32 %v111_v38, %v41_v15  ;;  %v241_v38 = vadd.f32 %v200_v44, %v140_v31 }
  0x63   :  { %1526 = vmatmul.mubr.bf16.vlgmr.msra.gmra.mrb[8].mxu0 %v301_v22  ;;  %v142_v19 = vmul.f32 %v107_v45, %v40_v12 }
  0x64   :  { %1566 = vmatmul.mubr.bf16.vlgmr.msra.gmra.mrb[8].mxu1 %v303_v39  ;;  %1929 = vmatpush3.bf16.msra.mxu0 %v2070_v35  ;;  %v244_v34 = vadd.f32 %v212_v40, %v143_v13  ;;  %vm257_vm14 = vcmp.gt.f32.partialorder %v241_v38, 0.0  ;;  %v273_v58 = vmul.f32 0.2, %v241_v38 }
  0x65   :  { %1951 = vmatpush3.bf16.msra.mxu1 %v2071_v30  ;;  %1930 = vmatprep.subr.bf16.mxu0 %v2072_v21  ;;  %v243_v42 = vadd.f32 %v208_v47, %v142_v19 }
  0x66   :  { %1952 = vmatprep.subr.bf16.mxu1 %v2073_v23  ;;  %vm260_vm13 = vcmp.gt.f32.partialorder %v244_v34, 0.0  ;;  %v276_v45 = vmul.f32 0.2, %v244_v34  ;;  %v289_v0 = vsel %vm257_vm14, %v241_v38, %v273_v58  ;;  %1605 = vmatprep.mubr.bf16.mxu0 %v306_v24 }
  0x67   :  { %vm259_vm15 = vcmp.gt.f32.partialorder %v243_v42, 0.0  ;;  %v275_v36 = vmul.f32 0.2, %v243_v42  ;;  %v305_v37 = vpack.c.bf16 %v289_v0, %v289_v0 }
  0x68   :  { %1931 = vmatpush3.bf16.msra.mxu0 %v2074_v26  ;;  %v292_v40 = vsel %vm260_vm13, %v244_v34, %v276_v45 }
  0x69   :  { %1953 = vmatpush3.bf16.msra.mxu1 %v2075_v27  ;;  %1932 = vmatprep.subr.bf16.mxu0 %v2076_v32  ;;  %v308_v35 = vpack.c.bf16 %v292_v40, %v292_v40  ;;  %v291_v44 = vsel %vm259_vm15, %v243_v42, %v275_v36 }
  0x6a   :  { %1954 = vmatprep.subr.bf16.mxu1 %v2077_v41  ;;  %v307_v28 = vpack.c.bf16 %v291_v44, %v291_v44 }
  0x6b   :  { %1645 = vmatprep.mubr.bf16.mxu1 %v308_v35 }
  0x6c   :  { %1933 = vmatpush3.bf16.msra.mxu0 %v2078_v46 }
  0x6d   :  { %1955 = vmatpush3.bf16.msra.mxu1 %v2079_v48  ;;  %1934 = vmatprep.subr.bf16.mxu0 %v2080_v49 }
  0x6e   :  { %1956 = vmatprep.subr.bf16.mxu1 %v2081_v50 }
  0x70   :  { %1935 = vmatpush3.bf16.msra.mxu0 %v2082_v51 }
  0x71   :  { %1957 = vmatpush3.bf16.msra.mxu1 %v2083_v52  ;;  %1936 = vmatprep.subr.bf16.mxu0 %v2084_v43 }
  0x72   :  { %1958 = vmatprep.subr.bf16.mxu1 %v2085_v53 }
  0x74   :  { %1937 = vmatpush3.bf16.msra.mxu0 %v2086_v54 }
  0x75   :  { %1959 = vmatpush3.bf16.msra.mxu1 %v2087_v55  ;;  %1938 = vmatprep.subr.bf16.mxu0 %v2088_v56 }
  0x76   :  { %1960 = vmatprep.subr.bf16.mxu1 %v2089_v57 }
  0x78   :  { %1939 = vmatpush3.bf16.msra.mxu0 %v2090_v59 }
  0x79   :  { %1961 = vmatpush3.bf16.msra.mxu1 %v2091_v60  ;;  %1940 = vmatprep.subr.bf16.mxu0 %v2092_v61 }
  0x7a   :  { %1962 = vmatprep.subr.bf16.mxu1 %v2093_v63 }
  0x7c   :  { %1941 = vmatpush3.bf16.msra.mxu0 %v2094_v3 }
  0x7d   :  { %1963 = vmatpush3.bf16.msra.mxu1 %v2095_v4  ;;  %1942 = vmatprep.subr.bf16.mxu0 %v2096_v5 }
  0x7e   :  { %1964 = vmatprep.subr.bf16.mxu1 %v2097_v7 }
  0x80   :  { %1943 = vmatpush3.bf16.msra.mxu0 %v2098_v20 }
  0x81   :  { %1965 = vmatpush3.bf16.msra.mxu1 %v2099_v25 }
  0x83   :  { %1606 = vmatmul.mubr.bf16.vlgmr.msra.gmra.mrb[12].mxu0 %v305_v37 }
  0x84   :  { %1646 = vmatmul.mubr.bf16.vlgmr.msra.gmra.mrb[12].mxu1 %v307_v28 }
  0xf6   :  { %v1812_v1 = vpop.f32.mrb[0].mxu0 }
  0xf7   :  { %v1834_v6 = vpop.f32.mrb[0].mxu1  ;;  %v1813_v47 = vpop.f32.mrb[1].mxu0 }
  0xf8   :  { %v1814_v30 = vadd.f32 %v1813_v47, %v1812_v1  ;;  %v1835_v14 = vpop.f32.mrb[1].mxu1  ;;  %v1815_v16 = vpop.f32.mrb[2].mxu0 }
  0xf9   :  { %v1836_v17 = vadd.f32 %v1835_v14, %v1834_v6  ;;  %v1837_v18 = vpop.f32.mrb[2].mxu1  ;;  %v1816_v21 = vpop.f32.mrb[3].mxu0 }
  0xfa   :  { %v1838_v22 = vpop.f32.mrb[3].mxu1 }
  0xfb   :  { %v1408_v39 = vadd.f32 %v1836_v17, %v1814_v30 }
 0x116   :  { %v1856_v23 = vpop.f32.mrb[4].mxu0 }
 0x117   :  { %v1878_v26 = vpop.f32.mrb[4].mxu1  ;;  %v1857_v27 = vpop.f32.mrb[5].mxu0 }
 0x118   :  { %v1858_v32 = vadd.f32 %v1857_v27, %v1856_v23  ;;  %v1879_v41 = vpop.f32.mrb[5].mxu1  ;;  %v1859_v46 = vpop.f32.mrb[6].mxu0 }
 0x119   :  { %v1880_v48 = vadd.f32 %v1879_v41, %v1878_v26  ;;  %v1881_v49 = vpop.f32.mrb[6].mxu1  ;;  %v1860_v50 = vpop.f32.mrb[7].mxu0 }
 0x11a   :  { %v1448_v51 = vadd.f32 %v1858_v32, %v1408_v39  ;;  %v1882_v52 = vpop.f32.mrb[7].mxu1 }
 0x11c   :  { %v1488_v43 = vadd.f32 %v1880_v48, %v1448_v51 }
 0x136   :  { %v1900_v53 = vpop.f32.mrb[8].mxu0 }
 0x137   :  { %v1922_v54 = vpop.f32.mrb[8].mxu1  ;;  %v1901_v55 = vpop.f32.mrb[9].mxu0 }
 0x138   :  { %v1923_v56 = vpop.f32.mrb[9].mxu1  ;;  %v1902_v57 = vadd.f32 %v1901_v55, %v1900_v53  ;;  %v1903_v60 = vpop.f32.mrb[10].mxu0 }
 0x139   :  { %v1924_v59 = vadd.f32 %v1923_v56, %v1922_v54  ;;  %v1925_v61 = vpop.f32.mrb[10].mxu1  ;;  %v1904_v63 = vpop.f32.mrb[11].mxu0 }
 0x13a   :  { %v1926_v3 = vpop.f32.mrb[11].mxu1  ;;  %v1528_v4 = vadd.f32 %v1902_v57, %v1488_v43 }
 0x13c   :  { %v1568_v5 = vadd.f32 %v1924_v59, %v1528_v4 }
 0x156   :  { %v1944_v7 = vpop.f32.mrb[12].mxu0 }
 0x157   :  { %v1966_v8 = vpop.f32.mrb[12].mxu1  ;;  %v1945_v9 = vpop.f32.mrb[13].mxu0 }
 0x158   :  { %v1967_v10 = vpop.f32.mrb[13].mxu1  ;;  %v1946_v11 = vadd.f32 %v1945_v9, %v1944_v7  ;;  %v1947_v15 = vpop.f32.mrb[14].mxu0 }
 0x159   :  { %v1968_v12 = vadd.f32 %v1967_v10, %v1966_v8  ;;  %v1969_v20 = vpop.f32.mrb[14].mxu1  ;;  %v1948_v25 = vpop.f32.mrb[15].mxu0 }
 0x15a   :  { %v1970_v29 = vpop.f32.mrb[15].mxu1  ;;  %v1608_v13 = vadd.f32 %v1946_v11, %v1568_v5 }
 0x15c   :  { %v1648_v31 = vadd.f32 %v1968_v12, %v1608_v13 }
 0x15e   :  { %v1653_v19 = vand.u32 2147483647, %v1648_v31  ;;  %vm1657_vm0 = vcmp.ge.f32.partialorder %v1648_v31, 0.0 }
 0x160   :  { %v1654_v33 = vsub.f32 0.0, %v1653_v19 }
 0x162   :  { %v1655_v34 = vmul.f32 1.442695, %v1654_v33 }
 0x164   :  { %2100 = vpow2.f32 %v1655_v34 }
 0x16e   :  { %v2101_v38 = vpop.eup %2100 }
 0x16f   :  { %v1658_v42 = vadd.f32 1.0, %v2101_v38 }
 0x171   :  { %2102 = vrcp.f32 %v1658_v42 }
 0x17b   :  { %v2103_v2 = vpop.eup %2102 }
 0x17c   :  { %v1661_v45 = vmul.f32 %v2103_v2, %v2101_v38 }
 0x17e   :  { %v1662_v58 = vsel %vm1657_vm0, %v2103_v2, %v1661_v45 }
 0x17f   :  { %1663 = vst [vmem:[%s2692_s4] sm:$0xff] %v1662_v58 }

</bundles_post_ra>
